<compile_context>
chip_gen: v6e
topology: v6e:2x2x1
jax: 0.10.0
libtpu: 0.0.40
codegen_flags: <defaults>
</compile_context>

<pallas_src>
import numpy as np
import jax
import jax.numpy as jnp
from jax.experimental import pallas as pl
from jax.experimental.pallas import tpu as pltpu


# ---------------------------------------------------------------------------
# Glue: deterministic constant matrices (windowed DFT basis, mel filterbank)
# ---------------------------------------------------------------------------
def _round_up(x, m):
    return ((x + m - 1) // m) * m


def _hann_window(n_fft):
    # torch.hann_window(n_fft, periodic=True)
    return 0.5 - 0.5 * np.cos(2.0 * np.pi * np.arange(n_fft) / n_fft)


def _dft_cs_matrix(n_fft, n_bins):
    """Fused windowed real-DFT basis [C | S]: frames @ CS -> [Re | Im]."""
    n = np.arange(n_fft, dtype=np.float64)[:, None]
    k = np.arange(n_bins, dtype=np.float64)[None, :]
    ang = 2.0 * np.pi * n * k / n_fft
    w = _hann_window(n_fft)[:, None]
    C = w * np.cos(ang)
    S = -w * np.sin(ang)
    return np.concatenate([C, S], axis=1).astype(np.float32)   # (n_fft, 2*n_bins)


def _mel_filterbank_full(sample_rate, n_fft, n_mels):
    """torchaudio.functional.melscale_fbanks (htk, norm=None): (n_fft//2+1, n_mels)."""
    n_freq = n_fft // 2 + 1
    f_max = sample_rate / 2.0
    all_freqs = np.linspace(0.0, f_max, n_freq)

    def hz_to_mel(f):
        return 2595.0 * np.log10(1.0 + f / 700.0)

    def mel_to_hz(m):
        return 700.0 * (10.0 ** (m / 2595.0) - 1.0)

    m_pts = np.linspace(hz_to_mel(0.0), hz_to_mel(f_max), n_mels + 2)
    f_pts = mel_to_hz(m_pts)
    f_diff = f_pts[1:] - f_pts[:-1]                      # (n_mels+1,)
    slopes = f_pts[None, :] - all_freqs[:, None]         # (n_freq, n_mels+2)
    down = -slopes[:, :-2] / f_diff[:-1]
    up = slopes[:, 2:] / f_diff[1:]
    fb = np.maximum(0.0, np.minimum(down, up))           # (n_freq, n_mels)
    return fb.astype(np.float32)


# ---------------------------------------------------------------------------
# Pallas kernel: fused windowed DFT -> magnitude -> mel -> safe_log -> |diff| sums
# ---------------------------------------------------------------------------
def _mel_l1_kernel(x_ref, cs_ref, fb_ref, out_ref):
    rt2 = x_ref.shape[0]                                 # 2 * row_tile (static)
    rt = rt2 // 2
    n_bins = cs_ref.shape[1] // 2                        # 512

    # One MXU pass for both inputs (pre-stacked) and both cos/sin bases (fused RHS).
    rei = jnp.dot(x_ref[...], cs_ref[...], preferred_element_type=jnp.float32)
    re = rei[:, :n_bins]                                 # lane-aligned static slices
    im = rei[:, n_bins:]
    mag = jnp.sqrt(re * re + im * im)                    # power = 1 (magnitude)

    mel = jnp.dot(mag, fb_ref[...], preferred_element_type=jnp.float32)
    logmel = jnp.log(jnp.maximum(mel, 1e-7))             # safe_log

    diff = jnp.abs(logmel[:rt, :] - logmel[rt:, :])      # (rt, mel_pad)
    # (8, mel_pad) partial sum: VPU adds across sublane-tile-aligned groups,
    # full-vreg unmasked store; the 8-row finish happens in the outer jnp.sum.
    out_ref[...] = jnp.sum(diff.reshape(rt // 8, 8, diff.shape[1]), axis=0)


def mel_spec_reconstruction_loss(y_hat, y, *, sample_rate=24000, n_fft=1024,
                                 hop_length=256, n_mels=100, row_tile=128):
    assert y_hat.shape == y.shape and y_hat.ndim == 2
    B, T = y_hat.shape

    pad = n_fft // 2
    num_frames = 1 + T // hop_length
    n_freq = n_fft // 2 + 1
    freq_dim = n_fft // 2                 # 512: Nyquist bin dropped (zero mel weight)
    mel_pad = _round_up(n_mels, 128)      # 100 -> 128

    # Constants (windowed DFT basis fused [C|S], mel filterbank).
    CS = _dft_cs_matrix(n_fft, freq_dim)                          # (1024, 1024)
    fb_full = _mel_filterbank_full(sample_rate, n_fft, n_mels)    # (513, 100)
    # Exactness guard for dropping DC/Nyquist dead bins (HTK, f_min=0, f_max=sr/2, norm=None).
    assert np.all(np.abs(fb_full[0]) < 1e-6) and np.all(np.abs(fb_full[n_freq - 1]) < 1e-6)
    FB = np.zeros((freq_dim, mel_pad), dtype=np.float32)
    FB[:, :n_mels] = fb_full[:freq_dim]
    CS, FB = jnp.asarray(CS), jnp.asarray(FB)

    rows = B * num_frames
    # Fill the MXU (2*row_tile = 256 on v6e/v7x) but keep >= 2 grid tiles for the
    # "parallel" axis so both v7x TensorCores get work on short inputs.
    if rows < 2 * row_tile:
        row_tile = max(8, _round_up(pl.cdiv(rows, 2), 8))
    assert row_tile % 8 == 0
    rows_pad = _round_up(rows, row_tile)
    num_tiles = rows_pad // row_tile

    # Framing (center=True, reflect pad) in plain-JAX glue; window folded into CS.
    idx = (np.arange(num_frames)[:, None] * hop_length
           + np.arange(n_fft)[None, :]).astype(np.int32)
    idx = jnp.asarray(idx)

    def frame(x):
        xp = jnp.pad(x, ((0, 0), (pad, pad)), mode="reflect")
        fr = xp[:, idx].reshape(rows, n_fft).astype(jnp.float32)
        return jnp.pad(fr, ((0, rows_pad - rows), (0, 0)))        # zero rows -> 0 loss

    fr_hat = frame(y_hat)
    fr = frame(y)

    # Pre-stack per tile: tile i = [y_hat rows | y rows] -> no in-kernel concat.
    frames = jnp.concatenate(
        [fr_hat.reshape(num_tiles, row_tile, n_fft),
         fr.reshape(num_tiles, row_tile, n_fft)], axis=1,
    ).reshape(num_tiles * 2 * row_tile, n_fft)

    partials = pl.pallas_call(
        _mel_l1_kernel,
        out_shape=jax.ShapeDtypeStruct((8, num_tiles * mel_pad), jnp.float32),
        grid=(num_tiles,),
        in_specs=[
            pl.BlockSpec((2 * row_tile, n_fft), lambda i: (i, 0)),
            pl.BlockSpec((n_fft, 2 * freq_dim), lambda i: (0, 0)),   # constants:
            pl.BlockSpec((freq_dim, mel_pad), lambda i: (0, 0)),     # fetched once
        ],
        out_specs=pl.BlockSpec((8, mel_pad), lambda i: (0, i)),
        compiler_params=pltpu.CompilerParams(
            dimension_semantics=("parallel",),          # shard tiles across TCs
            vmem_limit_bytes=32 * 1024 * 1024,          # ~14 MiB working set + slack
        ),
    )(frames, CS, FB)

    count = B * n_mels * num_frames                      # F.l1_loss 'mean'
    return jnp.sum(partials) / count


# ---------------------------------------------------------------------------
if __name__ == "__main__":
    B, T = 2, 4096
    N_FFT, HOP, N_MELS, SR = 1024, 256, 100, 24000

    key = jax.random.PRNGKey(0)
    k1, k2 = jax.random.split(key)
    y_hat = 0.5 * jax.random.normal(k1, (B, T), dtype=jnp.float32)
    y = 0.5 * jax.random.normal(k2, (B, T), dtype=jnp.float32)

    loss = mel_spec_reconstruction_loss(
        y_hat, y, sample_rate=SR, n_fft=N_FFT, hop_length=HOP, n_mels=N_MELS)
    jax.block_until_ready(loss)

    # Pure-JAX reference of the same module (rfft-based, full 513-bin filterbank).
    pad = N_FFT // 2
    num_frames = 1 + T // HOP
    idx = jnp.asarray(np.arange(num_frames)[:, None] * HOP
                      + np.arange(N_FFT)[None, :])
    win = jnp.asarray(_hann_window(N_FFT), dtype=jnp.float32)
    fb_full = jnp.asarray(_mel_filterbank_full(SR, N_FFT, N_MELS))   # (513, 100)

    def ref_logmel(x):
        xp = jnp.pad(x, ((0, 0), (pad, pad)), mode="reflect")
        fr = xp[:, idx] * win                                   # (B, F, n_fft)
        spec = jnp.abs(jnp.fft.rfft(fr, axis=-1)).astype(jnp.float32)
        mel = spec @ fb_full                                    # (B, F, n_mels)
        return jnp.log(jnp.maximum(mel, 1e-7))

    ref = jnp.mean(jnp.abs(ref_logmel(y) - ref_logmel(y_hat)))
    assert jnp.allclose(loss, ref, atol=2e-3, rtol=2e-3), (loss, ref)

    print("KERNEL_OK")
</pallas_src>

<mosaic_0001>
module attributes {stable_mosaic.version = 11 : i64} {
  func.func @_mel_l1_kernel(%arg0: i32, %arg1: memref<48x1024xf32, #tpu.memory_space<vmem>>, %arg2: memref<1024x1024xf32, #tpu.memory_space<vmem>>, %arg3: memref<512x128xf32, #tpu.memory_space<vmem>>, %arg4: memref<8x128xf32, #tpu.memory_space<vmem>>) attributes {dimension_semantics = [#tpu.dimension_semantics<parallel>], iteration_bounds = array<i64: 2>, scalar_prefetch = 0 : i64, scratch_operands = 0 : i64, tpu.core_type = #tpu.core_type<tc>, window_params = [{transform_indices = @transform_0, window_bounds = array<i64: 48, 1024>}, {pipeline_mode = #tpu.pipeline_mode<synchronous>, transform_indices = @transform_1, window_bounds = array<i64: 1024, 1024>}, {pipeline_mode = #tpu.pipeline_mode<synchronous>, transform_indices = @transform_2, window_bounds = array<i64: 512, 128>}, {transform_indices = @transform_3, window_bounds = array<i64: 8, 128>}]} {
    %c0 = arith.constant 0 : index
    %c0_0 = arith.constant 0 : index
    %0 = vector.load %arg1[%c0, %c0_0] : memref<48x1024xf32, #tpu.memory_space<vmem>>, vector<48x1024xf32>
    %c0_1 = arith.constant 0 : index
    %c0_2 = arith.constant 0 : index
    %1 = vector.load %arg2[%c0_1, %c0_2] : memref<1024x1024xf32, #tpu.memory_space<vmem>>, vector<1024x1024xf32>
    %cst = arith.constant dense<0.000000e+00> : vector<48x1024xf32>
    %2 = tpu.matmul %0, %1, %cst {dimension_numbers = #tpu.dot_dimension_numbers<[1], [0], [0], [1], [0, 0, 1, 1], [], []>} : vector<48x1024xf32>, vector<1024x1024xf32>, vector<48x1024xf32> -> vector<48x1024xf32>
    %3 = vector.extract_strided_slice %2 {offsets = [0, 0], sizes = [48, 512], strides = [1, 1]} : vector<48x1024xf32> to vector<48x512xf32>
    %4 = vector.extract_strided_slice %2 {offsets = [0, 512], sizes = [48, 512], strides = [1, 1]} : vector<48x1024xf32> to vector<48x512xf32>
    %5 = arith.mulf %3, %3 : vector<48x512xf32>
    %6 = arith.mulf %4, %4 : vector<48x512xf32>
    %7 = arith.addf %5, %6 : vector<48x512xf32>
    %8 = math.sqrt %7 : vector<48x512xf32>
    %c0_3 = arith.constant 0 : index
    %c0_4 = arith.constant 0 : index
    %9 = vector.load %arg3[%c0_3, %c0_4] : memref<512x128xf32, #tpu.memory_space<vmem>>, vector<512x128xf32>
    %cst_5 = arith.constant dense<0.000000e+00> : vector<48x128xf32>
    %10 = tpu.matmul %8, %9, %cst_5 {dimension_numbers = #tpu.dot_dimension_numbers<[1], [0], [0], [1], [0, 0, 1, 1], [], []>} : vector<48x512xf32>, vector<512x128xf32>, vector<48x128xf32> -> vector<48x128xf32>
    %cst_6 = arith.constant 1.000000e-07 : f32
    %11 = vector.broadcast %cst_6 : f32 to vector<48x128xf32>
    %12 = arith.maximumf %10, %11 : vector<48x128xf32>
    %13 = math.log %12 : vector<48x128xf32>
    %14 = vector.extract_strided_slice %13 {offsets = [0, 0], sizes = [24, 128], strides = [1, 1]} : vector<48x128xf32> to vector<24x128xf32>
    %15 = vector.extract_strided_slice %13 {offsets = [24, 0], sizes = [24, 128], strides = [1, 1]} : vector<48x128xf32> to vector<24x128xf32>
    %16 = arith.subf %14, %15 : vector<24x128xf32>
    %17 = math.absf %16 : vector<24x128xf32>
    %18 = vector.shape_cast %17 : vector<24x128xf32> to vector<3x8x128xf32>
    %cst_7 = arith.constant dense<0.000000e+00> : vector<8x128xf32>
    %19 = vector.multi_reduction <add>, %18, %cst_7 [0] : vector<3x8x128xf32> to vector<8x128xf32>
    %c0_8 = arith.constant 0 : index
    %c0_9 = arith.constant 0 : index
    %20 = vector.load %arg4[%c0_8, %c0_9] : memref<8x128xf32, #tpu.memory_space<vmem>>, vector<8x128xf32>
    tpu.vector_store %arg4[%c0_8, %c0_9], %19 {strides = array<i32>} : memref<8x128xf32, #tpu.memory_space<vmem>>, vector<8x128xf32>,
    return
  }
  func.func @transform_0(%arg0: i32) -> (i32, i32) {
    %c0_i32 = arith.constant 0 : i32
    %c0_i32_0 = arith.constant 0 : i32
    return %arg0, %c0_i32 : i32, i32
  }
  func.func @transform_1(%arg0: i32) -> (i32, i32) {
    %c0_i32 = arith.constant 0 : i32
    %c0_i32_0 = arith.constant 0 : i32
    %c0_i32_1 = arith.constant 0 : i32
    return %c0_i32, %c0_i32_0 : i32, i32
  }
  func.func @transform_2(%arg0: i32) -> (i32, i32) {
    %c0_i32 = arith.constant 0 : i32
    %c0_i32_0 = arith.constant 0 : i32
    %c0_i32_1 = arith.constant 0 : i32
    return %c0_i32, %c0_i32_0 : i32, i32
  }
  func.func @transform_3(%arg0: i32) -> (i32, i32) {
    %c0_i32 = arith.constant 0 : i32
    %c0_i32_0 = arith.constant 0 : i32
    return %c0_i32, %arg0 : i32, i32
  }
}

</mosaic_0001>

<bundles_post_ra>
// kernel: tpu_custom_call.1
= control target key start
LH: loop header
LB: loop body
LE: loop exit
PB: predicated region body
PF: predicated region fallthrough
CT: control target
= control target key end

     0   :  { %8 = vsyncpa [#allocation3], 0  ;;  %s4938_s0 = inlined_call_operand.hbm [shape: f32[96,1024], index: 0, kind: input, shape index: {}]   ;;  %s4939_s1 = inlined_call_operand.hbm [shape: f32[1024,1024], index: 1, kind: input, shape index: {}]   ;;  %s4940_s2 = inlined_call_operand.hbm [shape: f32[512,128], index: 2, kind: input, shape index: {}]   ;;  %s4941_s3 = inlined_call_operand.hbm [shape: f32[8,256], index: 3, kind: output, shape index: {}]  }
   0x1   :  { %10 = vsyncpa [#allocation3 + $0x1], 0 }
   0x2   :  { %11 = vsyncpa [#allocation6], 0 }
   0x3   :  { %12 = vsyncpa [#allocation4], 0 }
   0x4   :  { %14 = vsyncpa [#allocation4 + $0x1], 0  ;;  %s4105_s12 = smov 0   ;;  %s4107_s13 = smov 0  }
   0x5   :  { %s4109_s14 = smov 0   ;;  %s4111_s15 = smov 0  }
   0x6 LB: > { %s4126_s16 = sadd.s32 4294967295, %s4075_s15   ;;  %s3532_s17 = sadd.s32 4294967294, %s4075_s15   ;;  %s4075_s15 = sphi %s4111_s15, %s4962_s15   ;;  %s4071_s14 = sphi %s4109_s14, %s4961_s14   ;;  %s4067_s13 = sphi %s4107_s13, %s4960_s13   ;;  %s4063_s12 = sphi %s4105_s12, %s4959_s12  }
   0x7   : > { %p40_p0 = scmp.ne.s32.totalorder %s4067_s13, %s4063_s12  ;;  %p4942_p1 = scmp.eq.s32.totalorder %s4126_s16, 0 }
   0x8   : > { %p106_p2 = scmp.eq.s32.totalorder %s4126_s16, 1  ;;  %p112_p3 = scmp.eq.s32.totalorder %s3532_s17, 1 }
   0x9   : > { %p4135_p4 = por %p4942_p1, %p40_p0  ;;  %p3533_p5 = scmp.ge.s32.totalorder %s4075_s15, 1 }
   0xa   : > { %p4140_p6 = por %p112_p3, %p40_p0  ;;  %p119_p7 = scmp.lt.s32.totalorder %s4075_s15, 3 }
   0xb   : > { %s4946_s18 = scalar_select %p4135_p4, 1, 0 }
   0xc   : > { %s4947_s19 = scalar_select %p4140_p6, 1, 0 }
   0xd   : > { %p4145_p8 = pnand %p3533_p5, %p119_p7  ;;  %s4077_s21 = smov [#allocation5]  }
   0xe   : > { %s131_s22 = sshll.u32 %s4077_s21, 4  ;;  %s4078_s24 = smov [#allocation7]   ;;  %s132_s22 = int_to_ptr.vmem [resolvable:$true] %s131_s22 }
   0xf   : > { %s4948_s20 = scalar_select %p4145_p8, 1, 0 }
  0x10   : > { %p3664_p9 = pneg %p4145_p8  ;;  %s144_s25 = sshll.u32 %s4078_s24, 4  ;;  %s145_s25 = int_to_ptr.vmem [resolvable:$true] %s144_s25 }
  0x11   : > { %s3938_s26 = scalar_lea.vmem %s132_s22, 131072  ;;  %p3946_p5 = scmp.lt.s32.totalorder %s132_s22, %s132_s22 }
  0x12   : > { %p4154_p11 = pnand %p3664_p9, %p4942_p1  ;;  %p3939_p13 = scmp.ne.s32.totalorder %s132_s22, %s3938_s26 }
  0x13   : > { %p3947_p7 = scmp.lt.s32.totalorder %s3938_s26, %s3938_s26 }
  0x14   : > { %p3929_p12 = pneg %p4154_p11 }
  0x15   : > { %p3948_p10 = por %p3947_p7, %p3946_p5 }
  0x16   : > { %p3941_p0 = pnand %p3939_p13, %p3929_p12 }
  0x18   : > { %p3942_p3 = pneg %p3941_p0 }
  0x1a   : > { %p3949_p9 = pnand %p3948_p10, %p3942_p3 }
  0x1c   : > { %3952 = shalt.err (!%p3949_p9)
}
  0x1d   : > { %s4079_s27 = smov 1024   ;;  %s4080_s28 = smov 64  }
  0x1e   : > { %3667 = dma.hbm_to_vmem [thread:$0]  (!%p4154_p11), %s4939_s1, 131072, %s132_s22, [#allocation6], %s4079_s27, %s4079_s27, %s4080_s28  }
  0x1f   : > { %s3964_s4 = scalar_lea.vmem %s145_s25, 8192  ;;  %p3972_p10 = scmp.lt.s32.totalorder %s145_s25, %s145_s25 }
  0x20   : > { %p3965_p13 = scmp.ne.s32.totalorder %s145_s25, %s3964_s4  ;;  %p3973_p3 = scmp.lt.s32.totalorder %s3964_s4, %s3964_s4 }
  0x22   : > { %p3967_p0 = pnand %p3965_p13, %p3929_p12  ;;  %p3974_p7 = por %p3973_p3, %p3972_p10 }
  0x24   : > { %p3968_p5 = pneg %p3967_p0 }
  0x26   : > { %p3975_p9 = pnand %p3974_p7, %p3968_p5 }
  0x28   : > { %3978 = shalt.err (!%p3975_p9)
}
  0x29   : > { %s4081_s5 = smov 128   ;;  %s4082_s6 = smov 8  }
  0x2a   : > { %3670 = dma.hbm_to_vmem [thread:$0]  (!%p4154_p11), %s4940_s2, 8192, %s145_s25, [#allocation6], %s4081_s5, %s4081_s5, %s4082_s6  }
  0x2b   : > { %s4180_s9 = sadd.s32 1, %s4075_s15   ;;  %s27_s11 = sadd.s32 1, %s4071_s14 }
  0x2c   : > { %s24_s10 = ssub.s32 %s4075_s15, %s4180_s9  ;;  %p34_p13 = scmp.ne.s32.totalorder %s4071_s14, %s4067_s13 }
  0x2d   : > { %p25_p12 = scmp.eq.s32.totalorder %s24_s10, 0  ;;  %p35_p0 = scmp.eq.s32.totalorder %s4075_s15, 0 }
  0x2e   : > { %p4193_p10 = por %p106_p2, %p34_p13  ;;  %p3681_p3 = scmp.lt.s32.totalorder %s4075_s15, 2 }
  0x2f   : > { %s4189_s17 = scalar_select %p25_p12, %s4071_s14, %s27_s11  }
  0x30   : > { %p36_p5 = por %p35_p0, %p34_p13  ;;  %s158_s22 = sand.u32 1, %s4071_s14  }
  0x31   : > { %s4950_s21 = scalar_select %p4193_p10, 1, 0 }
  0x32   : > { %s3650_s23 = smul.u32 384, %s158_s22  ;;  %p4200_p11 = pnand %p3681_p3, %p36_p5 }
  0x33   : > { %s3549_s24 = smul.u32 6144, %s4075_s15  ;;  %s4211_s6 = scalar_lea.sflag [#allocation3], %s158_s22 }
  0x34   : > { %s162_s4 = scalar_lea.vmem [#allocation2], %s3650_s23  ;;  %p3981_p7 = pneg %p4200_p11 }
  0x35   : > { %s4207_s30 = scalar_lea.hbm %s4938_s0, %s3549_s24  ;;  %s170_s5 = sshll.u32 %s162_s4, 4  ;;  %s4209_s5 = int_to_ptr.vmem [resolvable:$true] %s170_s5 }
  0x36   : > { %s3979_s7 = scalar_lea.hbm %s4207_s30, 6144  ;;  %s3984_s11 = scalar_lea.hbm %s4938_s0, 12288 }
  0x37   : > { %p3980_p2 = scmp.ne.s32.totalorder %s4207_s30, %s3979_s7  ;;  %p3985_p13 = scmp.lt.s32.totalorder %s4207_s30, %s4938_s0 }
  0x38   : > { %p3986_p0 = scmp.lt.s32.totalorder %s3984_s11, %s3979_s7 }
  0x39   : > { %p3982_p9 = pnand %p3981_p7, %p3980_p2 }
  0x3a   : > { %p3987_p5 = por %p3986_p0, %p3985_p13 }
  0x3b   : > { %p3983_p12 = pneg %p3982_p9 }
  0x3d   : > { %p3988_p3 = pnand %p3987_p5, %p3983_p12 }
  0x3f   : > { %3991 = shalt.err (!%p3988_p3)
}
  0x40   : > { %s3992_s22 = scalar_lea.vmem %s4209_s5, 6144  ;;  %s4083_s23 = smov [#allocation2]  }
  0x41   : > { %p3993_p1 = scmp.ne.s32.totalorder %s4209_s5, %s3992_s22  ;;  %s3997_s29 = sshll.u32 %s4083_s23, 4  ;;  %s3998_s29 = int_to_ptr.vmem [resolvable:$false] %s3997_s29 }
  0x42   : > { %s3999_s4 = scalar_lea.vmem %s3998_s29, 12288  ;;  %p4000_p9 = scmp.lt.s32.totalorder %s4209_s5, %s3998_s29 }
  0x43   : > { %p3995_p6 = pnand %p3993_p1, %p3981_p7  ;;  %p4001_p10 = scmp.lt.s32.totalorder %s3999_s4, %s3992_s22 }
  0x45   : > { %p3996_p2 = pneg %p3995_p6  ;;  %p4002_p4 = por %p4001_p10, %p4000_p9 }
  0x47   : > { %p4003_p8 = pnand %p4002_p4, %p3996_p2 }
  0x49   : > { %4006 = shalt.err (!%p4003_p8)
}
  0x4a   : > { %3674 = dma.hbm_to_vmem [thread:$0]  (!%p4200_p11), %s4207_s30, 6144, %s4209_s5, %s4211_s6, %s4079_s27, %s4079_s27, %s4080_s28  }
  0x4b   : > { %p4952_p1 = scmp.ne.s32.totalorder %s4948_s20, 0 }
  0x4c   : > { %s4238_s7 = sand.u32 (!%p4952_p1), 1, %s4067_s13   ;;  %p4953_p4 = scmp.ne.s32.totalorder (!%p4952_p1), %s4946_s18, 0 }
  0x4d   : > { %182 = sbr.rel (%p4952_p1) target bundleno = 1163 (0x48b), region = 32  ;;  %s185_s10 = scalar_lea.sflag (!%p4952_p1), [#allocation3], %s4238_s7 }
  0x4e   : > { %s3651_s8 = smul.u32 (!%p4952_p1), 384, %s4238_s7 }
  0x50   : > { %s4242_s11 = scalar_lea.vmem (!%p4952_p1), [#allocation2], %s3651_s8 }
  0x52   : > { %4050 = dma.done.wait (%p4953_p4), %s185_s10, 6144  }
  0x53   : > { %4052 = vsyncadd (%p4953_p4), %s185_s10, 4294961152  ;;  %p4954_p6 = scmp.eq.s32.totalorder %s4126_s16, 0 }
  0x55   : > { %4054 = dma.done.wait (%p4954_p6), [#allocation6], 139264   ;;  %p4955_p8 = pmov %p4954_p6 }
  0x56   : > { %v389_v0 = vld [vmem:[#allocation5 + $0x3c8] sm:$0xff]  ;;  %v388_v2 = vld [vmem:[#allocation5 + $0x3c0] sm:$0xff]  ;;  %s3542_s18 = sshll.u32 %s4238_s7, 3  ;;  %s3544_s20 = sshll.u32 %s4126_s16, 7 }
  0x57   : > { %4056 = vsyncadd (%p4955_p8), [#allocation6], 4294828032  ;;  %v645_v1 = vld [vmem:[#allocation5 + $0xbc8] sm:$0xff]  ;;  %1292 = vmatprep.subr.mxu0 %v389_v0  ;;  %v644_v3 = vld [vmem:[#allocation5 + $0xbc0] sm:$0xff]  ;;  %s218_s27 = scalar_lea.vmem [#allocation8], %s3542_s18  ;;  %s3441_s5 = scalar_lea.hbm %s4941_s3, %s3544_s20 }
  0x58   : > { %1393 = vmatprep.subr.mxu1 %v645_v1  ;;  %v381_v4 = vld [vmem:[#allocation5 + $0x388] sm:$0xff]  ;;  %1293 = vmatpush1.msra.mxu0 %v388_v2  ;;  %v380_v6 = vld [vmem:[#allocation5 + $0x380] sm:$0xff]  ;;  %s3443_s28 = sshll.u32 %s218_s27, 4  ;;  %s3430_s6 = scalar_lea.sflag [#allocation4], %s4238_s7  ;;  %s3444_s28 = int_to_ptr.vmem [resolvable:$true] %s3443_s28 }
  0x59   : > { %v637_v5 = vld [vmem:[#allocation5 + $0xb88] sm:$0xff]  ;;  %1394 = vmatpush1.msra.mxu1 %v644_v3  ;;  %v636_v7 = vld [vmem:[#allocation5 + $0xb80] sm:$0xff]  ;;  %1294 = vmatprep.subr.mxu0 %v381_v4  ;;  %s4007_s24 = scalar_lea.vmem %s3444_s28, 128  ;;  %p4956_p11 = scmp.ne.s32.totalorder %s4950_s21, 0 }
  0x5a   : > { %v373_v8 = vld [vmem:[#allocation5 + $0x348] sm:$0xff]  ;;  %1395 = vmatprep.subr.mxu1 %v637_v5  ;;  %v372_v10 = vld [vmem:[#allocation5 + $0x340] sm:$0xff]  ;;  %1295 = vmatpush1.msra.mxu0 %v380_v6  ;;  %p4008_p10 = scmp.ne.s32.totalorder %s3444_s28, %s4007_s24  ;;  %s4084_s26 = smov [#allocation8]  }
  0x5b   : > { %v629_v9 = vld [vmem:[#allocation5 + $0xb48] sm:$0xff]  ;;  %v628_v11 = vld [vmem:[#allocation5 + $0xb40] sm:$0xff]  ;;  %1396 = vmatpush1.msra.mxu1 %v636_v7  ;;  %1296 = vmatprep.subr.mxu0 %v373_v8  ;;  %s4011_s22 = sshll.u32 %s4084_s26, 4  ;;  %s4012_s22 = int_to_ptr.vmem [resolvable:$false] %s4011_s22 }
  0x5c   : > { %v365_v12 = vld [vmem:[#allocation5 + $0x308] sm:$0xff]  ;;  %1397 = vmatprep.subr.mxu1 %v629_v9  ;;  %v364_v14 = vld [vmem:[#allocation5 + $0x300] sm:$0xff]  ;;  %1297 = vmatpush1.msra.mxu0 %v372_v10  ;;  %p4009_p7 = pnand %p4008_p10, %p4956_p11  ;;  %s4013_s16 = scalar_lea.vmem %s4012_s22, 256 }
  0x5d   : > { %v621_v13 = vld [vmem:[#allocation5 + $0xb08] sm:$0xff]  ;;  %v620_v15 = vld [vmem:[#allocation5 + $0xb00] sm:$0xff]  ;;  %1398 = vmatpush1.msra.mxu1 %v628_v11  ;;  %1298 = vmatprep.subr.mxu0 %v365_v12  ;;  %p4014_p13 = scmp.lt.s32.totalorder %s3444_s28, %s4012_s22  ;;  %p4015_p0 = scmp.lt.s32.totalorder %s4013_s16, %s4007_s24 }
  0x5e   : > { %v357_v16 = vld [vmem:[#allocation5 + $0x2c8] sm:$0xff]  ;;  %1399 = vmatprep.subr.mxu1 %v621_v13  ;;  %v356_v18 = vld [vmem:[#allocation5 + $0x2c0] sm:$0xff]  ;;  %1299 = vmatpush1.msra.mxu0 %v364_v14  ;;  %p4010_p12 = pneg %p4009_p7 }
  0x5f   : > { %v613_v17 = vld [vmem:[#allocation5 + $0xac8] sm:$0xff]  ;;  %v612_v19 = vld [vmem:[#allocation5 + $0xac0] sm:$0xff]  ;;  %1400 = vmatpush1.msra.mxu1 %v620_v15  ;;  %1300 = vmatprep.subr.mxu0 %v357_v16  ;;  %p4016_p5 = por %p4015_p0, %p4014_p13 }
  0x60   : > { %v349_v20 = vld [vmem:[#allocation5 + $0x288] sm:$0xff]  ;;  %1401 = vmatprep.subr.mxu1 %v613_v17  ;;  %v348_v22 = vld [vmem:[#allocation5 + $0x280] sm:$0xff]  ;;  %1301 = vmatpush1.msra.mxu0 %v356_v18 }
  0x61   : > { %v605_v21 = vld [vmem:[#allocation5 + $0xa88] sm:$0xff]  ;;  %v604_v23 = vld [vmem:[#allocation5 + $0xa80] sm:$0xff]  ;;  %1402 = vmatpush1.msra.mxu1 %v612_v19  ;;  %1302 = vmatprep.subr.mxu0 %v349_v20  ;;  %p4017_p3 = pnand %p4016_p5, %p4010_p12 }
  0x62   : > { %v341_v24 = vld [vmem:[#allocation5 + $0x248] sm:$0xff]  ;;  %1403 = vmatprep.subr.mxu1 %v605_v21  ;;  %v340_v26 = vld [vmem:[#allocation5 + $0x240] sm:$0xff]  ;;  %1303 = vmatpush1.msra.mxu0 %v348_v22 }
  0x63   : > { %v597_v25 = vld [vmem:[#allocation5 + $0xa48] sm:$0xff]  ;;  %v596_v27 = vld [vmem:[#allocation5 + $0xa40] sm:$0xff]  ;;  %1404 = vmatpush1.msra.mxu1 %v604_v23  ;;  %1304 = vmatprep.subr.mxu0 %v341_v24 }
  0x64   : > { %v333_v28 = vld [vmem:[#allocation5 + $0x208] sm:$0xff]  ;;  %1405 = vmatprep.subr.mxu1 %v597_v25  ;;  %v332_v30 = vld [vmem:[#allocation5 + $0x200] sm:$0xff]  ;;  %1305 = vmatpush1.msra.mxu0 %v340_v26 }
  0x65   : > { %v589_v29 = vld [vmem:[#allocation5 + $0xa08] sm:$0xff]  ;;  %v588_v31 = vld [vmem:[#allocation5 + $0xa00] sm:$0xff]  ;;  %1406 = vmatpush1.msra.mxu1 %v596_v27  ;;  %1306 = vmatprep.subr.mxu0 %v333_v28 }
  0x66   : > { %v325_v32 = vld [vmem:[#allocation5 + $0x1c8] sm:$0xff]  ;;  %1407 = vmatprep.subr.mxu1 %v589_v29  ;;  %v324_v34 = vld [vmem:[#allocation5 + $0x1c0] sm:$0xff]  ;;  %1307 = vmatpush1.msra.mxu0 %v332_v30 }
  0x67   : > { %v581_v33 = vld [vmem:[#allocation5 + $0x9c8] sm:$0xff]  ;;  %v580_v35 = vld [vmem:[#allocation5 + $0x9c0] sm:$0xff]  ;;  %1408 = vmatpush1.msra.mxu1 %v588_v31  ;;  %1308 = vmatprep.subr.mxu0 %v325_v32 }
  0x68   : > { %v317_v36 = vld [vmem:[#allocation5 + $0x188] sm:$0xff]  ;;  %1409 = vmatprep.subr.mxu1 %v581_v33  ;;  %v316_v38 = vld [vmem:[#allocation5 + $0x180] sm:$0xff]  ;;  %1309 = vmatpush1.msra.mxu0 %v324_v34 }
  0x69   : > { %v573_v37 = vld [vmem:[#allocation5 + $0x988] sm:$0xff]  ;;  %v572_v39 = vld [vmem:[#allocation5 + $0x980] sm:$0xff]  ;;  %1410 = vmatpush1.msra.mxu1 %v580_v35  ;;  %1310 = vmatprep.subr.mxu0 %v317_v36 }
  0x6a   : > { %v309_v40 = vld [vmem:[#allocation5 + $0x148] sm:$0xff]  ;;  %1411 = vmatprep.subr.mxu1 %v573_v37  ;;  %v308_v42 = vld [vmem:[#allocation5 + $0x140] sm:$0xff]  ;;  %1311 = vmatpush1.msra.mxu0 %v316_v38 }
  0x6b   : > { %v565_v41 = vld [vmem:[#allocation5 + $0x948] sm:$0xff]  ;;  %v564_v43 = vld [vmem:[#allocation5 + $0x940] sm:$0xff]  ;;  %1412 = vmatpush1.msra.mxu1 %v572_v39  ;;  %1312 = vmatprep.subr.mxu0 %v309_v40 }
  0x6c   : > { %v301_v44 = vld [vmem:[#allocation5 + $0x108] sm:$0xff]  ;;  %1413 = vmatprep.subr.mxu1 %v565_v41  ;;  %v300_v46 = vld [vmem:[#allocation5 + $0x100] sm:$0xff]  ;;  %1313 = vmatpush1.msra.mxu0 %v308_v42 }
  0x6d   : > { %v557_v45 = vld [vmem:[#allocation5 + $0x908] sm:$0xff]  ;;  %v556_v47 = vld [vmem:[#allocation5 + $0x900] sm:$0xff]  ;;  %1414 = vmatpush1.msra.mxu1 %v564_v43  ;;  %1314 = vmatprep.subr.mxu0 %v301_v44 }
  0x6e   : > { %v293_v48 = vld [vmem:[#allocation5 + $0xc8] sm:$0xff]  ;;  %1415 = vmatprep.subr.mxu1 %v557_v45  ;;  %v292_v50 = vld [vmem:[#allocation5 + $0xc0] sm:$0xff]  ;;  %1315 = vmatpush1.msra.mxu0 %v300_v46 }
  0x6f   : > { %v549_v49 = vld [vmem:[#allocation5 + $0x8c8] sm:$0xff]  ;;  %v548_v51 = vld [vmem:[#allocation5 + $0x8c0] sm:$0xff]  ;;  %1416 = vmatpush1.msra.mxu1 %v556_v47  ;;  %1316 = vmatprep.subr.mxu0 %v293_v48 }
  0x70   : > { %v285_v52 = vld [vmem:[#allocation5 + $0x88] sm:$0xff]  ;;  %1417 = vmatprep.subr.mxu1 %v549_v49  ;;  %v284_v54 = vld [vmem:[#allocation5 + $0x80] sm:$0xff]  ;;  %1317 = vmatpush1.msra.mxu0 %v292_v50 }
  0x71   : > { %v541_v53 = vld [vmem:[#allocation5 + $0x888] sm:$0xff]  ;;  %v540_v55 = vld [vmem:[#allocation5 + $0x880] sm:$0xff]  ;;  %1418 = vmatpush1.msra.mxu1 %v548_v51  ;;  %1318 = vmatprep.subr.mxu0 %v285_v52 }
  0x72   : > { %v277_v56 = vld [vmem:[#allocation5 + $0x48] sm:$0xff]  ;;  %1419 = vmatprep.subr.mxu1 %v541_v53  ;;  %v276_v58 = vld [vmem:[#allocation5 + $0x40] sm:$0xff]  ;;  %1319 = vmatpush1.msra.mxu0 %v284_v54 }
  0x73   : > { %v533_v57 = vld [vmem:[#allocation5 + $0x848] sm:$0xff]  ;;  %v532_v59 = vld [vmem:[#allocation5 + $0x840] sm:$0xff]  ;;  %1420 = vmatpush1.msra.mxu1 %v540_v55  ;;  %1320 = vmatprep.subr.mxu0 %v277_v56 }
  0x74   : > { %v269_v60 = vld [vmem:[#allocation5 + $0x8] sm:$0xff]  ;;  %1421 = vmatprep.subr.mxu1 %v533_v57  ;;  %v268_v62 = vld [vmem:[#allocation5] sm:$0xff]  ;;  %1321 = vmatpush1.msra.mxu0 %v276_v58 }
  0x75   : > { %v525_v61 = vld [vmem:[#allocation5 + $0x808] sm:$0xff]  ;;  %v524_v63 = vld [vmem:[#allocation5 + $0x800] sm:$0xff]  ;;  %1422 = vmatpush1.msra.mxu1 %v532_v59  ;;  %1322 = vmatprep.subr.mxu0 %v269_v60 }
  0x76   : > { %v517_v0 = vld [vmem:[#allocation5 + $0x7c8] sm:$0xff]  ;;  %1423 = vmatprep.subr.mxu1 %v525_v61  ;;  %v516_v2 = vld [vmem:[#allocation5 + $0x7c0] sm:$0xff]  ;;  %1323 = vmatpush1.msra.mxu0 %v268_v62 }
  0x77   : > { %v773_v1 = vld [vmem:[#allocation5 + $0xfc8] sm:$0xff]  ;;  %v772_v3 = vld [vmem:[#allocation5 + $0xfc0] sm:$0xff]  ;;  %1424 = vmatpush1.msra.mxu1 %v524_v63  ;;  %1324 = vmatprep.subr.mxu0 %v517_v0 }
  0x78   : > { %v509_v4 = vld [vmem:[#allocation5 + $0x788] sm:$0xff]  ;;  %1425 = vmatprep.subr.mxu1 %v773_v1  ;;  %v508_v6 = vld [vmem:[#allocation5 + $0x780] sm:$0xff]  ;;  %1325 = vmatpush2.msra.mxu0 %v516_v2  ;;  %v223_v1 = vld [vmem:[%s4242_s11 + $0x18] sm:$0xff] }
  0x79   : > { %v765_v5 = vld [vmem:[#allocation5 + $0xf88] sm:$0xff]  ;;  %v764_v7 = vld [vmem:[#allocation5 + $0xf80] sm:$0xff]  ;;  %1426 = vmatpush2.msra.mxu1 %v772_v3  ;;  %1326 = vmatprep.subr.mxu0 %v509_v4  ;;  %v222_v3 = vld [vmem:[%s4242_s11 + $0x10] sm:$0xff] }
  0x7a   : > { %v501_v8 = vld [vmem:[#allocation5 + $0x748] sm:$0xff]  ;;  %1427 = vmatprep.subr.mxu1 %v765_v5  ;;  %v500_v10 = vld [vmem:[#allocation5 + $0x740] sm:$0xff]  ;;  %1327 = vmatpush2.msra.mxu0 %v508_v6 }
  0x7b   : > { %v757_v9 = vld [vmem:[#allocation5 + $0xf48] sm:$0xff]  ;;  %v756_v11 = vld [vmem:[#allocation5 + $0xf40] sm:$0xff]  ;;  %1428 = vmatpush2.msra.mxu1 %v764_v7  ;;  %1328 = vmatprep.subr.mxu0 %v501_v8 }
  0x7c   : > { %v493_v12 = vld [vmem:[#allocation5 + $0x708] sm:$0xff]  ;;  %1429 = vmatprep.subr.mxu1 %v757_v9  ;;  %v492_v14 = vld [vmem:[#allocation5 + $0x700] sm:$0xff]  ;;  %1329 = vmatpush2.msra.mxu0 %v500_v10 }
  0x7d   : > { %v749_v13 = vld [vmem:[#allocation5 + $0xf08] sm:$0xff]  ;;  %v748_v15 = vld [vmem:[#allocation5 + $0xf00] sm:$0xff]  ;;  %1430 = vmatpush2.msra.mxu1 %v756_v11  ;;  %1330 = vmatprep.subr.mxu0 %v493_v12 }
  0x7e   : > { %v485_v16 = vld [vmem:[#allocation5 + $0x6c8] sm:$0xff]  ;;  %1431 = vmatprep.subr.mxu1 %v749_v13  ;;  %v484_v18 = vld [vmem:[#allocation5 + $0x6c0] sm:$0xff]  ;;  %1331 = vmatpush2.msra.mxu0 %v492_v14 }
  0x7f   : > { %v741_v17 = vld [vmem:[#allocation5 + $0xec8] sm:$0xff]  ;;  %v740_v19 = vld [vmem:[#allocation5 + $0xec0] sm:$0xff]  ;;  %1432 = vmatpush2.msra.mxu1 %v748_v15  ;;  %1332 = vmatprep.subr.mxu0 %v485_v16 }
  0x80   : > { %v477_v20 = vld [vmem:[#allocation5 + $0x688] sm:$0xff]  ;;  %1433 = vmatprep.subr.mxu1 %v741_v17  ;;  %v476_v22 = vld [vmem:[#allocation5 + $0x680] sm:$0xff]  ;;  %1333 = vmatpush2.msra.mxu0 %v484_v18 }
  0x81   : > { %v733_v21 = vld [vmem:[#allocation5 + $0xe88] sm:$0xff]  ;;  %v732_v23 = vld [vmem:[#allocation5 + $0xe80] sm:$0xff]  ;;  %1434 = vmatpush2.msra.mxu1 %v740_v19  ;;  %1334 = vmatprep.subr.mxu0 %v477_v20 }
  0x82   : > { %v469_v24 = vld [vmem:[#allocation5 + $0x648] sm:$0xff]  ;;  %1435 = vmatprep.subr.mxu1 %v733_v21  ;;  %v468_v26 = vld [vmem:[#allocation5 + $0x640] sm:$0xff]  ;;  %1335 = vmatpush2.msra.mxu0 %v476_v22 }
  0x83   : > { %v725_v25 = vld [vmem:[#allocation5 + $0xe48] sm:$0xff]  ;;  %v724_v27 = vld [vmem:[#allocation5 + $0xe40] sm:$0xff]  ;;  %1436 = vmatpush2.msra.mxu1 %v732_v23  ;;  %1336 = vmatprep.subr.mxu0 %v469_v24 }
  0x84   : > { %v461_v28 = vld [vmem:[#allocation5 + $0x608] sm:$0xff]  ;;  %1437 = vmatprep.subr.mxu1 %v725_v25  ;;  %v460_v30 = vld [vmem:[#allocation5 + $0x600] sm:$0xff]  ;;  %1337 = vmatpush2.msra.mxu0 %v468_v26 }
  0x85   : > { %v717_v29 = vld [vmem:[#allocation5 + $0xe08] sm:$0xff]  ;;  %v716_v31 = vld [vmem:[#allocation5 + $0xe00] sm:$0xff]  ;;  %1438 = vmatpush2.msra.mxu1 %v724_v27  ;;  %1338 = vmatprep.subr.mxu0 %v461_v28 }
  0x86   : > { %v453_v32 = vld [vmem:[#allocation5 + $0x5c8] sm:$0xff]  ;;  %1439 = vmatprep.subr.mxu1 %v717_v29  ;;  %v452_v34 = vld [vmem:[#allocation5 + $0x5c0] sm:$0xff]  ;;  %1339 = vmatpush2.msra.mxu0 %v460_v30 }
  0x87   : > { %v709_v33 = vld [vmem:[#allocation5 + $0xdc8] sm:$0xff]  ;;  %v708_v35 = vld [vmem:[#allocation5 + $0xdc0] sm:$0xff]  ;;  %1440 = vmatpush2.msra.mxu1 %v716_v31  ;;  %1340 = vmatprep.subr.mxu0 %v453_v32 }
  0x88   : > { %v445_v36 = vld [vmem:[#allocation5 + $0x588] sm:$0xff]  ;;  %1441 = vmatprep.subr.mxu1 %v709_v33  ;;  %v444_v38 = vld [vmem:[#allocation5 + $0x580] sm:$0xff]  ;;  %1341 = vmatpush2.msra.mxu0 %v452_v34 }
  0x89   : > { %v701_v37 = vld [vmem:[#allocation5 + $0xd88] sm:$0xff]  ;;  %v700_v39 = vld [vmem:[#allocation5 + $0xd80] sm:$0xff]  ;;  %1442 = vmatpush2.msra.mxu1 %v708_v35  ;;  %1342 = vmatprep.subr.mxu0 %v445_v36 }
  0x8a   : > { %v437_v40 = vld [vmem:[#allocation5 + $0x548] sm:$0xff]  ;;  %1443 = vmatprep.subr.mxu1 %v701_v37  ;;  %v436_v42 = vld [vmem:[#allocation5 + $0x540] sm:$0xff]  ;;  %1343 = vmatpush2.msra.mxu0 %v444_v38 }
  0x8b   : > { %v693_v41 = vld [vmem:[#allocation5 + $0xd48] sm:$0xff]  ;;  %v692_v43 = vld [vmem:[#allocation5 + $0xd40] sm:$0xff]  ;;  %1444 = vmatpush2.msra.mxu1 %v700_v39  ;;  %1344 = vmatprep.subr.mxu0 %v437_v40 }
  0x8c   : > { %v429_v44 = vld [vmem:[#allocation5 + $0x508] sm:$0xff]  ;;  %1445 = vmatprep.subr.mxu1 %v693_v41  ;;  %v428_v46 = vld [vmem:[#allocation5 + $0x500] sm:$0xff]  ;;  %1345 = vmatpush2.msra.mxu0 %v436_v42 }
  0x8d   : > { %v685_v45 = vld [vmem:[#allocation5 + $0xd08] sm:$0xff]  ;;  %v684_v47 = vld [vmem:[#allocation5 + $0xd00] sm:$0xff]  ;;  %1446 = vmatpush2.msra.mxu1 %v692_v43  ;;  %1346 = vmatprep.subr.mxu0 %v429_v44 }
  0x8e   : > { %v421_v48 = vld [vmem:[#allocation5 + $0x4c8] sm:$0xff]  ;;  %1447 = vmatprep.subr.mxu1 %v685_v45  ;;  %v420_v50 = vld [vmem:[#allocation5 + $0x4c0] sm:$0xff]  ;;  %1347 = vmatpush2.msra.mxu0 %v428_v46 }
  0x8f   : > { %v677_v49 = vld [vmem:[#allocation5 + $0xcc8] sm:$0xff]  ;;  %v676_v51 = vld [vmem:[#allocation5 + $0xcc0] sm:$0xff]  ;;  %1448 = vmatpush2.msra.mxu1 %v684_v47  ;;  %1348 = vmatprep.subr.mxu0 %v421_v48 }
  0x90   : > { %v413_v52 = vld [vmem:[#allocation5 + $0x488] sm:$0xff]  ;;  %1449 = vmatprep.subr.mxu1 %v677_v49  ;;  %v412_v54 = vld [vmem:[#allocation5 + $0x480] sm:$0xff]  ;;  %1349 = vmatpush2.msra.mxu0 %v420_v50 }
  0x91   : > { %v669_v53 = vld [vmem:[#allocation5 + $0xc88] sm:$0xff]  ;;  %v668_v55 = vld [vmem:[#allocation5 + $0xc80] sm:$0xff]  ;;  %1450 = vmatpush2.msra.mxu1 %v676_v51  ;;  %1350 = vmatprep.subr.mxu0 %v413_v52 }
  0x92   : > { %v405_v56 = vld [vmem:[#allocation5 + $0x448] sm:$0xff]  ;;  %1451 = vmatprep.subr.mxu1 %v669_v53  ;;  %v404_v58 = vld [vmem:[#allocation5 + $0x440] sm:$0xff]  ;;  %1351 = vmatpush2.msra.mxu0 %v412_v54 }
  0x93   : > { %v661_v57 = vld [vmem:[#allocation5 + $0xc48] sm:$0xff]  ;;  %v660_v59 = vld [vmem:[#allocation5 + $0xc40] sm:$0xff]  ;;  %1452 = vmatpush2.msra.mxu1 %v668_v55  ;;  %1352 = vmatprep.subr.mxu0 %v405_v56 }
  0x94   : > { %v397_v60 = vld [vmem:[#allocation5 + $0x408] sm:$0xff]  ;;  %1453 = vmatprep.subr.mxu1 %v661_v57  ;;  %v396_v62 = vld [vmem:[#allocation5 + $0x400] sm:$0xff]  ;;  %1353 = vmatpush2.msra.mxu0 %v404_v58 }
  0x95   : > { %v653_v61 = vld [vmem:[#allocation5 + $0xc08] sm:$0xff]  ;;  %1454 = vmatpush2.msra.mxu1 %v660_v59  ;;  %v652_v0 = vld [vmem:[#allocation5 + $0xc00] sm:$0xff]  ;;  %1354 = vmatprep.subr.mxu0 %v397_v60 }
  0x96   : > { %v221_v63 = vld [vmem:[%s4242_s11 + $0x8] sm:$0xff]  ;;  %1455 = vmatprep.subr.mxu1 %v653_v61  ;;  %v220_v2 = vld [vmem:[%s4242_s11] sm:$0xff]  ;;  %1355 = vmatpush2.msra.mxu0 %v396_v62 }
  0x97   : > { %1356 = vmatprep.mubr.f32.mxu0 %v221_v63  ;;  %v901_v4 = vld [vmem:[#allocation5 + $0x13c8] sm:$0xff]  ;;  %1456 = vmatpush2.msra.mxu1 %v652_v0  ;;  %v900_v6 = vld [vmem:[#allocation5 + $0x13c0] sm:$0xff] }
  0x98   : > { %v1157_v5 = vld [vmem:[#allocation5 + $0x1bc8] sm:$0xff]  ;;  %1457 = vmatprep.mubr.f32.mxu1 %v223_v1  ;;  %v1156_v7 = vld [vmem:[#allocation5 + $0x1bc0] sm:$0xff]  ;;  %1357 = vmatmul.mubr.f32.vlgmr.msra.gmra.mxu0 %v220_v2 }
  0x99   : > { %1458 = vmatmul.mubr.f32.vlgmr.msra.gmra.mxu1 %v222_v3  ;;  %v893_v8 = vld [vmem:[#allocation5 + $0x1388] sm:$0xff]  ;;  %1494 = vmatprep.subr.mxu0 %v901_v4  ;;  %v892_v10 = vld [vmem:[#allocation5 + $0x1380] sm:$0xff] }
  0x9a   : > { %v1149_v9 = vld [vmem:[#allocation5 + $0x1b88] sm:$0xff]  ;;  %1595 = vmatprep.subr.mxu1 %v1157_v5  ;;  %v1148_v11 = vld [vmem:[#allocation5 + $0x1b80] sm:$0xff]  ;;  %1495 = vmatpush1.msra.mxu0 %v900_v6 }
  0x9b   : > { %1596 = vmatpush1.msra.mxu1 %v1156_v7  ;;  %v885_v12 = vld [vmem:[#allocation5 + $0x1348] sm:$0xff]  ;;  %1496 = vmatprep.subr.mxu0 %v893_v8  ;;  %v884_v14 = vld [vmem:[#allocation5 + $0x1340] sm:$0xff] }
  0x9c   : > { %v1141_v13 = vld [vmem:[#allocation5 + $0x1b48] sm:$0xff]  ;;  %1597 = vmatprep.subr.mxu1 %v1149_v9  ;;  %v1140_v15 = vld [vmem:[#allocation5 + $0x1b40] sm:$0xff]  ;;  %1497 = vmatpush1.msra.mxu0 %v892_v10 }
  0x9d   : > { %1598 = vmatpush1.msra.mxu1 %v1148_v11  ;;  %v877_v16 = vld [vmem:[#allocation5 + $0x1308] sm:$0xff]  ;;  %1498 = vmatprep.subr.mxu0 %v885_v12  ;;  %v876_v18 = vld [vmem:[#allocation5 + $0x1300] sm:$0xff] }
  0x9e   : > { %v1133_v17 = vld [vmem:[#allocation5 + $0x1b08] sm:$0xff]  ;;  %1599 = vmatprep.subr.mxu1 %v1141_v13  ;;  %v1132_v19 = vld [vmem:[#allocation5 + $0x1b00] sm:$0xff]  ;;  %1499 = vmatpush1.msra.mxu0 %v884_v14 }
  0x9f   : > { %1600 = vmatpush1.msra.mxu1 %v1140_v15  ;;  %v869_v20 = vld [vmem:[#allocation5 + $0x12c8] sm:$0xff]  ;;  %1500 = vmatprep.subr.mxu0 %v877_v16  ;;  %v868_v22 = vld [vmem:[#allocation5 + $0x12c0] sm:$0xff] }
  0xa0   : > { %v1125_v21 = vld [vmem:[#allocation5 + $0x1ac8] sm:$0xff]  ;;  %1601 = vmatprep.subr.mxu1 %v1133_v17  ;;  %v1124_v23 = vld [vmem:[#allocation5 + $0x1ac0] sm:$0xff]  ;;  %1501 = vmatpush1.msra.mxu0 %v876_v18 }
  0xa1   : > { %1602 = vmatpush1.msra.mxu1 %v1132_v19  ;;  %v861_v24 = vld [vmem:[#allocation5 + $0x1288] sm:$0xff]  ;;  %1502 = vmatprep.subr.mxu0 %v869_v20  ;;  %v860_v26 = vld [vmem:[#allocation5 + $0x1280] sm:$0xff] }
  0xa2   : > { %v1117_v25 = vld [vmem:[#allocation5 + $0x1a88] sm:$0xff]  ;;  %1603 = vmatprep.subr.mxu1 %v1125_v21  ;;  %v1116_v27 = vld [vmem:[#allocation5 + $0x1a80] sm:$0xff]  ;;  %1503 = vmatpush1.msra.mxu0 %v868_v22 }
  0xa3   : > { %1604 = vmatpush1.msra.mxu1 %v1124_v23  ;;  %v853_v28 = vld [vmem:[#allocation5 + $0x1248] sm:$0xff]  ;;  %1504 = vmatprep.subr.mxu0 %v861_v24  ;;  %v852_v30 = vld [vmem:[#allocation5 + $0x1240] sm:$0xff] }
  0xa4   : > { %v1109_v29 = vld [vmem:[#allocation5 + $0x1a48] sm:$0xff]  ;;  %1605 = vmatprep.subr.mxu1 %v1117_v25  ;;  %v1108_v31 = vld [vmem:[#allocation5 + $0x1a40] sm:$0xff]  ;;  %1505 = vmatpush1.msra.mxu0 %v860_v26  ;;  %v231_v25 = vld [vmem:[%s4242_s11 + $0x58] sm:$0xff] }
  0xa5   : > { %1606 = vmatpush1.msra.mxu1 %v1116_v27  ;;  %v845_v32 = vld [vmem:[#allocation5 + $0x1208] sm:$0xff]  ;;  %1506 = vmatprep.subr.mxu0 %v853_v28  ;;  %v844_v34 = vld [vmem:[#allocation5 + $0x1200] sm:$0xff] }
  0xa6   : > { %v1101_v33 = vld [vmem:[#allocation5 + $0x1a08] sm:$0xff]  ;;  %1607 = vmatprep.subr.mxu1 %v1109_v29  ;;  %v1100_v35 = vld [vmem:[#allocation5 + $0x1a00] sm:$0xff]  ;;  %1507 = vmatpush1.msra.mxu0 %v852_v30  ;;  %v230_v29 = vld [vmem:[%s4242_s11 + $0x50] sm:$0xff] }
  0xa7   : > { %1608 = vmatpush1.msra.mxu1 %v1108_v31  ;;  %v837_v36 = vld [vmem:[#allocation5 + $0x11c8] sm:$0xff]  ;;  %1508 = vmatprep.subr.mxu0 %v845_v32  ;;  %v836_v38 = vld [vmem:[#allocation5 + $0x11c0] sm:$0xff] }
  0xa8   : > { %v1093_v37 = vld [vmem:[#allocation5 + $0x19c8] sm:$0xff]  ;;  %1609 = vmatprep.subr.mxu1 %v1101_v33  ;;  %v1092_v39 = vld [vmem:[#allocation5 + $0x19c0] sm:$0xff]  ;;  %1509 = vmatpush1.msra.mxu0 %v844_v34 }
  0xa9   : > { %1610 = vmatpush1.msra.mxu1 %v1100_v35  ;;  %v829_v40 = vld [vmem:[#allocation5 + $0x1188] sm:$0xff]  ;;  %1510 = vmatprep.subr.mxu0 %v837_v36  ;;  %v828_v42 = vld [vmem:[#allocation5 + $0x1180] sm:$0xff] }
  0xaa   : > { %v1085_v41 = vld [vmem:[#allocation5 + $0x1988] sm:$0xff]  ;;  %1611 = vmatprep.subr.mxu1 %v1093_v37  ;;  %v1084_v43 = vld [vmem:[#allocation5 + $0x1980] sm:$0xff]  ;;  %1511 = vmatpush1.msra.mxu0 %v836_v38  ;;  %v239_v37 = vld [vmem:[%s4242_s11 + $0x98] sm:$0xff] }
  0xab   : > { %1612 = vmatpush1.msra.mxu1 %v1092_v39  ;;  %v821_v44 = vld [vmem:[#allocation5 + $0x1148] sm:$0xff]  ;;  %1512 = vmatprep.subr.mxu0 %v829_v40  ;;  %v820_v46 = vld [vmem:[#allocation5 + $0x1140] sm:$0xff] }
  0xac   : > { %v1077_v45 = vld [vmem:[#allocation5 + $0x1948] sm:$0xff]  ;;  %1613 = vmatprep.subr.mxu1 %v1085_v41  ;;  %v1076_v47 = vld [vmem:[#allocation5 + $0x1940] sm:$0xff]  ;;  %1513 = vmatpush1.msra.mxu0 %v828_v42  ;;  %v238_v41 = vld [vmem:[%s4242_s11 + $0x90] sm:$0xff] }
  0xad   : > { %1614 = vmatpush1.msra.mxu1 %v1084_v43  ;;  %v813_v48 = vld [vmem:[#allocation5 + $0x1108] sm:$0xff]  ;;  %1514 = vmatprep.subr.mxu0 %v821_v44  ;;  %v812_v50 = vld [vmem:[#allocation5 + $0x1100] sm:$0xff] }
  0xae   : > { %v1069_v49 = vld [vmem:[#allocation5 + $0x1908] sm:$0xff]  ;;  %1615 = vmatprep.subr.mxu1 %v1077_v45  ;;  %v1068_v51 = vld [vmem:[#allocation5 + $0x1900] sm:$0xff]  ;;  %1515 = vmatpush1.msra.mxu0 %v820_v46 }
  0xaf   : > { %1616 = vmatpush1.msra.mxu1 %v1076_v47  ;;  %v805_v52 = vld [vmem:[#allocation5 + $0x10c8] sm:$0xff]  ;;  %1516 = vmatprep.subr.mxu0 %v813_v48  ;;  %v804_v54 = vld [vmem:[#allocation5 + $0x10c0] sm:$0xff] }
  0xb0   : > { %v1061_v53 = vld [vmem:[#allocation5 + $0x18c8] sm:$0xff]  ;;  %1617 = vmatprep.subr.mxu1 %v1069_v49  ;;  %v1060_v55 = vld [vmem:[#allocation5 + $0x18c0] sm:$0xff]  ;;  %1517 = vmatpush1.msra.mxu0 %v812_v50  ;;  %v247_v49 = vld [vmem:[%s4242_s11 + $0xd8] sm:$0xff] }
  0xb1   : > { %1618 = vmatpush1.msra.mxu1 %v1068_v51  ;;  %v797_v56 = vld [vmem:[#allocation5 + $0x1088] sm:$0xff]  ;;  %1518 = vmatprep.subr.mxu0 %v805_v52  ;;  %v796_v58 = vld [vmem:[#allocation5 + $0x1080] sm:$0xff] }
  0xb2   : > { %v1053_v57 = vld [vmem:[#allocation5 + $0x1888] sm:$0xff]  ;;  %1619 = vmatprep.subr.mxu1 %v1061_v53  ;;  %v1052_v59 = vld [vmem:[#allocation5 + $0x1880] sm:$0xff]  ;;  %1519 = vmatpush1.msra.mxu0 %v804_v54  ;;  %v246_v53 = vld [vmem:[%s4242_s11 + $0xd0] sm:$0xff] }
  0xb3   : > { %1620 = vmatpush1.msra.mxu1 %v1060_v55  ;;  %v789_v60 = vld [vmem:[#allocation5 + $0x1048] sm:$0xff]  ;;  %1520 = vmatprep.subr.mxu0 %v797_v56  ;;  %v788_v62 = vld [vmem:[#allocation5 + $0x1040] sm:$0xff] }
  0xb4   : > { %v1045_v61 = vld [vmem:[#allocation5 + $0x1848] sm:$0xff]  ;;  %1621 = vmatprep.subr.mxu1 %v1053_v57  ;;  %v1044_v63 = vld [vmem:[#allocation5 + $0x1840] sm:$0xff]  ;;  %1521 = vmatpush1.msra.mxu0 %v796_v58 }
  0xb5   : > { %1622 = vmatpush1.msra.mxu1 %v1052_v59  ;;  %v781_v0 = vld [vmem:[#allocation5 + $0x1008] sm:$0xff]  ;;  %1522 = vmatprep.subr.mxu0 %v789_v60  ;;  %v780_v2 = vld [vmem:[#allocation5 + $0x1000] sm:$0xff] }
  0xb6   : > { %v1037_v1 = vld [vmem:[#allocation5 + $0x1808] sm:$0xff]  ;;  %1623 = vmatprep.subr.mxu1 %v1045_v61  ;;  %v1036_v3 = vld [vmem:[#allocation5 + $0x1800] sm:$0xff]  ;;  %1523 = vmatpush1.msra.mxu0 %v788_v62  ;;  %v255_v61 = vld [vmem:[%s4242_s11 + $0x118] sm:$0xff] }
  0xb7   : > { %1624 = vmatpush1.msra.mxu1 %v1044_v63  ;;  %v1029_v4 = vld [vmem:[#allocation5 + $0x17c8] sm:$0xff]  ;;  %1524 = vmatprep.subr.mxu0 %v781_v0  ;;  %v1028_v6 = vld [vmem:[#allocation5 + $0x17c0] sm:$0xff] }
  0xb8   : > { %v1285_v5 = vld [vmem:[#allocation5 + $0x1fc8] sm:$0xff]  ;;  %1625 = vmatprep.subr.mxu1 %v1037_v1  ;;  %v1284_v7 = vld [vmem:[#allocation5 + $0x1fc0] sm:$0xff]  ;;  %1525 = vmatpush1.msra.mxu0 %v780_v2  ;;  %v254_v1 = vld [vmem:[%s4242_s11 + $0x110] sm:$0xff] }
  0xb9   : > { %1626 = vmatpush1.msra.mxu1 %v1036_v3  ;;  %v1021_v8 = vld [vmem:[#allocation5 + $0x1788] sm:$0xff]  ;;  %1526 = vmatprep.subr.mxu0 %v1029_v4  ;;  %v1020_v10 = vld [vmem:[#allocation5 + $0x1780] sm:$0xff] }
  0xba   : > { %v1277_v9 = vld [vmem:[#allocation5 + $0x1f88] sm:$0xff]  ;;  %1627 = vmatprep.subr.mxu1 %v1285_v5  ;;  %v1276_v11 = vld [vmem:[#allocation5 + $0x1f80] sm:$0xff]  ;;  %1527 = vmatpush2.msra.mxu0 %v1028_v6 }
  0xbb   : > { %1628 = vmatpush2.msra.mxu1 %v1284_v7  ;;  %v1013_v12 = vld [vmem:[#allocation5 + $0x1748] sm:$0xff]  ;;  %1528 = vmatprep.subr.mxu0 %v1021_v8  ;;  %v1012_v14 = vld [vmem:[#allocation5 + $0x1740] sm:$0xff] }
  0xbc   : > { %v1269_v13 = vld [vmem:[#allocation5 + $0x1f48] sm:$0xff]  ;;  %1629 = vmatprep.subr.mxu1 %v1277_v9  ;;  %v1268_v15 = vld [vmem:[#allocation5 + $0x1f40] sm:$0xff]  ;;  %1529 = vmatpush2.msra.mxu0 %v1020_v10  ;;  %v263_v9 = vld [vmem:[%s4242_s11 + $0x158] sm:$0xff] }
  0xbd   : > { %1630 = vmatpush2.msra.mxu1 %v1276_v11  ;;  %v1005_v16 = vld [vmem:[#allocation5 + $0x1708] sm:$0xff]  ;;  %1530 = vmatprep.subr.mxu0 %v1013_v12  ;;  %v1004_v18 = vld [vmem:[#allocation5 + $0x1700] sm:$0xff] }
  0xbe   : > { %v1261_v17 = vld [vmem:[#allocation5 + $0x1f08] sm:$0xff]  ;;  %1631 = vmatprep.subr.mxu1 %v1269_v13  ;;  %v1260_v19 = vld [vmem:[#allocation5 + $0x1f00] sm:$0xff]  ;;  %1531 = vmatpush2.msra.mxu0 %v1012_v14  ;;  %v262_v13 = vld [vmem:[%s4242_s11 + $0x150] sm:$0xff] }
  0xbf   : > { %1632 = vmatpush2.msra.mxu1 %v1268_v15  ;;  %v997_v20 = vld [vmem:[#allocation5 + $0x16c8] sm:$0xff]  ;;  %1532 = vmatprep.subr.mxu0 %v1005_v16  ;;  %v996_v22 = vld [vmem:[#allocation5 + $0x16c0] sm:$0xff] }
  0xc0   : > { %v1253_v21 = vld [vmem:[#allocation5 + $0x1ec8] sm:$0xff]  ;;  %1633 = vmatprep.subr.mxu1 %v1261_v17  ;;  %v1252_v23 = vld [vmem:[#allocation5 + $0x1ec0] sm:$0xff]  ;;  %1533 = vmatpush2.msra.mxu0 %v1004_v18 }
  0xc1   : > { %1634 = vmatpush2.msra.mxu1 %v1260_v19  ;;  %v229_v24 = vld [vmem:[%s4242_s11 + $0x48] sm:$0xff]  ;;  %1534 = vmatprep.subr.mxu0 %v997_v20  ;;  %v228_v28 = vld [vmem:[%s4242_s11 + $0x40] sm:$0xff] }
  0xc2   : > { %1635 = vmatprep.subr.mxu1 %v1253_v21  ;;  %v989_v26 = vld [vmem:[#allocation5 + $0x1688] sm:$0xff]  ;;  %1535 = vmatpush2.msra.mxu0 %v996_v22  ;;  %v988_v30 = vld [vmem:[#allocation5 + $0x1680] sm:$0xff] }
  0xc3   : > { %v1245_v27 = vld [vmem:[#allocation5 + $0x1e88] sm:$0xff]  ;;  %1636 = vmatpush2.msra.mxu1 %v1252_v23  ;;  %1362 = vmatprep.mubr.f32.mxu0 %v229_v24  ;;  %v1244_v31 = vld [vmem:[#allocation5 + $0x1e80] sm:$0xff] }
  0xc4   : > { %1463 = vmatprep.mubr.f32.mxu1 %v231_v25  ;;  %1536 = vmatprep.subr.mxu0 %v989_v26  ;;  %v981_v32 = vld [vmem:[#allocation5 + $0x1648] sm:$0xff]  ;;  %v980_v34 = vld [vmem:[#allocation5 + $0x1640] sm:$0xff]  ;;  %v227_v26 = vld [vmem:[%s4242_s11 + $0x38] sm:$0xff] }
  0xc5   : > { %1637 = vmatprep.subr.mxu1 %v1245_v27  ;;  %v1237_v33 = vld [vmem:[#allocation5 + $0x1e48] sm:$0xff]  ;;  %1363 = vmatmul.mubr.f32.gmra.mxu0 %v228_v28  ;;  %v1236_v35 = vld [vmem:[#allocation5 + $0x1e40] sm:$0xff]  ;;  %v391_v27 = vld [vmem:[#allocation5 + $0x3d8] sm:$0xff] }
  0xc6   : > { %1464 = vmatmul.mubr.f32.gmra.mxu1 %v230_v29  ;;  %1537 = vmatpush2.msra.mxu0 %v988_v30  ;;  %v237_v36 = vld [vmem:[%s4242_s11 + $0x88] sm:$0xff]  ;;  %v236_v40 = vld [vmem:[%s4242_s11 + $0x80] sm:$0xff]  ;;  %v647_v28 = vld [vmem:[#allocation5 + $0xbd8] sm:$0xff] }
  0xc7   : > { %1638 = vmatpush2.msra.mxu1 %v1244_v31  ;;  %1538 = vmatprep.subr.mxu0 %v981_v32  ;;  %v973_v38 = vld [vmem:[#allocation5 + $0x1608] sm:$0xff]  ;;  %v972_v42 = vld [vmem:[#allocation5 + $0x1600] sm:$0xff]  ;;  %v226_v29 = vld [vmem:[%s4242_s11 + $0x30] sm:$0xff] }
  0xc8   : > { %1639 = vmatprep.subr.mxu1 %v1237_v33  ;;  %v1229_v39 = vld [vmem:[#allocation5 + $0x1e08] sm:$0xff]  ;;  %1539 = vmatpush2.msra.mxu0 %v980_v34  ;;  %v1228_v43 = vld [vmem:[#allocation5 + $0x1e00] sm:$0xff]  ;;  %v390_v30 = vld [vmem:[#allocation5 + $0x3d0] sm:$0xff] }
  0xc9   : > { %1640 = vmatpush2.msra.mxu1 %v1236_v35  ;;  %1368 = vmatprep.mubr.f32.mxu0 %v237_v36  ;;  %v965_v44 = vld [vmem:[#allocation5 + $0x15c8] sm:$0xff]  ;;  %v964_v46 = vld [vmem:[#allocation5 + $0x15c0] sm:$0xff]  ;;  %v646_v31 = vld [vmem:[#allocation5 + $0xbd0] sm:$0xff] }
  0xca   : > { %1469 = vmatprep.mubr.f32.mxu1 %v239_v37  ;;  %1540 = vmatprep.subr.mxu0 %v973_v38  ;;  %v1221_v45 = vld [vmem:[#allocation5 + $0x1dc8] sm:$0xff]  ;;  %v1220_v47 = vld [vmem:[#allocation5 + $0x1dc0] sm:$0xff]  ;;  %v383_v32 = vld [vmem:[#allocation5 + $0x398] sm:$0xff] }
  0xcb   : > { %1641 = vmatprep.subr.mxu1 %v1229_v39  ;;  %1369 = vmatmul.mubr.f32.gmra.mxu0 %v236_v40  ;;  %v245_v48 = vld [vmem:[%s4242_s11 + $0xc8] sm:$0xff]  ;;  %v244_v52 = vld [vmem:[%s4242_s11 + $0xc0] sm:$0xff]  ;;  %v639_v33 = vld [vmem:[#allocation5 + $0xb98] sm:$0xff] }
  0xcc   : > { %1470 = vmatmul.mubr.f32.gmra.mxu1 %v238_v41  ;;  %1541 = vmatpush2.msra.mxu0 %v972_v42  ;;  %v957_v50 = vld [vmem:[#allocation5 + $0x1588] sm:$0xff]  ;;  %v956_v54 = vld [vmem:[#allocation5 + $0x1580] sm:$0xff]  ;;  %v382_v35 = vld [vmem:[#allocation5 + $0x390] sm:$0xff] }
  0xcd   : > { %1642 = vmatpush2.msra.mxu1 %v1228_v43  ;;  %1542 = vmatprep.subr.mxu0 %v965_v44  ;;  %v1213_v51 = vld [vmem:[#allocation5 + $0x1d88] sm:$0xff]  ;;  %v1212_v55 = vld [vmem:[#allocation5 + $0x1d80] sm:$0xff]  ;;  %v638_v36 = vld [vmem:[#allocation5 + $0xb90] sm:$0xff] }
  0xce   : > { %1643 = vmatprep.subr.mxu1 %v1221_v45  ;;  %1543 = vmatpush2.msra.mxu0 %v964_v46  ;;  %v949_v56 = vld [vmem:[#allocation5 + $0x1548] sm:$0xff]  ;;  %v948_v58 = vld [vmem:[#allocation5 + $0x1540] sm:$0xff]  ;;  %v375_v38 = vld [vmem:[#allocation5 + $0x358] sm:$0xff] }
  0xcf   : > { %1644 = vmatpush2.msra.mxu1 %v1220_v47  ;;  %1374 = vmatprep.mubr.f32.mxu0 %v245_v48  ;;  %v1205_v57 = vld [vmem:[#allocation5 + $0x1d48] sm:$0xff]  ;;  %v1204_v59 = vld [vmem:[#allocation5 + $0x1d40] sm:$0xff]  ;;  %v631_v39 = vld [vmem:[#allocation5 + $0xb58] sm:$0xff] }
  0xd0   : > { %1475 = vmatprep.mubr.f32.mxu1 %v247_v49  ;;  %1544 = vmatprep.subr.mxu0 %v957_v50  ;;  %v253_v60 = vld [vmem:[%s4242_s11 + $0x108] sm:$0xff]  ;;  %v252_v0 = vld [vmem:[%s4242_s11 + $0x100] sm:$0xff]  ;;  %v235_v40 = vld [vmem:[%s4242_s11 + $0x78] sm:$0xff] }
  0xd1   : > { %1645 = vmatprep.subr.mxu1 %v1213_v51  ;;  %1375 = vmatmul.mubr.f32.gmra.mxu0 %v244_v52  ;;  %v941_v62 = vld [vmem:[#allocation5 + $0x1508] sm:$0xff]  ;;  %v940_v2 = vld [vmem:[#allocation5 + $0x1500] sm:$0xff]  ;;  %v374_v41 = vld [vmem:[#allocation5 + $0x350] sm:$0xff] }
  0xd2   : > { %1476 = vmatmul.mubr.f32.gmra.mxu1 %v246_v53  ;;  %1545 = vmatpush2.msra.mxu0 %v956_v54  ;;  %v1197_v63 = vld [vmem:[#allocation5 + $0x1d08] sm:$0xff]  ;;  %v1196_v3 = vld [vmem:[#allocation5 + $0x1d00] sm:$0xff]  ;;  %v630_v42 = vld [vmem:[#allocation5 + $0xb50] sm:$0xff] }
  0xd3   : > { %1646 = vmatpush2.msra.mxu1 %v1212_v55  ;;  %1546 = vmatprep.subr.mxu0 %v949_v56  ;;  %v933_v4 = vld [vmem:[#allocation5 + $0x14c8] sm:$0xff]  ;;  %v932_v6 = vld [vmem:[#allocation5 + $0x14c0] sm:$0xff]  ;;  %v367_v43 = vld [vmem:[#allocation5 + $0x318] sm:$0xff] }
  0xd4   : > { %1647 = vmatprep.subr.mxu1 %v1205_v57  ;;  %1547 = vmatpush2.msra.mxu0 %v948_v58  ;;  %v1189_v5 = vld [vmem:[#allocation5 + $0x1cc8] sm:$0xff]  ;;  %v1188_v7 = vld [vmem:[#allocation5 + $0x1cc0] sm:$0xff]  ;;  %v234_v44 = vld [vmem:[%s4242_s11 + $0x70] sm:$0xff] }
  0xd5   : > { %1648 = vmatpush2.msra.mxu1 %v1204_v59  ;;  %1380 = vmatprep.mubr.f32.mxu0 %v253_v60  ;;  %v261_v8 = vld [vmem:[%s4242_s11 + $0x148] sm:$0xff]  ;;  %v260_v12 = vld [vmem:[%s4242_s11 + $0x140] sm:$0xff]  ;;  %v623_v45 = vld [vmem:[#allocation5 + $0xb18] sm:$0xff] }
  0xd6   : > { %1481 = vmatprep.mubr.f32.mxu1 %v255_v61  ;;  %1548 = vmatprep.subr.mxu0 %v941_v62  ;;  %v925_v10 = vld [vmem:[#allocation5 + $0x1488] sm:$0xff]  ;;  %v924_v14 = vld [vmem:[#allocation5 + $0x1480] sm:$0xff]  ;;  %v366_v47 = vld [vmem:[#allocation5 + $0x310] sm:$0xff] }
  0xd7   : > { %1649 = vmatprep.subr.mxu1 %v1197_v63  ;;  %1381 = vmatmul.mubr.f32.gmra.mxu0 %v252_v0  ;;  %v1181_v11 = vld [vmem:[#allocation5 + $0x1c88] sm:$0xff]  ;;  %v1180_v15 = vld [vmem:[#allocation5 + $0x1c80] sm:$0xff]  ;;  %v622_v48 = vld [vmem:[#allocation5 + $0xb10] sm:$0xff] }
  0xd8   : > { %1482 = vmatmul.mubr.f32.gmra.mxu1 %v254_v1  ;;  %1549 = vmatpush2.msra.mxu0 %v940_v2  ;;  %v917_v16 = vld [vmem:[#allocation5 + $0x1448] sm:$0xff]  ;;  %v916_v18 = vld [vmem:[#allocation5 + $0x1440] sm:$0xff]  ;;  %v359_v50 = vld [vmem:[#allocation5 + $0x2d8] sm:$0xff] }
  0xd9   : > { %1650 = vmatpush2.msra.mxu1 %v1196_v3  ;;  %1550 = vmatprep.subr.mxu0 %v933_v4  ;;  %v1173_v17 = vld [vmem:[#allocation5 + $0x1c48] sm:$0xff]  ;;  %v1172_v19 = vld [vmem:[#allocation5 + $0x1c40] sm:$0xff]  ;;  %v615_v51 = vld [vmem:[#allocation5 + $0xad8] sm:$0xff] }
  0xda   : > { %1651 = vmatprep.subr.mxu1 %v1189_v5  ;;  %1551 = vmatpush2.msra.mxu0 %v932_v6  ;;  %v909_v20 = vld [vmem:[#allocation5 + $0x1408] sm:$0xff]  ;;  %v908_v22 = vld [vmem:[#allocation5 + $0x1400] sm:$0xff]  ;;  %v243_v52 = vld [vmem:[%s4242_s11 + $0xb8] sm:$0xff] }
  0xdb   : > { %1652 = vmatpush2.msra.mxu1 %v1188_v7  ;;  %1386 = vmatprep.mubr.f32.mxu0 %v261_v8  ;;  %v1165_v21 = vld [vmem:[#allocation5 + $0x1c08] sm:$0xff]  ;;  %v1164_v24 = vld [vmem:[#allocation5 + $0x1c00] sm:$0xff]  ;;  %v358_v53 = vld [vmem:[#allocation5 + $0x2d0] sm:$0xff] }
  0xdc   : > { %1487 = vmatprep.mubr.f32.mxu1 %v263_v9  ;;  %1552 = vmatprep.subr.mxu0 %v925_v10  ;;  %v225_v23 = vld [vmem:[%s4242_s11 + $0x28] sm:$0xff]  ;;  %v224_v25 = vld [vmem:[%s4242_s11 + $0x20] sm:$0xff]  ;;  %v614_v54 = vld [vmem:[#allocation5 + $0xad0] sm:$0xff] }
  0xdd   : > { %1653 = vmatprep.subr.mxu1 %v1181_v11  ;;  %1387 = vmatmul.mubr.f32.gmra.mxu0 %v260_v12  ;;  %v233_v34 = vld [vmem:[%s4242_s11 + $0x68] sm:$0xff]  ;;  %v232_v37 = vld [vmem:[%s4242_s11 + $0x60] sm:$0xff]  ;;  %v351_v55 = vld [vmem:[#allocation5 + $0x298] sm:$0xff] }
  0xde   : > { %1488 = vmatmul.mubr.f32.gmra.mxu1 %v262_v13  ;;  %1553 = vmatpush2.msra.mxu0 %v924_v14  ;;  %v241_v46 = vld [vmem:[%s4242_s11 + $0xa8] sm:$0xff]  ;;  %v240_v49 = vld [vmem:[%s4242_s11 + $0xa0] sm:$0xff]  ;;  %v242_v56 = vld [vmem:[%s4242_s11 + $0xb0] sm:$0xff] }
  0xdf   : > { %1654 = vmatpush2.msra.mxu1 %v1180_v15  ;;  %1554 = vmatprep.subr.mxu0 %v917_v16  ;;  %v607_v57 = vld [vmem:[#allocation5 + $0xa98] sm:$0xff]  ;;  %v249_v58 = vld [vmem:[%s4242_s11 + $0xe8] sm:$0xff]  ;;  %v350_v59 = vld [vmem:[#allocation5 + $0x290] sm:$0xff] }
  0xe0   : > { %1655 = vmatprep.subr.mxu1 %v1173_v17  ;;  %1555 = vmatpush2.msra.mxu0 %v916_v18  ;;  %v606_v60 = vld [vmem:[#allocation5 + $0xa90] sm:$0xff]  ;;  %v248_v61 = vld [vmem:[%s4242_s11 + $0xe0] sm:$0xff]  ;;  %v343_v62 = vld [vmem:[#allocation5 + $0x258] sm:$0xff] }
  0xe1   : > { %1656 = vmatpush2.msra.mxu1 %v1172_v19  ;;  %1556 = vmatprep.subr.mxu0 %v909_v20  ;;  %v599_v63 = vld [vmem:[#allocation5 + $0xa58] sm:$0xff]  ;;  %v342_v1 = vld [vmem:[#allocation5 + $0x250] sm:$0xff]  ;;  %v257_v6 = vld [vmem:[%s4242_s11 + $0x128] sm:$0xff] }
  0xe2   : > { %1657 = vmatprep.subr.mxu1 %v1165_v21  ;;  %1557 = vmatpush2.msra.mxu0 %v908_v22  ;;  %v251_v0 = vld [vmem:[%s4242_s11 + $0xf8] sm:$0xff]  ;;  %v598_v2 = vld [vmem:[#allocation5 + $0xa50] sm:$0xff]  ;;  %v256_v9 = vld [vmem:[%s4242_s11 + $0x120] sm:$0xff] }
  0xe3   : > { %1558 = vmatprep.mubr.f32.mxu0 %v225_v23  ;;  %1658 = vmatpush2.msra.mxu1 %v1164_v24  ;;  %v335_v3 = vld [vmem:[#allocation5 + $0x218] sm:$0xff]  ;;  %v250_v4 = vld [vmem:[%s4242_s11 + $0xf0] sm:$0xff]  ;;  %v265_v18 = vld [vmem:[%s4242_s11 + $0x168] sm:$0xff] }
  0xe4   : > { %1559 = vmatmul.mubr.f32.vlgmr.msra.gmra.mxu0 %v224_v25  ;;  %1659 = vmatprep.mubr.f32.mxu1 %v227_v26  ;;  %v591_v5 = vld [vmem:[#allocation5 + $0xa18] sm:$0xff]  ;;  %v334_v7 = vld [vmem:[#allocation5 + $0x210] sm:$0xff]  ;;  %v264_v21 = vld [vmem:[%s4242_s11 + $0x160] sm:$0xff] }
  0xe5   : > { %1696 = vmatprep.subr.mxu0 %v391_v27  ;;  %1797 = vmatprep.subr.mxu1 %v647_v28  ;;  %v590_v8 = vld [vmem:[#allocation5 + $0xa10] sm:$0xff]  ;;  %v327_v10 = vld [vmem:[#allocation5 + $0x1d8] sm:$0xff] }
  0xe6   : > { %1660 = vmatmul.mubr.f32.vlgmr.msra.gmra.mxu1 %v226_v29  ;;  %1697 = vmatpush1.msra.mxu0 %v390_v30  ;;  %v583_v11 = vld [vmem:[#allocation5 + $0x9d8] sm:$0xff]  ;;  %v326_v13 = vld [vmem:[#allocation5 + $0x1d0] sm:$0xff] }
  0xe7   : > { %1798 = vmatpush1.msra.mxu1 %v646_v31  ;;  %1698 = vmatprep.subr.mxu0 %v383_v32  ;;  %v259_v12 = vld [vmem:[%s4242_s11 + $0x138] sm:$0xff]  ;;  %v582_v14 = vld [vmem:[#allocation5 + $0x9d0] sm:$0xff] }
  0xe8   : > { %1799 = vmatprep.subr.mxu1 %v639_v33  ;;  %1564 = vmatprep.mubr.f32.mxu0 %v233_v34  ;;  %v319_v15 = vld [vmem:[#allocation5 + $0x198] sm:$0xff]  ;;  %v258_v16 = vld [vmem:[%s4242_s11 + $0x130] sm:$0xff] }
  0xe9   : > { %1699 = vmatpush1.msra.mxu0 %v382_v35  ;;  %1800 = vmatpush1.msra.mxu1 %v638_v36  ;;  %v575_v17 = vld [vmem:[#allocation5 + $0x998] sm:$0xff]  ;;  %v318_v19 = vld [vmem:[#allocation5 + $0x190] sm:$0xff] }
  0xea   : > { %1565 = vmatmul.mubr.f32.gmra.mxu0 %v232_v37  ;;  %1700 = vmatprep.subr.mxu0 %v375_v38  ;;  %v574_v20 = vld [vmem:[#allocation5 + $0x990] sm:$0xff]  ;;  %v311_v22 = vld [vmem:[#allocation5 + $0x158] sm:$0xff] }
  0xeb   : > { %1801 = vmatprep.subr.mxu1 %v631_v39  ;;  %1665 = vmatprep.mubr.f32.mxu1 %v235_v40  ;;  %v567_v23 = vld [vmem:[#allocation5 + $0x958] sm:$0xff]  ;;  %v310_v25 = vld [vmem:[#allocation5 + $0x150] sm:$0xff] }
  0xec   : > { %1701 = vmatpush1.msra.mxu0 %v374_v41  ;;  %1802 = vmatpush1.msra.mxu1 %v630_v42  ;;  %v267_v24 = vld [vmem:[%s4242_s11 + $0x178] sm:$0xff]  ;;  %v566_v26 = vld [vmem:[#allocation5 + $0x950] sm:$0xff] }
  0xed   : > { %1702 = vmatprep.subr.mxu0 %v367_v43  ;;  %1666 = vmatmul.mubr.f32.gmra.mxu1 %v234_v44  ;;  %v303_v27 = vld [vmem:[#allocation5 + $0x118] sm:$0xff]  ;;  %v266_v28 = vld [vmem:[%s4242_s11 + $0x170] sm:$0xff] }
  0xee   : > { %1803 = vmatprep.subr.mxu1 %v623_v45  ;;  %1570 = vmatprep.mubr.f32.mxu0 %v241_v46  ;;  %v559_v29 = vld [vmem:[#allocation5 + $0x918] sm:$0xff]  ;;  %v302_v30 = vld [vmem:[#allocation5 + $0x110] sm:$0xff] }
  0xef   : > { %1703 = vmatpush1.msra.mxu0 %v366_v47  ;;  %1804 = vmatpush1.msra.mxu1 %v622_v48  ;;  %v558_v31 = vld [vmem:[#allocation5 + $0x910] sm:$0xff]  ;;  %v295_v32 = vld [vmem:[#allocation5 + $0xd8] sm:$0xff] }
  0xf0   : > { %1571 = vmatmul.mubr.f32.gmra.mxu0 %v240_v49  ;;  %1704 = vmatprep.subr.mxu0 %v359_v50  ;;  %v551_v33 = vld [vmem:[#allocation5 + $0x8d8] sm:$0xff]  ;;  %v294_v34 = vld [vmem:[#allocation5 + $0xd0] sm:$0xff] }
  0xf1   : > { %1805 = vmatprep.subr.mxu1 %v615_v51  ;;  %1671 = vmatprep.mubr.f32.mxu1 %v243_v52  ;;  %v550_v35 = vld [vmem:[#allocation5 + $0x8d0] sm:$0xff]  ;;  %v287_v36 = vld [vmem:[#allocation5 + $0x98] sm:$0xff] }
  0xf2   : > { %1705 = vmatpush1.msra.mxu0 %v358_v53  ;;  %1806 = vmatpush1.msra.mxu1 %v614_v54  ;;  %v543_v37 = vld [vmem:[#allocation5 + $0x898] sm:$0xff]  ;;  %v286_v38 = vld [vmem:[#allocation5 + $0x90] sm:$0xff] }
  0xf3   : > { %1706 = vmatprep.subr.mxu0 %v351_v55  ;;  %1672 = vmatmul.mubr.f32.gmra.mxu1 %v242_v56  ;;  %v542_v39 = vld [vmem:[#allocation5 + $0x890] sm:$0xff]  ;;  %v279_v40 = vld [vmem:[#allocation5 + $0x58] sm:$0xff] }
  0xf4   : > { %1807 = vmatprep.subr.mxu1 %v607_v57  ;;  %1576 = vmatprep.mubr.f32.mxu0 %v249_v58  ;;  %v535_v41 = vld [vmem:[#allocation5 + $0x858] sm:$0xff]  ;;  %v278_v42 = vld [vmem:[#allocation5 + $0x50] sm:$0xff] }
  0xf5   : > { %1707 = vmatpush1.msra.mxu0 %v350_v59  ;;  %1808 = vmatpush1.msra.mxu1 %v606_v60  ;;  %v534_v43 = vld [vmem:[#allocation5 + $0x850] sm:$0xff]  ;;  %v271_v44 = vld [vmem:[#allocation5 + $0x18] sm:$0xff] }
  0xf6   : > { %1577 = vmatmul.mubr.f32.gmra.mxu0 %v248_v61  ;;  %1708 = vmatprep.subr.mxu0 %v343_v62  ;;  %v527_v45 = vld [vmem:[#allocation5 + $0x818] sm:$0xff]  ;;  %v270_v46 = vld [vmem:[#allocation5 + $0x10] sm:$0xff] }
  0xf7   : > { %1809 = vmatprep.subr.mxu1 %v599_v63  ;;  %1677 = vmatprep.mubr.f32.mxu1 %v251_v0  ;;  %v526_v47 = vld [vmem:[#allocation5 + $0x810] sm:$0xff]  ;;  %v519_v48 = vld [vmem:[#allocation5 + $0x7d8] sm:$0xff] }
  0xf8   : > { %1709 = vmatpush1.msra.mxu0 %v342_v1  ;;  %1810 = vmatpush1.msra.mxu1 %v598_v2  ;;  %v775_v49 = vld [vmem:[#allocation5 + $0xfd8] sm:$0xff]  ;;  %v518_v50 = vld [vmem:[#allocation5 + $0x7d0] sm:$0xff] }
  0xf9   : > { %1710 = vmatprep.subr.mxu0 %v335_v3  ;;  %1678 = vmatmul.mubr.f32.gmra.mxu1 %v250_v4  ;;  %v774_v51 = vld [vmem:[#allocation5 + $0xfd0] sm:$0xff]  ;;  %v511_v52 = vld [vmem:[#allocation5 + $0x798] sm:$0xff] }
  0xfa   : > { %1811 = vmatprep.subr.mxu1 %v591_v5  ;;  %1582 = vmatprep.mubr.f32.mxu0 %v257_v6  ;;  %v767_v53 = vld [vmem:[#allocation5 + $0xf98] sm:$0xff]  ;;  %v510_v54 = vld [vmem:[#allocation5 + $0x790] sm:$0xff] }
  0xfb   : > { %1711 = vmatpush1.msra.mxu0 %v334_v7  ;;  %1812 = vmatpush1.msra.mxu1 %v590_v8  ;;  %v766_v55 = vld [vmem:[#allocation5 + $0xf90] sm:$0xff]  ;;  %v503_v56 = vld [vmem:[#allocation5 + $0x758] sm:$0xff] }
  0xfc   : > { %1583 = vmatmul.mubr.f32.gmra.mxu0 %v256_v9  ;;  %1712 = vmatprep.subr.mxu0 %v327_v10  ;;  %v759_v57 = vld [vmem:[#allocation5 + $0xf58] sm:$0xff]  ;;  %v502_v58 = vld [vmem:[#allocation5 + $0x750] sm:$0xff] }
  0xfd   : > { %1813 = vmatprep.subr.mxu1 %v583_v11  ;;  %1683 = vmatprep.mubr.f32.mxu1 %v259_v12  ;;  %v758_v59 = vld [vmem:[#allocation5 + $0xf50] sm:$0xff]  ;;  %v495_v60 = vld [vmem:[#allocation5 + $0x718] sm:$0xff] }
  0xfe   : > { %1713 = vmatpush1.msra.mxu0 %v326_v13  ;;  %1814 = vmatpush1.msra.mxu1 %v582_v14  ;;  %v751_v61 = vld [vmem:[#allocation5 + $0xf18] sm:$0xff]  ;;  %v494_v62 = vld [vmem:[#allocation5 + $0x710] sm:$0xff] }
  0xff   : > { %1714 = vmatprep.subr.mxu0 %v319_v15  ;;  %1684 = vmatmul.mubr.f32.gmra.mxu1 %v258_v16  ;;  %v750_v63 = vld [vmem:[#allocation5 + $0xf10] sm:$0xff]  ;;  %v487_v0 = vld [vmem:[#allocation5 + $0x6d8] sm:$0xff] }
 0x100   : > { %1815 = vmatprep.subr.mxu1 %v575_v17  ;;  %1588 = vmatprep.mubr.f32.mxu0 %v265_v18  ;;  %v743_v1 = vld [vmem:[#allocation5 + $0xed8] sm:$0xff]  ;;  %v486_v2 = vld [vmem:[#allocation5 + $0x6d0] sm:$0xff] }
 0x101   : > { %1715 = vmatpush1.msra.mxu0 %v318_v19  ;;  %1816 = vmatpush1.msra.mxu1 %v574_v20  ;;  %v742_v3 = vld [vmem:[#allocation5 + $0xed0] sm:$0xff]  ;;  %v479_v4 = vld [vmem:[#allocation5 + $0x698] sm:$0xff] }
 0x102   : > { %1589 = vmatmul.mubr.f32.gmra.mxu0 %v264_v21  ;;  %1716 = vmatprep.subr.mxu0 %v311_v22  ;;  %v735_v5 = vld [vmem:[#allocation5 + $0xe98] sm:$0xff]  ;;  %v478_v6 = vld [vmem:[#allocation5 + $0x690] sm:$0xff] }
 0x103   : > { %1817 = vmatprep.subr.mxu1 %v567_v23  ;;  %1689 = vmatprep.mubr.f32.mxu1 %v267_v24  ;;  %v734_v7 = vld [vmem:[#allocation5 + $0xe90] sm:$0xff]  ;;  %v471_v8 = vld [vmem:[#allocation5 + $0x658] sm:$0xff] }
 0x104   : > { %1717 = vmatpush1.msra.mxu0 %v310_v25  ;;  %1818 = vmatpush1.msra.mxu1 %v566_v26  ;;  %v727_v9 = vld [vmem:[#allocation5 + $0xe58] sm:$0xff]  ;;  %v470_v10 = vld [vmem:[#allocation5 + $0x650] sm:$0xff] }
 0x105   : > { %1718 = vmatprep.subr.mxu0 %v303_v27  ;;  %1690 = vmatmul.mubr.f32.gmra.mxu1 %v266_v28  ;;  %v726_v11 = vld [vmem:[#allocation5 + $0xe50] sm:$0xff]  ;;  %v463_v12 = vld [vmem:[#allocation5 + $0x618] sm:$0xff] }
 0x106   : > { %1819 = vmatprep.subr.mxu1 %v559_v29  ;;  %1719 = vmatpush1.msra.mxu0 %v302_v30  ;;  %v719_v13 = vld [vmem:[#allocation5 + $0xe18] sm:$0xff]  ;;  %v462_v14 = vld [vmem:[#allocation5 + $0x610] sm:$0xff] }
 0x107   : > { %1820 = vmatpush1.msra.mxu1 %v558_v31  ;;  %1720 = vmatprep.subr.mxu0 %v295_v32  ;;  %v718_v15 = vld [vmem:[#allocation5 + $0xe10] sm:$0xff]  ;;  %v455_v16 = vld [vmem:[#allocation5 + $0x5d8] sm:$0xff] }
 0x108   : > { %1821 = vmatprep.subr.mxu1 %v551_v33  ;;  %1721 = vmatpush1.msra.mxu0 %v294_v34  ;;  %v711_v17 = vld [vmem:[#allocation5 + $0xdd8] sm:$0xff]  ;;  %v454_v18 = vld [vmem:[#allocation5 + $0x5d0] sm:$0xff] }
 0x109   : > { %1822 = vmatpush1.msra.mxu1 %v550_v35  ;;  %1722 = vmatprep.subr.mxu0 %v287_v36  ;;  %v710_v19 = vld [vmem:[#allocation5 + $0xdd0] sm:$0xff]  ;;  %v447_v20 = vld [vmem:[#allocation5 + $0x598] sm:$0xff] }
 0x10a   : > { %1823 = vmatprep.subr.mxu1 %v543_v37  ;;  %1723 = vmatpush1.msra.mxu0 %v286_v38  ;;  %v703_v21 = vld [vmem:[#allocation5 + $0xd98] sm:$0xff]  ;;  %v446_v22 = vld [vmem:[#allocation5 + $0x590] sm:$0xff] }
 0x10b   : > { %1824 = vmatpush1.msra.mxu1 %v542_v39  ;;  %1724 = vmatprep.subr.mxu0 %v279_v40  ;;  %v702_v23 = vld [vmem:[#allocation5 + $0xd90] sm:$0xff]  ;;  %v439_v24 = vld [vmem:[#allocation5 + $0x558] sm:$0xff] }
 0x10c   : > { %1825 = vmatprep.subr.mxu1 %v535_v41  ;;  %1725 = vmatpush1.msra.mxu0 %v278_v42  ;;  %v695_v25 = vld [vmem:[#allocation5 + $0xd58] sm:$0xff]  ;;  %v438_v26 = vld [vmem:[#allocation5 + $0x550] sm:$0xff] }
 0x10d   : > { %1826 = vmatpush1.msra.mxu1 %v534_v43  ;;  %1726 = vmatprep.subr.mxu0 %v271_v44  ;;  %v694_v27 = vld [vmem:[#allocation5 + $0xd50] sm:$0xff]  ;;  %v431_v28 = vld [vmem:[#allocation5 + $0x518] sm:$0xff] }
 0x10e   : > { %1827 = vmatprep.subr.mxu1 %v527_v45  ;;  %1727 = vmatpush1.msra.mxu0 %v270_v46  ;;  %v687_v29 = vld [vmem:[#allocation5 + $0xd18] sm:$0xff]  ;;  %v430_v30 = vld [vmem:[#allocation5 + $0x510] sm:$0xff] }
 0x10f   : > { %1828 = vmatpush1.msra.mxu1 %v526_v47  ;;  %1728 = vmatprep.subr.mxu0 %v519_v48  ;;  %v686_v31 = vld [vmem:[#allocation5 + $0xd10] sm:$0xff]  ;;  %v423_v32 = vld [vmem:[#allocation5 + $0x4d8] sm:$0xff]  ;;  %v3783_v48 = vld [vmem:[%s4242_s11 + $0x8] sm:$0xff] }
 0x110   : > { %1829 = vmatprep.subr.mxu1 %v775_v49  ;;  %1729 = vmatpush2.msra.mxu0 %v518_v50  ;;  %v679_v33 = vld [vmem:[#allocation5 + $0xcd8] sm:$0xff]  ;;  %v422_v34 = vld [vmem:[#allocation5 + $0x4d0] sm:$0xff] }
 0x111   : > { %1830 = vmatpush2.msra.mxu1 %v774_v51  ;;  %1730 = vmatprep.subr.mxu0 %v511_v52  ;;  %v678_v35 = vld [vmem:[#allocation5 + $0xcd0] sm:$0xff]  ;;  %v415_v36 = vld [vmem:[#allocation5 + $0x498] sm:$0xff] }
 0x112   : > { %1831 = vmatprep.subr.mxu1 %v767_v53  ;;  %1731 = vmatpush2.msra.mxu0 %v510_v54  ;;  %v671_v37 = vld [vmem:[#allocation5 + $0xc98] sm:$0xff]  ;;  %v414_v38 = vld [vmem:[#allocation5 + $0x490] sm:$0xff]  ;;  %v3785_v54 = vld [vmem:[%s4242_s11] sm:$0xff] }
 0x113   : > { %1832 = vmatpush2.msra.mxu1 %v766_v55  ;;  %1732 = vmatprep.subr.mxu0 %v503_v56  ;;  %v670_v39 = vld [vmem:[#allocation5 + $0xc90] sm:$0xff]  ;;  %v407_v40 = vld [vmem:[#allocation5 + $0x458] sm:$0xff] }
 0x114   : > { %1833 = vmatprep.subr.mxu1 %v759_v57  ;;  %1733 = vmatpush2.msra.mxu0 %v502_v58  ;;  %v663_v41 = vld [vmem:[#allocation5 + $0xc58] sm:$0xff]  ;;  %v406_v42 = vld [vmem:[#allocation5 + $0x450] sm:$0xff] }
 0x115   : > { %1834 = vmatpush2.msra.mxu1 %v758_v59  ;;  %1734 = vmatprep.subr.mxu0 %v495_v60  ;;  %v662_v43 = vld [vmem:[#allocation5 + $0xc50] sm:$0xff]  ;;  %v399_v44 = vld [vmem:[#allocation5 + $0x418] sm:$0xff] }
 0x116   : > { %1835 = vmatprep.subr.mxu1 %v751_v61  ;;  %1735 = vmatpush2.msra.mxu0 %v494_v62  ;;  %v655_v45 = vld [vmem:[#allocation5 + $0xc18] sm:$0xff]  ;;  %v398_v46 = vld [vmem:[#allocation5 + $0x410] sm:$0xff] }
 0x117   : > { %1836 = vmatpush2.msra.mxu1 %v750_v63  ;;  %1736 = vmatprep.subr.mxu0 %v487_v0  ;;  %v654_v47 = vld [vmem:[#allocation5 + $0xc10] sm:$0xff]  ;;  %v903_v49 = vld [vmem:[#allocation5 + $0x13d8] sm:$0xff] }
 0x118   : > { %1837 = vmatprep.subr.mxu1 %v743_v1  ;;  %1737 = vmatpush2.msra.mxu0 %v486_v2  ;;  %v1159_v50 = vld [vmem:[#allocation5 + $0x1bd8] sm:$0xff]  ;;  %v902_v52 = vld [vmem:[#allocation5 + $0x13d0] sm:$0xff] }
 0x119   : > { %1838 = vmatpush2.msra.mxu1 %v742_v3  ;;  %1738 = vmatprep.subr.mxu0 %v479_v4  ;;  %v3784_v51 = vld [vmem:[%s4242_s11 + $0x18] sm:$0xff]  ;;  %v1158_v53 = vld [vmem:[#allocation5 + $0x1bd0] sm:$0xff] }
 0x11a   : > { %1839 = vmatprep.subr.mxu1 %v735_v5  ;;  %1739 = vmatpush2.msra.mxu0 %v478_v6  ;;  %v3786_v55 = vld [vmem:[%s4242_s11 + $0x10] sm:$0xff]  ;;  %v895_v56 = vld [vmem:[#allocation5 + $0x1398] sm:$0xff] }
 0x11b   : > { %1840 = vmatpush2.msra.mxu1 %v734_v7  ;;  %1740 = vmatprep.subr.mxu0 %v471_v8  ;;  %v1151_v57 = vld [vmem:[#allocation5 + $0x1b98] sm:$0xff]  ;;  %v894_v58 = vld [vmem:[#allocation5 + $0x1390] sm:$0xff] }
 0x11c   : > { %1841 = vmatprep.subr.mxu1 %v727_v9  ;;  %1741 = vmatpush2.msra.mxu0 %v470_v10  ;;  %v1150_v59 = vld [vmem:[#allocation5 + $0x1b90] sm:$0xff]  ;;  %v887_v60 = vld [vmem:[#allocation5 + $0x1358] sm:$0xff] }
 0x11d   : > { %1842 = vmatpush2.msra.mxu1 %v726_v11  ;;  %1742 = vmatprep.subr.mxu0 %v463_v12  ;;  %v1143_v61 = vld [vmem:[#allocation5 + $0x1b58] sm:$0xff]  ;;  %v886_v62 = vld [vmem:[#allocation5 + $0x1350] sm:$0xff] }
 0x11e   : > { %1843 = vmatprep.subr.mxu1 %v719_v13  ;;  %1743 = vmatpush2.msra.mxu0 %v462_v14  ;;  %v1142_v63 = vld [vmem:[#allocation5 + $0x1b50] sm:$0xff]  ;;  %v879_v0 = vld [vmem:[#allocation5 + $0x1318] sm:$0xff] }
 0x11f   : > { %1844 = vmatpush2.msra.mxu1 %v718_v15  ;;  %1744 = vmatprep.subr.mxu0 %v455_v16  ;;  %v1135_v1 = vld [vmem:[#allocation5 + $0x1b18] sm:$0xff]  ;;  %v878_v2 = vld [vmem:[#allocation5 + $0x1310] sm:$0xff] }
 0x120   : > { %1845 = vmatprep.subr.mxu1 %v711_v17  ;;  %1745 = vmatpush2.msra.mxu0 %v454_v18  ;;  %v1134_v3 = vld [vmem:[#allocation5 + $0x1b10] sm:$0xff]  ;;  %v871_v4 = vld [vmem:[#allocation5 + $0x12d8] sm:$0xff] }
 0x121   : > { %1846 = vmatpush2.msra.mxu1 %v710_v19  ;;  %1746 = vmatprep.subr.mxu0 %v447_v20  ;;  %v1127_v5 = vld [vmem:[#allocation5 + $0x1ad8] sm:$0xff]  ;;  %v870_v6 = vld [vmem:[#allocation5 + $0x12d0] sm:$0xff] }
 0x122   : > { %1847 = vmatprep.subr.mxu1 %v703_v21  ;;  %1747 = vmatpush2.msra.mxu0 %v446_v22  ;;  %v1126_v7 = vld [vmem:[#allocation5 + $0x1ad0] sm:$0xff]  ;;  %v863_v8 = vld [vmem:[#allocation5 + $0x1298] sm:$0xff] }
 0x123   : > { %1848 = vmatpush2.msra.mxu1 %v702_v23  ;;  %1748 = vmatprep.subr.mxu0 %v439_v24  ;;  %v1119_v9 = vld [vmem:[#allocation5 + $0x1a98] sm:$0xff]  ;;  %v862_v10 = vld [vmem:[#allocation5 + $0x1290] sm:$0xff] }
 0x124   : > { %1849 = vmatprep.subr.mxu1 %v695_v25  ;;  %1749 = vmatpush2.msra.mxu0 %v438_v26  ;;  %v1118_v11 = vld [vmem:[#allocation5 + $0x1a90] sm:$0xff]  ;;  %v855_v12 = vld [vmem:[#allocation5 + $0x1258] sm:$0xff] }
 0x125   : > { %1850 = vmatpush2.msra.mxu1 %v694_v27  ;;  %1750 = vmatprep.subr.mxu0 %v431_v28  ;;  %v1111_v13 = vld [vmem:[#allocation5 + $0x1a58] sm:$0xff]  ;;  %v854_v14 = vld [vmem:[#allocation5 + $0x1250] sm:$0xff] }
 0x126   : > { %1851 = vmatprep.subr.mxu1 %v687_v29  ;;  %1751 = vmatpush2.msra.mxu0 %v430_v30  ;;  %v1110_v15 = vld [vmem:[#allocation5 + $0x1a50] sm:$0xff]  ;;  %v847_v16 = vld [vmem:[#allocation5 + $0x1218] sm:$0xff] }
 0x127   : > { %1852 = vmatpush2.msra.mxu1 %v686_v31  ;;  %1752 = vmatprep.subr.mxu0 %v423_v32  ;;  %v1103_v17 = vld [vmem:[#allocation5 + $0x1a18] sm:$0xff]  ;;  %v846_v18 = vld [vmem:[#allocation5 + $0x1210] sm:$0xff] }
 0x128   : > { %1853 = vmatprep.subr.mxu1 %v679_v33  ;;  %1753 = vmatpush2.msra.mxu0 %v422_v34  ;;  %v1102_v19 = vld [vmem:[#allocation5 + $0x1a10] sm:$0xff]  ;;  %v839_v20 = vld [vmem:[#allocation5 + $0x11d8] sm:$0xff] }
 0x129   : > { %1854 = vmatpush2.msra.mxu1 %v678_v35  ;;  %1754 = vmatprep.subr.mxu0 %v415_v36  ;;  %v1095_v21 = vld [vmem:[#allocation5 + $0x19d8] sm:$0xff]  ;;  %v838_v22 = vld [vmem:[#allocation5 + $0x11d0] sm:$0xff] }
 0x12a   : > { %1855 = vmatprep.subr.mxu1 %v671_v37  ;;  %1755 = vmatpush2.msra.mxu0 %v414_v38  ;;  %v1094_v23 = vld [vmem:[#allocation5 + $0x19d0] sm:$0xff]  ;;  %v831_v24 = vld [vmem:[#allocation5 + $0x1198] sm:$0xff] }
 0x12b   : > { %1856 = vmatpush2.msra.mxu1 %v670_v39  ;;  %1756 = vmatprep.subr.mxu0 %v407_v40  ;;  %v1087_v25 = vld [vmem:[#allocation5 + $0x1998] sm:$0xff]  ;;  %v830_v26 = vld [vmem:[#allocation5 + $0x1190] sm:$0xff] }
 0x12c   : > { %1857 = vmatprep.subr.mxu1 %v663_v41  ;;  %1757 = vmatpush2.msra.mxu0 %v406_v42  ;;  %v1086_v27 = vld [vmem:[#allocation5 + $0x1990] sm:$0xff]  ;;  %v823_v28 = vld [vmem:[#allocation5 + $0x1158] sm:$0xff] }
 0x12d   : > { %1858 = vmatpush2.msra.mxu1 %v662_v43  ;;  %1758 = vmatprep.subr.mxu0 %v399_v44  ;;  %v1079_v29 = vld [vmem:[#allocation5 + $0x1958] sm:$0xff]  ;;  %v822_v30 = vld [vmem:[#allocation5 + $0x1150] sm:$0xff] }
 0x12e   : > { %1859 = vmatprep.subr.mxu1 %v655_v45  ;;  %1759 = vmatpush2.msra.mxu0 %v398_v46  ;;  %v1078_v31 = vld [vmem:[#allocation5 + $0x1950] sm:$0xff]  ;;  %v815_v32 = vld [vmem:[#allocation5 + $0x1118] sm:$0xff] }
 0x12f   : > { %1760 = vmatprep.mubr.f32.mxu0 %v3783_v48  ;;  %1860 = vmatpush2.msra.mxu1 %v654_v47  ;;  %v1071_v33 = vld [vmem:[#allocation5 + $0x1918] sm:$0xff]  ;;  %v814_v34 = vld [vmem:[#allocation5 + $0x1110] sm:$0xff] }
 0x130   : > { %1861 = vmatprep.mubr.f32.mxu1 %v3784_v51  ;;  %1761 = vmatmul.mubr.f32.vlgmr.msra.gmra.mxu0 %v3785_v54  ;;  %v1070_v35 = vld [vmem:[#allocation5 + $0x1910] sm:$0xff]  ;;  %v807_v36 = vld [vmem:[#allocation5 + $0x10d8] sm:$0xff] }
 0x131   : > { %1862 = vmatmul.mubr.f32.vlgmr.msra.gmra.mxu1 %v3786_v55  ;;  %1898 = vmatprep.subr.mxu0 %v903_v49  ;;  %v1063_v37 = vld [vmem:[#allocation5 + $0x18d8] sm:$0xff]  ;;  %v806_v38 = vld [vmem:[#allocation5 + $0x10d0] sm:$0xff] }
 0x132   : > { %1999 = vmatprep.subr.mxu1 %v1159_v50  ;;  %1899 = vmatpush1.msra.mxu0 %v902_v52  ;;  %v1062_v39 = vld [vmem:[#allocation5 + $0x18d0] sm:$0xff]  ;;  %v799_v40 = vld [vmem:[#allocation5 + $0x1098] sm:$0xff] }
 0x133   : > { %2000 = vmatpush1.msra.mxu1 %v1158_v53  ;;  %1900 = vmatprep.subr.mxu0 %v895_v56  ;;  %v1055_v41 = vld [vmem:[#allocation5 + $0x1898] sm:$0xff]  ;;  %v798_v42 = vld [vmem:[#allocation5 + $0x1090] sm:$0xff] }
 0x134   : > { %2001 = vmatprep.subr.mxu1 %v1151_v57  ;;  %1901 = vmatpush1.msra.mxu0 %v894_v58  ;;  %v1054_v43 = vld [vmem:[#allocation5 + $0x1890] sm:$0xff]  ;;  %v791_v44 = vld [vmem:[#allocation5 + $0x1058] sm:$0xff] }
 0x135   : > { %2002 = vmatpush1.msra.mxu1 %v1150_v59  ;;  %1902 = vmatprep.subr.mxu0 %v887_v60  ;;  %v1047_v45 = vld [vmem:[#allocation5 + $0x1858] sm:$0xff]  ;;  %v790_v46 = vld [vmem:[#allocation5 + $0x1050] sm:$0xff] }
 0x136   : > { %2003 = vmatprep.subr.mxu1 %v1143_v61  ;;  %1903 = vmatpush1.msra.mxu0 %v886_v62  ;;  %v1046_v47 = vld [vmem:[#allocation5 + $0x1850] sm:$0xff]  ;;  %v783_v48 = vld [vmem:[#allocation5 + $0x1018] sm:$0xff] }
 0x137   : > { %2004 = vmatpush1.msra.mxu1 %v1142_v63  ;;  %1904 = vmatprep.subr.mxu0 %v879_v0  ;;  %v1039_v49 = vld [vmem:[#allocation5 + $0x1818] sm:$0xff]  ;;  %v782_v50 = vld [vmem:[#allocation5 + $0x1010] sm:$0xff] }
 0x138   : > { %2005 = vmatprep.subr.mxu1 %v1135_v1  ;;  %1905 = vmatpush1.msra.mxu0 %v878_v2  ;;  %v1038_v51 = vld [vmem:[#allocation5 + $0x1810] sm:$0xff]  ;;  %v1031_v52 = vld [vmem:[#allocation5 + $0x17d8] sm:$0xff] }
 0x139   : > { %2006 = vmatpush1.msra.mxu1 %v1134_v3  ;;  %1906 = vmatprep.subr.mxu0 %v871_v4  ;;  %v1287_v53 = vld [vmem:[#allocation5 + $0x1fd8] sm:$0xff]  ;;  %v1030_v54 = vld [vmem:[#allocation5 + $0x17d0] sm:$0xff] }
 0x13a   : > { %2007 = vmatprep.subr.mxu1 %v1127_v5  ;;  %1907 = vmatpush1.msra.mxu0 %v870_v6  ;;  %v1286_v55 = vld [vmem:[#allocation5 + $0x1fd0] sm:$0xff]  ;;  %v1023_v56 = vld [vmem:[#allocation5 + $0x1798] sm:$0xff] }
 0x13b   : > { %2008 = vmatpush1.msra.mxu1 %v1126_v7  ;;  %1908 = vmatprep.subr.mxu0 %v863_v8  ;;  %v1279_v57 = vld [vmem:[#allocation5 + $0x1f98] sm:$0xff]  ;;  %v1022_v58 = vld [vmem:[#allocation5 + $0x1790] sm:$0xff] }
 0x13c   : > { %2009 = vmatprep.subr.mxu1 %v1119_v9  ;;  %1909 = vmatpush1.msra.mxu0 %v862_v10  ;;  %v1278_v59 = vld [vmem:[#allocation5 + $0x1f90] sm:$0xff]  ;;  %v1015_v60 = vld [vmem:[#allocation5 + $0x1758] sm:$0xff] }
 0x13d   : > { %2010 = vmatpush1.msra.mxu1 %v1118_v11  ;;  %1910 = vmatprep.subr.mxu0 %v855_v12  ;;  %v1271_v61 = vld [vmem:[#allocation5 + $0x1f58] sm:$0xff]  ;;  %v1014_v62 = vld [vmem:[#allocation5 + $0x1750] sm:$0xff] }
 0x13e   : > { %2011 = vmatprep.subr.mxu1 %v1111_v13  ;;  %1911 = vmatpush1.msra.mxu0 %v854_v14  ;;  %v1270_v63 = vld [vmem:[#allocation5 + $0x1f50] sm:$0xff]  ;;  %v1007_v0 = vld [vmem:[#allocation5 + $0x1718] sm:$0xff] }
 0x13f   : > { %2012 = vmatpush1.msra.mxu1 %v1110_v15  ;;  %1912 = vmatprep.subr.mxu0 %v847_v16  ;;  %v1263_v1 = vld [vmem:[#allocation5 + $0x1f18] sm:$0xff]  ;;  %v1006_v2 = vld [vmem:[#allocation5 + $0x1710] sm:$0xff]  ;;  %v3787_v15 = vld [vmem:[%s4242_s11 + $0x48] sm:$0xff] }
 0x140   : > { %2013 = vmatprep.subr.mxu1 %v1103_v17  ;;  %1913 = vmatpush1.msra.mxu0 %v846_v18  ;;  %v1262_v3 = vld [vmem:[#allocation5 + $0x1f10] sm:$0xff]  ;;  %v999_v4 = vld [vmem:[#allocation5 + $0x16d8] sm:$0xff] }
 0x141   : > { %2014 = vmatpush1.msra.mxu1 %v1102_v19  ;;  %1914 = vmatprep.subr.mxu0 %v839_v20  ;;  %v1255_v5 = vld [vmem:[#allocation5 + $0x1ed8] sm:$0xff]  ;;  %v998_v6 = vld [vmem:[#allocation5 + $0x16d0] sm:$0xff] }
 0x142   : > { %2015 = vmatprep.subr.mxu1 %v1095_v21  ;;  %1915 = vmatpush1.msra.mxu0 %v838_v22  ;;  %v1254_v7 = vld [vmem:[#allocation5 + $0x1ed0] sm:$0xff]  ;;  %v991_v10 = vld [vmem:[#allocation5 + $0x1698] sm:$0xff]  ;;  %v3789_v22 = vld [vmem:[%s4242_s11 + $0x40] sm:$0xff] }
 0x143   : > { %2016 = vmatpush1.msra.mxu1 %v1094_v23  ;;  %1916 = vmatprep.subr.mxu0 %v831_v24  ;;  %v1247_v11 = vld [vmem:[#allocation5 + $0x1e98] sm:$0xff]  ;;  %v990_v17 = vld [vmem:[#allocation5 + $0x1690] sm:$0xff] }
 0x144   : > { %2017 = vmatprep.subr.mxu1 %v1087_v25  ;;  %1917 = vmatpush1.msra.mxu0 %v830_v26  ;;  %v3788_v16 = vld [vmem:[%s4242_s11 + $0x58] sm:$0xff]  ;;  %v1246_v18 = vld [vmem:[#allocation5 + $0x1e90] sm:$0xff] }
 0x145   : > { %2018 = vmatpush1.msra.mxu1 %v1086_v27  ;;  %1918 = vmatprep.subr.mxu0 %v823_v28  ;;  %v983_v20 = vld [vmem:[#allocation5 + $0x1658] sm:$0xff]  ;;  %v3790_v23 = vld [vmem:[%s4242_s11 + $0x50] sm:$0xff]  ;;  %v3791_v28 = vld [vmem:[%s4242_s11 + $0x88] sm:$0xff] }
 0x146   : > { %2019 = vmatprep.subr.mxu1 %v1079_v29  ;;  %1919 = vmatpush1.msra.mxu0 %v822_v30  ;;  %v1239_v21 = vld [vmem:[#allocation5 + $0x1e58] sm:$0xff]  ;;  %v982_v24 = vld [vmem:[#allocation5 + $0x1650] sm:$0xff] }
 0x147   : > { %2020 = vmatpush1.msra.mxu1 %v1078_v31  ;;  %1920 = vmatprep.subr.mxu0 %v815_v32  ;;  %v1238_v25 = vld [vmem:[#allocation5 + $0x1e50] sm:$0xff]  ;;  %v975_v26 = vld [vmem:[#allocation5 + $0x1618] sm:$0xff] }
 0x148   : > { %2021 = vmatprep.subr.mxu1 %v1071_v33  ;;  %1921 = vmatpush1.msra.mxu0 %v814_v34  ;;  %v1231_v27 = vld [vmem:[#allocation5 + $0x1e18] sm:$0xff]  ;;  %v974_v30 = vld [vmem:[#allocation5 + $0x1610] sm:$0xff]  ;;  %v3793_v34 = vld [vmem:[%s4242_s11 + $0x80] sm:$0xff] }
 0x149   : > { %2022 = vmatpush1.msra.mxu1 %v1070_v35  ;;  %1922 = vmatprep.subr.mxu0 %v807_v36  ;;  %v3792_v29 = vld [vmem:[%s4242_s11 + $0x98] sm:$0xff]  ;;  %v1230_v31 = vld [vmem:[#allocation5 + $0x1e10] sm:$0xff] }
 0x14a   : > { %2023 = vmatprep.subr.mxu1 %v1063_v37  ;;  %1923 = vmatpush1.msra.mxu0 %v806_v38  ;;  %v967_v32 = vld [vmem:[#allocation5 + $0x15d8] sm:$0xff]  ;;  %v3794_v35 = vld [vmem:[%s4242_s11 + $0x90] sm:$0xff] }
 0x14b   : > { %2024 = vmatpush1.msra.mxu1 %v1062_v39  ;;  %1924 = vmatprep.subr.mxu0 %v799_v40  ;;  %v1223_v33 = vld [vmem:[#allocation5 + $0x1dd8] sm:$0xff]  ;;  %v966_v36 = vld [vmem:[#allocation5 + $0x15d0] sm:$0xff]  ;;  %v3795_v40 = vld [vmem:[%s4242_s11 + $0xc8] sm:$0xff] }
 0x14c   : > { %2025 = vmatprep.subr.mxu1 %v1055_v41  ;;  %1925 = vmatpush1.msra.mxu0 %v798_v42  ;;  %v1222_v37 = vld [vmem:[#allocation5 + $0x1dd0] sm:$0xff]  ;;  %v959_v38 = vld [vmem:[#allocation5 + $0x1598] sm:$0xff] }
 0x14d   : > { %2026 = vmatpush1.msra.mxu1 %v1054_v43  ;;  %1926 = vmatprep.subr.mxu0 %v791_v44  ;;  %v1215_v39 = vld [vmem:[#allocation5 + $0x1d98] sm:$0xff]  ;;  %v958_v42 = vld [vmem:[#allocation5 + $0x1590] sm:$0xff] }
 0x14e   : > { %2027 = vmatprep.subr.mxu1 %v1047_v45  ;;  %1927 = vmatpush1.msra.mxu0 %v790_v46  ;;  %v3796_v41 = vld [vmem:[%s4242_s11 + $0xd8] sm:$0xff]  ;;  %v1214_v43 = vld [vmem:[#allocation5 + $0x1d90] sm:$0xff]  ;;  %v3797_v46 = vld [vmem:[%s4242_s11 + $0xc0] sm:$0xff] }
 0x14f   : > { %2028 = vmatpush1.msra.mxu1 %v1046_v47  ;;  %1928 = vmatprep.subr.mxu0 %v783_v48  ;;  %v951_v44 = vld [vmem:[#allocation5 + $0x1558] sm:$0xff]  ;;  %v3798_v47 = vld [vmem:[%s4242_s11 + $0xd0] sm:$0xff] }
 0x150   : > { %2029 = vmatprep.subr.mxu1 %v1039_v49  ;;  %1929 = vmatpush1.msra.mxu0 %v782_v50  ;;  %v1207_v45 = vld [vmem:[#allocation5 + $0x1d58] sm:$0xff]  ;;  %v950_v48 = vld [vmem:[#allocation5 + $0x1550] sm:$0xff] }
 0x151   : > { %2030 = vmatpush1.msra.mxu1 %v1038_v51  ;;  %1930 = vmatprep.subr.mxu0 %v1031_v52  ;;  %v1206_v49 = vld [vmem:[#allocation5 + $0x1d50] sm:$0xff]  ;;  %v943_v50 = vld [vmem:[#allocation5 + $0x1518] sm:$0xff]  ;;  %v3799_v52 = vld [vmem:[%s4242_s11 + $0x108] sm:$0xff] }
 0x152   : > { %2031 = vmatprep.subr.mxu1 %v1287_v53  ;;  %1931 = vmatpush2.msra.mxu0 %v1030_v54  ;;  %v1199_v51 = vld [vmem:[#allocation5 + $0x1d18] sm:$0xff]  ;;  %v942_v54 = vld [vmem:[#allocation5 + $0x1510] sm:$0xff] }
 0x153   : > { %2032 = vmatpush2.msra.mxu1 %v1286_v55  ;;  %1932 = vmatprep.subr.mxu0 %v1023_v56  ;;  %v3800_v53 = vld [vmem:[%s4242_s11 + $0x118] sm:$0xff]  ;;  %v1198_v55 = vld [vmem:[#allocation5 + $0x1d10] sm:$0xff] }
 0x154   : > { %2033 = vmatprep.subr.mxu1 %v1279_v57  ;;  %1933 = vmatpush2.msra.mxu0 %v1022_v58  ;;  %v935_v56 = vld [vmem:[#allocation5 + $0x14d8] sm:$0xff]  ;;  %v3801_v58 = vld [vmem:[%s4242_s11 + $0x100] sm:$0xff] }
 0x155   : > { %2034 = vmatpush2.msra.mxu1 %v1278_v59  ;;  %1934 = vmatprep.subr.mxu0 %v1015_v60  ;;  %v1191_v57 = vld [vmem:[#allocation5 + $0x1cd8] sm:$0xff]  ;;  %v3802_v59 = vld [vmem:[%s4242_s11 + $0x110] sm:$0xff] }
 0x156   : > { %2035 = vmatprep.subr.mxu1 %v1271_v61  ;;  %1935 = vmatpush2.msra.mxu0 %v1014_v62  ;;  %v934_v60 = vld [vmem:[#allocation5 + $0x14d0] sm:$0xff]  ;;  %v927_v62 = vld [vmem:[#allocation5 + $0x1498] sm:$0xff] }
 0x157   : > { %2036 = vmatpush2.msra.mxu1 %v1270_v63  ;;  %1936 = vmatprep.subr.mxu0 %v1007_v0  ;;  %v1190_v61 = vld [vmem:[#allocation5 + $0x1cd0] sm:$0xff]  ;;  %v1183_v63 = vld [vmem:[#allocation5 + $0x1c98] sm:$0xff]  ;;  %v3803_v0 = vld [vmem:[%s4242_s11 + $0x148] sm:$0xff] }
 0x158   : > { %2037 = vmatprep.subr.mxu1 %v1263_v1  ;;  %1937 = vmatpush2.msra.mxu0 %v1006_v2  ;;  %v1358_v8 = vpop.f32.mrf.mxu0  ;;  %v3804_v1 = vld [vmem:[%s4242_s11 + $0x158] sm:$0xff]  ;;  %v926_v2 = vld [vmem:[#allocation5 + $0x1490] sm:$0xff] }
 0x159   : > { %2038 = vmatpush2.msra.mxu1 %v1262_v3  ;;  %v1459_v9 = vpop.f32.mrf.mxu1  ;;  %1938 = vmatprep.subr.mxu0 %v999_v4  ;;  %v1182_v3 = vld [vmem:[#allocation5 + $0x1c90] sm:$0xff]  ;;  %v919_v4 = vld [vmem:[#allocation5 + $0x1458] sm:$0xff] }
 0x15a   : > { %2039 = vmatprep.subr.mxu1 %v1255_v5  ;;  %v4304_v12 = vadd.f32 %v1459_v9, %v1358_v8  ;;  %1939 = vmatpush2.msra.mxu0 %v998_v6  ;;  %v1360_v13 = vpop.f32.mrf.mxu0  ;;  %v1175_v5 = vld [vmem:[#allocation5 + $0x1c58] sm:$0xff]  ;;  %v3805_v6 = vld [vmem:[%s4242_s11 + $0x140] sm:$0xff]  ;;  %v918_v8 = vld [vmem:[#allocation5 + $0x1450] sm:$0xff] }
 0x15b   : > { %2040 = vmatpush2.msra.mxu1 %v1254_v7  ;;  %v1461_v14 = vpop.f32.mrf.mxu1  ;;  %1766 = vmatprep.mubr.f32.mxu0 %v3787_v15  ;;  %v3806_v7 = vld [vmem:[%s4242_s11 + $0x150] sm:$0xff]  ;;  %v393_v15 = vld [vmem:[#allocation5 + $0x3e8] sm:$0xff] }
 0x15c   : > { %1867 = vmatprep.mubr.f32.mxu1 %v3788_v16  ;;  %v4308_v19 = vadd.f32 %v1461_v14, %v1360_v13  ;;  %1940 = vmatprep.subr.mxu0 %v991_v10  ;;  %v1174_v9 = vld [vmem:[#allocation5 + $0x1c50] sm:$0xff]  ;;  %v911_v10 = vld [vmem:[#allocation5 + $0x1418] sm:$0xff]  ;;  %v3807_v16 = vld [vmem:[%s4242_s11 + $0x28] sm:$0xff] }
 0x15d   : > { %2041 = vmatprep.subr.mxu1 %v1247_v11  ;;  %1767 = vmatmul.mubr.f32.gmra.mxu0 %v3789_v22  ;;  %v1167_v11 = vld [vmem:[#allocation5 + $0x1c18] sm:$0xff]  ;;  %v910_v13 = vld [vmem:[#allocation5 + $0x1410] sm:$0xff] }
 0x15e   : > { %1868 = vmatmul.mubr.f32.gmra.mxu1 %v3790_v23  ;;  %1941 = vmatpush2.msra.mxu0 %v990_v17  ;;  %v1166_v14 = vld [vmem:[#allocation5 + $0x1c10] sm:$0xff]  ;;  %v649_v17 = vld [vmem:[#allocation5 + $0xbe8] sm:$0xff]  ;;  %v3809_v22 = vld [vmem:[%s4242_s11 + $0x38] sm:$0xff] }
 0x15f   : > { %2042 = vmatpush2.msra.mxu1 %v1246_v18  ;;  %1942 = vmatprep.subr.mxu0 %v983_v20  ;;  %v3808_v18 = vld [vmem:[%s4242_s11 + $0x20] sm:$0xff]  ;;  %v385_v23 = vld [vmem:[#allocation5 + $0x3a8] sm:$0xff] }
 0x160   : > { %2043 = vmatprep.subr.mxu1 %v1239_v21  ;;  %1943 = vmatpush2.msra.mxu0 %v982_v24  ;;  %v392_v20 = vld [vmem:[#allocation5 + $0x3e0] sm:$0xff]  ;;  %v641_v24 = vld [vmem:[#allocation5 + $0xba8] sm:$0xff] }
 0x161   : > { %2044 = vmatpush2.msra.mxu1 %v1238_v25  ;;  %1772 = vmatprep.mubr.f32.mxu0 %v3791_v28  ;;  %v648_v21 = vld [vmem:[#allocation5 + $0xbe0] sm:$0xff]  ;;  %v3810_v25 = vld [vmem:[%s4242_s11 + $0x30] sm:$0xff]  ;;  %v377_v28 = vld [vmem:[#allocation5 + $0x368] sm:$0xff] }
 0x162   : > { %1873 = vmatprep.mubr.f32.mxu1 %v3792_v29  ;;  %1944 = vmatprep.subr.mxu0 %v975_v26  ;;  %v384_v26 = vld [vmem:[#allocation5 + $0x3a0] sm:$0xff]  ;;  %v633_v29 = vld [vmem:[#allocation5 + $0xb68] sm:$0xff] }
 0x163   : > { %2045 = vmatprep.subr.mxu1 %v1231_v27  ;;  %1773 = vmatmul.mubr.f32.gmra.mxu0 %v3793_v34  ;;  %v640_v27 = vld [vmem:[#allocation5 + $0xba0] sm:$0xff]  ;;  %v369_v34 = vld [vmem:[#allocation5 + $0x328] sm:$0xff] }
 0x164   : > { %1874 = vmatmul.mubr.f32.gmra.mxu1 %v3794_v35  ;;  %1945 = vmatpush2.msra.mxu0 %v974_v30  ;;  %v3811_v30 = vld [vmem:[%s4242_s11 + $0x68] sm:$0xff] }
 0x165   : > { %2046 = vmatpush2.msra.mxu1 %v1230_v31  ;;  %1946 = vmatprep.subr.mxu0 %v967_v32  ;;  %v376_v31 = vld [vmem:[#allocation5 + $0x360] sm:$0xff]  ;;  %v625_v35 = vld [vmem:[#allocation5 + $0xb28] sm:$0xff] }
 0x166   : > { %2047 = vmatprep.subr.mxu1 %v1223_v33  ;;  %1947 = vmatpush2.msra.mxu0 %v966_v36  ;;  %v3812_v32 = vld [vmem:[%s4242_s11 + $0x60] sm:$0xff]  ;;  %v3813_v36 = vld [vmem:[%s4242_s11 + $0x78] sm:$0xff] }
 0x167   : > { %2048 = vmatpush2.msra.mxu1 %v1222_v37  ;;  %1778 = vmatprep.mubr.f32.mxu0 %v3795_v40  ;;  %v632_v33 = vld [vmem:[#allocation5 + $0xb60] sm:$0xff]  ;;  %v361_v40 = vld [vmem:[#allocation5 + $0x2e8] sm:$0xff] }
 0x168   : > { %1879 = vmatprep.mubr.f32.mxu1 %v3796_v41  ;;  %1948 = vmatprep.subr.mxu0 %v959_v38  ;;  %v368_v37 = vld [vmem:[#allocation5 + $0x320] sm:$0xff]  ;;  %v617_v41 = vld [vmem:[#allocation5 + $0xae8] sm:$0xff] }
 0x169   : > { %2049 = vmatprep.subr.mxu1 %v1215_v39  ;;  %1779 = vmatmul.mubr.f32.gmra.mxu0 %v3797_v46  ;;  %v624_v38 = vld [vmem:[#allocation5 + $0xb20] sm:$0xff]  ;;  %v3814_v39 = vld [vmem:[%s4242_s11 + $0x70] sm:$0xff] }
 0x16a   : > { %1880 = vmatmul.mubr.f32.gmra.mxu1 %v3798_v47  ;;  %1949 = vmatpush2.msra.mxu0 %v958_v42  ;;  %v3816_v47 = vld [vmem:[%s4242_s11 + $0xa0] sm:$0xff] }
 0x16b   : > { %2050 = vmatpush2.msra.mxu1 %v1214_v43  ;;  %1950 = vmatprep.subr.mxu0 %v951_v44  ;;  %v3815_v44 = vld [vmem:[%s4242_s11 + $0xa8] sm:$0xff] }
 0x16c   : > { %2051 = vmatprep.subr.mxu1 %v1207_v45  ;;  %1951 = vmatpush2.msra.mxu0 %v950_v48  ;;  %v360_v45 = vld [vmem:[#allocation5 + $0x2e0] sm:$0xff] }
 0x16d   : > { %2052 = vmatpush2.msra.mxu1 %v1206_v49  ;;  %1784 = vmatprep.mubr.f32.mxu0 %v3799_v52  ;;  %v616_v48 = vld [vmem:[#allocation5 + $0xae0] sm:$0xff]  ;;  %v353_v49 = vld [vmem:[#allocation5 + $0x2a8] sm:$0xff] }
 0x16e   : > { %1885 = vmatprep.mubr.f32.mxu1 %v3800_v53  ;;  %1952 = vmatprep.subr.mxu0 %v943_v50  ;;  %v609_v52 = vld [vmem:[#allocation5 + $0xaa8] sm:$0xff] }
 0x16f   : > { %2053 = vmatprep.subr.mxu1 %v1199_v51  ;;  %1785 = vmatmul.mubr.f32.gmra.mxu0 %v3801_v58  ;;  %v345_v58 = vld [vmem:[#allocation5 + $0x268] sm:$0xff] }
 0x170   : > { %1886 = vmatmul.mubr.f32.gmra.mxu1 %v3802_v59  ;;  %1953 = vmatpush2.msra.mxu0 %v942_v54  ;;  %v3817_v54 = vld [vmem:[%s4242_s11 + $0xb8] sm:$0xff]  ;;  %v601_v59 = vld [vmem:[#allocation5 + $0xa68] sm:$0xff] }
 0x171   : > { %2054 = vmatpush2.msra.mxu1 %v1198_v55  ;;  %1954 = vmatprep.subr.mxu0 %v935_v56  ;;  %v352_v55 = vld [vmem:[#allocation5 + $0x2a0] sm:$0xff] }
 0x172   : > { %2055 = vmatprep.subr.mxu1 %v1191_v57  ;;  %1955 = vmatpush2.msra.mxu0 %v934_v60  ;;  %v608_v56 = vld [vmem:[#allocation5 + $0xaa0] sm:$0xff]  ;;  %v3818_v57 = vld [vmem:[%s4242_s11 + $0xb0] sm:$0xff] }
 0x173   : > { %2056 = vmatpush2.msra.mxu1 %v1190_v61  ;;  %1790 = vmatprep.mubr.f32.mxu0 %v3803_v0 }
 0x174   : > { %1891 = vmatprep.mubr.f32.mxu1 %v3804_v1  ;;  %1956 = vmatprep.subr.mxu0 %v927_v62  ;;  %v3819_v62 = vld [vmem:[%s4242_s11 + $0xe8] sm:$0xff]  ;;  %v3820_v1 = vld [vmem:[%s4242_s11 + $0xe0] sm:$0xff] }
 0x175   : > { %2057 = vmatprep.subr.mxu1 %v1183_v63  ;;  %1791 = vmatmul.mubr.f32.gmra.mxu0 %v3805_v6  ;;  %v344_v63 = vld [vmem:[#allocation5 + $0x260] sm:$0xff]  ;;  %v593_v6 = vld [vmem:[#allocation5 + $0xa28] sm:$0xff] }
 0x176   : > { %1892 = vmatmul.mubr.f32.gmra.mxu1 %v3806_v7  ;;  %1957 = vmatpush2.msra.mxu0 %v926_v2  ;;  %v600_v2 = vld [vmem:[#allocation5 + $0xa60] sm:$0xff] }
 0x177   : > { %2058 = vmatpush2.msra.mxu1 %v1182_v3  ;;  %1958 = vmatprep.subr.mxu0 %v919_v4  ;;  %v337_v3 = vld [vmem:[#allocation5 + $0x228] sm:$0xff] }
 0x178   : > { %2059 = vmatprep.subr.mxu1 %v1175_v5  ;;  %1959 = vmatpush2.msra.mxu0 %v918_v8  ;;  %v3821_v8 = vld [vmem:[%s4242_s11 + $0xf8] sm:$0xff] }
 0x179   : > { %2060 = vmatpush2.msra.mxu1 %v1174_v9  ;;  %1960 = vmatprep.subr.mxu0 %v911_v10  ;;  %v336_v9 = vld [vmem:[#allocation5 + $0x220] sm:$0xff] }
 0x17a   : > { %2061 = vmatprep.subr.mxu1 %v1167_v11  ;;  %1961 = vmatpush2.msra.mxu0 %v910_v13  ;;  %v592_v10 = vld [vmem:[#allocation5 + $0xa20] sm:$0xff]  ;;  %v3822_v11 = vld [vmem:[%s4242_s11 + $0xf0] sm:$0xff]  ;;  %v329_v13 = vld [vmem:[#allocation5 + $0x1e8] sm:$0xff] }
 0x17b   : > { %1962 = vmatprep.mubr.f32.mxu0 %v3807_v16  ;;  %2062 = vmatpush2.msra.mxu1 %v1166_v14  ;;  %v585_v14 = vld [vmem:[#allocation5 + $0x9e8] sm:$0xff] }
 0x17c   : > { %1963 = vmatmul.mubr.f32.vlgmr.msra.gmra.mxu0 %v3808_v18  ;;  %2063 = vmatprep.mubr.f32.mxu1 %v3809_v22  ;;  %v328_v18 = vld [vmem:[#allocation5 + $0x1e0] sm:$0xff] }
 0x17d   : > { %2100 = vmatprep.subr.mxu0 %v393_v15  ;;  %2201 = vmatprep.subr.mxu1 %v649_v17  ;;  %v3823_v17 = vld [vmem:[%s4242_s11 + $0x128] sm:$0xff]  ;;  %v584_v22 = vld [vmem:[#allocation5 + $0x9e0] sm:$0xff] }
 0x17e   : > { %2064 = vmatmul.mubr.f32.vlgmr.msra.gmra.mxu1 %v3810_v25  ;;  %2101 = vmatpush1.msra.mxu0 %v392_v20 }
 0x17f   : > { %2202 = vmatpush1.msra.mxu1 %v648_v21  ;;  %2102 = vmatprep.subr.mxu0 %v385_v23  ;;  %v3824_v21 = vld [vmem:[%s4242_s11 + $0x120] sm:$0xff]  ;;  %v321_v23 = vld [vmem:[#allocation5 + $0x1a8] sm:$0xff] }
 0x180   : > { %2203 = vmatprep.subr.mxu1 %v641_v24  ;;  %1968 = vmatprep.mubr.f32.mxu0 %v3811_v30  ;;  %v576_v30 = vld [vmem:[#allocation5 + $0x9a0] sm:$0xff] }
 0x181   : > { %2103 = vmatpush1.msra.mxu0 %v384_v26  ;;  %2204 = vmatpush1.msra.mxu1 %v640_v27  ;;  %v577_v26 = vld [vmem:[#allocation5 + $0x9a8] sm:$0xff] }
 0x182   : > { %1969 = vmatmul.mubr.f32.gmra.mxu0 %v3812_v32  ;;  %2104 = vmatprep.subr.mxu0 %v377_v28  ;;  %v3825_v28 = vld [vmem:[%s4242_s11 + $0x138] sm:$0xff]  ;;  %v313_v32 = vld [vmem:[#allocation5 + $0x168] sm:$0xff] }
 0x183   : > { %2205 = vmatprep.subr.mxu1 %v633_v29  ;;  %2069 = vmatprep.mubr.f32.mxu1 %v3813_v36  ;;  %v320_v29 = vld [vmem:[#allocation5 + $0x1a0] sm:$0xff]  ;;  %v3827_v36 = vld [vmem:[%s4242_s11 + $0x168] sm:$0xff] }
 0x184   : > { %2105 = vmatpush1.msra.mxu0 %v376_v31  ;;  %2206 = vmatpush1.msra.mxu1 %v632_v33  ;;  %v3826_v31 = vld [vmem:[%s4242_s11 + $0x130] sm:$0xff]  ;;  %v569_v33 = vld [vmem:[#allocation5 + $0x968] sm:$0xff] }
 0x185   : > { %2106 = vmatprep.subr.mxu0 %v369_v34  ;;  %2070 = vmatmul.mubr.f32.gmra.mxu1 %v3814_v39  ;;  %v1364_v42 = vpop.f32.mrf.mxu0  ;;  %v3828_v39 = vld [vmem:[%s4242_s11 + $0x160] sm:$0xff] }
 0x186   : > { %2207 = vmatprep.subr.mxu1 %v625_v35  ;;  %v1465_v43 = vpop.f32.mrf.mxu1  ;;  %1974 = vmatprep.mubr.f32.mxu0 %v3815_v44  ;;  %v561_v44 = vld [vmem:[#allocation5 + $0x928] sm:$0xff] }
 0x187   : > { %2107 = vmatpush1.msra.mxu0 %v368_v37  ;;  %v4337_v46 = vadd.f32 %v1465_v43, %v1364_v42  ;;  %2208 = vmatpush1.msra.mxu1 %v624_v38  ;;  %v1366_v50 = vpop.f32.mrf.mxu0  ;;  %v312_v37 = vld [vmem:[#allocation5 + $0x160] sm:$0xff] }
 0x188   : > { %1975 = vmatmul.mubr.f32.gmra.mxu0 %v3816_v47  ;;  %v1467_v51 = vpop.f32.mrf.mxu1  ;;  %2108 = vmatprep.subr.mxu0 %v361_v40  ;;  %v568_v40 = vld [vmem:[#allocation5 + $0x960] sm:$0xff]  ;;  %v3829_v47 = vld [vmem:[%s4242_s11 + $0x178] sm:$0xff] }
 0x189   : > { %2209 = vmatprep.subr.mxu1 %v617_v41  ;;  %v4340_v53 = vadd.f32 %v1467_v51, %v1366_v50  ;;  %2075 = vmatprep.mubr.f32.mxu1 %v3817_v54  ;;  %v305_v41 = vld [vmem:[#allocation5 + $0x128] sm:$0xff]  ;;  %v296_v54 = vld [vmem:[#allocation5 + $0xe0] sm:$0xff] }
 0x18a   : > { %2109 = vmatpush1.msra.mxu0 %v360_v45  ;;  %2210 = vmatpush1.msra.mxu1 %v616_v48  ;;  %v304_v48 = vld [vmem:[#allocation5 + $0x120] sm:$0xff]  ;;  %v297_v50 = vld [vmem:[#allocation5 + $0xe8] sm:$0xff] }
 0x18b   : > { %2110 = vmatprep.subr.mxu0 %v353_v49  ;;  %2076 = vmatmul.mubr.f32.gmra.mxu1 %v3818_v57  ;;  %v1370_v60 = vpop.f32.mrf.mxu0  ;;  %v560_v49 = vld [vmem:[#allocation5 + $0x920] sm:$0xff]  ;;  %v553_v51 = vld [vmem:[#allocation5 + $0x8e8] sm:$0xff] }
 0x18c   : > { %2211 = vmatprep.subr.mxu1 %v609_v52  ;;  %v1471_v61 = vpop.f32.mrf.mxu1  ;;  %1980 = vmatprep.mubr.f32.mxu0 %v3819_v62  ;;  %v3830_v52 = vld [vmem:[%s4242_s11 + $0x170] sm:$0xff]  ;;  %v544_v62 = vld [vmem:[#allocation5 + $0x8a0] sm:$0xff] }
 0x18d   : > { %2111 = vmatpush1.msra.mxu0 %v352_v55  ;;  %v4345_v0 = vadd.f32 %v1471_v61, %v1370_v60  ;;  %2212 = vmatpush1.msra.mxu1 %v608_v56  ;;  %v1372_v4 = vpop.f32.mrf.mxu0  ;;  %v552_v55 = vld [vmem:[#allocation5 + $0x8e0] sm:$0xff] }
 0x18e   : > { %1981 = vmatmul.mubr.f32.gmra.mxu0 %v3820_v1  ;;  %v1473_v5 = vpop.f32.mrf.mxu1  ;;  %2112 = vmatprep.subr.mxu0 %v345_v58  ;;  %v289_v58 = vld [vmem:[#allocation5 + $0xa8] sm:$0xff]  ;;  %v288_v61 = vld [vmem:[#allocation5 + $0xa0] sm:$0xff] }
 0x18f   : > { %2213 = vmatprep.subr.mxu1 %v601_v59  ;;  %v4348_v7 = vadd.f32 %v1473_v5, %v1372_v4  ;;  %2081 = vmatprep.mubr.f32.mxu1 %v3821_v8  ;;  %v545_v59 = vld [vmem:[#allocation5 + $0x8a8] sm:$0xff]  ;;  %v280_v5 = vld [vmem:[#allocation5 + $0x60] sm:$0xff] }
 0x190   : > { %2113 = vmatpush1.msra.mxu0 %v344_v63  ;;  %2214 = vmatpush1.msra.mxu1 %v600_v2  ;;  %v281_v2 = vld [vmem:[#allocation5 + $0x68] sm:$0xff] }
 0x191   : > { %2114 = vmatprep.subr.mxu0 %v337_v3  ;;  %2082 = vmatmul.mubr.f32.gmra.mxu1 %v3822_v11  ;;  %v1376_v15 = vpop.f32.mrf.mxu0  ;;  %v537_v3 = vld [vmem:[#allocation5 + $0x868] sm:$0xff]  ;;  %v528_v11 = vld [vmem:[#allocation5 + $0x820] sm:$0xff] }
 0x192   : > { %2215 = vmatprep.subr.mxu1 %v593_v6  ;;  %v1477_v16 = vpop.f32.mrf.mxu1  ;;  %1986 = vmatprep.mubr.f32.mxu0 %v3823_v17  ;;  %v536_v6 = vld [vmem:[#allocation5 + $0x860] sm:$0xff]  ;;  %v273_v8 = vld [vmem:[#allocation5 + $0x28] sm:$0xff] }
 0x193   : > { %2115 = vmatpush1.msra.mxu0 %v336_v9  ;;  %v4353_v20 = vadd.f32 %v1477_v16, %v1376_v15  ;;  %2216 = vmatpush1.msra.mxu1 %v592_v10  ;;  %v1378_v24 = vpop.f32.mrf.mxu0  ;;  %v529_v9 = vld [vmem:[#allocation5 + $0x828] sm:$0xff]  ;;  %v272_v10 = vld [vmem:[#allocation5 + $0x20] sm:$0xff] }
 0x194   : > { %1987 = vmatmul.mubr.f32.gmra.mxu0 %v3824_v21  ;;  %v1479_v25 = vpop.f32.mrf.mxu1  ;;  %2116 = vmatprep.subr.mxu0 %v329_v13  ;;  %v777_v15 = vld [vmem:[#allocation5 + $0xfe8] sm:$0xff]  ;;  %v520_v17 = vld [vmem:[#allocation5 + $0x7e0] sm:$0xff] }
 0x195   : > { %2217 = vmatprep.subr.mxu1 %v585_v14  ;;  %v4356_v27 = vadd.f32 %v1479_v25, %v1378_v24  ;;  %2087 = vmatprep.mubr.f32.mxu1 %v3825_v28  ;;  %v521_v14 = vld [vmem:[#allocation5 + $0x7e8] sm:$0xff]  ;;  %v512_v28 = vld [vmem:[#allocation5 + $0x7a0] sm:$0xff] }
 0x196   : > { %2117 = vmatpush1.msra.mxu0 %v328_v18  ;;  %2218 = vmatpush1.msra.mxu1 %v584_v22  ;;  %v776_v18 = vld [vmem:[#allocation5 + $0xfe0] sm:$0xff]  ;;  %v769_v24 = vld [vmem:[#allocation5 + $0xfa8] sm:$0xff] }
 0x197   : > { %2118 = vmatprep.subr.mxu0 %v321_v23  ;;  %2088 = vmatmul.mubr.f32.gmra.mxu1 %v3826_v31  ;;  %v1382_v34 = vpop.f32.mrf.mxu0  ;;  %v513_v23 = vld [vmem:[#allocation5 + $0x7a8] sm:$0xff] }
 0x198   : > { %2219 = vmatprep.subr.mxu1 %v577_v26  ;;  %v1483_v35 = vpop.f32.mrf.mxu1  ;;  %1992 = vmatprep.mubr.f32.mxu0 %v3827_v36  ;;  %v761_v31 = vld [vmem:[#allocation5 + $0xf68] sm:$0xff] }
 0x199   : > { %2119 = vmatpush1.msra.mxu0 %v320_v29  ;;  %v4361_v38 = vadd.f32 %v1483_v35, %v1382_v34  ;;  %2220 = vmatpush1.msra.mxu1 %v576_v30  ;;  %v1384_v42 = vpop.f32.mrf.mxu0  ;;  %v768_v29 = vld [vmem:[#allocation5 + $0xfa0] sm:$0xff]  ;;  %v497_v36 = vld [vmem:[#allocation5 + $0x728] sm:$0xff] }
 0x19a   : > { %1993 = vmatmul.mubr.f32.gmra.mxu0 %v3828_v39  ;;  %v1485_v43 = vpop.f32.mrf.mxu1  ;;  %2120 = vmatprep.subr.mxu0 %v313_v32  ;;  %v760_v34 = vld [vmem:[#allocation5 + $0xf60] sm:$0xff] }
 0x19b   : > { %2221 = vmatprep.subr.mxu1 %v569_v33  ;;  %v4364_v45 = vadd.f32 %v1485_v43, %v1384_v42  ;;  %2093 = vmatprep.mubr.f32.mxu1 %v3829_v47  ;;  %v504_v33 = vld [vmem:[#allocation5 + $0x760] sm:$0xff]  ;;  %v489_v42 = vld [vmem:[#allocation5 + $0x6e8] sm:$0xff] }
 0x19c   : > { %2121 = vmatpush1.msra.mxu0 %v312_v37  ;;  %2222 = vmatpush1.msra.mxu1 %v568_v40  ;;  %v496_v39 = vld [vmem:[#allocation5 + $0x720] sm:$0xff]  ;;  %v745_v43 = vld [vmem:[#allocation5 + $0xee8] sm:$0xff] }
 0x19d   : > { %2122 = vmatprep.subr.mxu0 %v305_v41  ;;  %2094 = vmatmul.mubr.f32.gmra.mxu1 %v3830_v52  ;;  %v1388_v56 = vpop.f32.mrf.mxu0  ;;  %v752_v40 = vld [vmem:[#allocation5 + $0xf20] sm:$0xff] }
 0x19e   : > { %2223 = vmatprep.subr.mxu1 %v561_v44  ;;  %v1489_v57 = vpop.f32.mrf.mxu1  ;;  %2123 = vmatpush1.msra.mxu0 %v304_v48  ;;  %v488_v47 = vld [vmem:[#allocation5 + $0x6e0] sm:$0xff] }
 0x19f   : > { %2224 = vmatpush1.msra.mxu1 %v560_v49  ;;  %v4368_v60 = vadd.f32 %v1489_v57, %v1388_v56  ;;  %2124 = vmatprep.subr.mxu0 %v297_v50  ;;  %v1390_v63 = vpop.f32.mrf.mxu0  ;;  %v744_v48 = vld [vmem:[#allocation5 + $0xee0] sm:$0xff]  ;;  %v481_v50 = vld [vmem:[#allocation5 + $0x6a8] sm:$0xff] }
 0x1a0   : > { %2225 = vmatprep.subr.mxu1 %v553_v51  ;;  %v1491_v1 = vpop.f32.mrf.mxu1  ;;  %2125 = vmatpush1.msra.mxu0 %v296_v54  ;;  %v480_v52 = vld [vmem:[#allocation5 + $0x6a0] sm:$0xff]  ;;  %v729_v57 = vld [vmem:[#allocation5 + $0xe68] sm:$0xff] }
 0x1a1   : > { %2226 = vmatpush1.msra.mxu1 %v552_v55  ;;  %v4370_v4 = vadd.f32 %v1491_v1, %v1390_v63  ;;  %2126 = vmatprep.subr.mxu0 %v289_v58  ;;  %v736_v54 = vld [vmem:[#allocation5 + $0xea0] sm:$0xff]  ;;  %v465_v1 = vld [vmem:[#allocation5 + $0x628] sm:$0xff] }
 0x1a2   : > { %2227 = vmatprep.subr.mxu1 %v545_v59  ;;  %2127 = vmatpush1.msra.mxu0 %v288_v61  ;;  %v472_v61 = vld [vmem:[#allocation5 + $0x660] sm:$0xff] }
 0x1a3   : > { %2228 = vmatpush1.msra.mxu1 %v544_v62  ;;  %2128 = vmatprep.subr.mxu0 %v281_v2  ;;  %v728_v62 = vld [vmem:[#allocation5 + $0xe60] sm:$0xff]  ;;  %v721_v2 = vld [vmem:[#allocation5 + $0xe28] sm:$0xff] }
 0x1a4   : > { %2229 = vmatprep.subr.mxu1 %v537_v3  ;;  %v1560_v13 = vpop.f32.mrf.mxu0  ;;  %2129 = vmatpush1.msra.mxu0 %v280_v5  ;;  %v464_v5 = vld [vmem:[#allocation5 + $0x620] sm:$0xff] }
 0x1a5   : > { %2230 = vmatpush1.msra.mxu1 %v536_v6  ;;  %v1561_v16 = vadd.f32 %v1560_v13, %v4304_v12  ;;  %2130 = vmatprep.subr.mxu0 %v273_v8  ;;  %v505_v12 = vld [vmem:[#allocation5 + $0x768] sm:$0xff]  ;;  %v720_v6 = vld [vmem:[#allocation5 + $0xe20] sm:$0xff] }
 0x1a6   : > { %2231 = vmatprep.subr.mxu1 %v529_v9  ;;  %v1661_v21 = vpop.f32.mrf.mxu1  ;;  %v1562_v22 = vpop.f32.mrf.mxu0  ;;  %2131 = vmatpush1.msra.mxu0 %v272_v10  ;;  %v713_v9 = vld [vmem:[#allocation5 + $0xde8] sm:$0xff]  ;;  %v712_v13 = vld [vmem:[#allocation5 + $0xde0] sm:$0xff] }
 0x1a7   : > { %2232 = vmatpush1.msra.mxu1 %v528_v11  ;;  %v4373_v25 = vadd.f32 %v1661_v21, %v1561_v16  ;;  %v1563_v26 = vadd.f32 %v1562_v22, %v4308_v19  ;;  %2132 = vmatprep.subr.mxu0 %v521_v14  ;;  %v753_v19 = vld [vmem:[#allocation5 + $0xf28] sm:$0xff]  ;;  %v456_v11 = vld [vmem:[#allocation5 + $0x5e0] sm:$0xff] }
 0x1a8   : > { %2233 = vmatprep.subr.mxu1 %v777_v15  ;;  %v1663_v30 = vpop.f32.mrf.mxu1  ;;  %2133 = vmatpush2.msra.mxu0 %v520_v17  ;;  %v705_v16 = vld [vmem:[#allocation5 + $0xda8] sm:$0xff]  ;;  %v448_v21 = vld [vmem:[#allocation5 + $0x5a0] sm:$0xff] }
 0x1a9   : > { %2234 = vmatpush2.msra.mxu1 %v776_v18  ;;  %v4376_v32 = vadd.f32 %v1663_v30, %v1563_v26  ;;  %2134 = vmatprep.subr.mxu0 %v513_v23  ;;  %v704_v22 = vld [vmem:[#allocation5 + $0xda0] sm:$0xff]  ;;  %v697_v26 = vld [vmem:[#allocation5 + $0xd68] sm:$0xff] }
 0x1aa   : > { %2235 = vmatprep.subr.mxu1 %v769_v24  ;;  %v1566_v35 = vpop.f32.mrf.mxu0  ;;  %2135 = vmatpush2.msra.mxu0 %v512_v28  ;;  %v441_v24 = vld [vmem:[#allocation5 + $0x568] sm:$0xff]  ;;  %v696_v30 = vld [vmem:[#allocation5 + $0xd60] sm:$0xff] }
 0x1ab   : > { %2236 = vmatpush2.msra.mxu1 %v768_v29  ;;  %v1567_v37 = vadd.f32 %v1566_v35, %v4337_v46  ;;  %2136 = vmatprep.subr.mxu0 %v505_v12  ;;  %v737_v46 = vld [vmem:[#allocation5 + $0xea8] sm:$0xff]  ;;  %v440_v29 = vld [vmem:[#allocation5 + $0x560] sm:$0xff] }
 0x1ac   : > { %2237 = vmatprep.subr.mxu1 %v761_v31  ;;  %v1568_v41 = vpop.f32.mrf.mxu0  ;;  %2137 = vmatpush2.msra.mxu0 %v504_v33  ;;  %v689_v31 = vld [vmem:[#allocation5 + $0xd28] sm:$0xff]  ;;  %v688_v35 = vld [vmem:[#allocation5 + $0xd20] sm:$0xff] }
 0x1ad   : > { %2238 = vmatpush2.msra.mxu1 %v760_v34  ;;  %v1569_v44 = vadd.f32 %v1568_v41, %v4340_v53  ;;  %2138 = vmatprep.subr.mxu0 %v497_v36  ;;  %v1667_v49 = vpop.f32.mrf.mxu1  ;;  %v473_v53 = vld [vmem:[#allocation5 + $0x668] sm:$0xff]  ;;  %v432_v34 = vld [vmem:[#allocation5 + $0x520] sm:$0xff] }
 0x1ae   : > { %2239 = vmatprep.subr.mxu1 %v753_v19  ;;  %2139 = vmatpush2.msra.mxu0 %v496_v39  ;;  %v4380_v51 = vadd.f32 %v1667_v49, %v1567_v37  ;;  %v681_v37 = vld [vmem:[#allocation5 + $0xce8] sm:$0xff]  ;;  %v424_v41 = vld [vmem:[#allocation5 + $0x4e0] sm:$0xff] }
 0x1af   : > { %2240 = vmatpush2.msra.mxu1 %v752_v40  ;;  %2140 = vmatprep.subr.mxu0 %v489_v42  ;;  %v1669_v56 = vpop.f32.mrf.mxu1  ;;  %v680_v42 = vld [vmem:[#allocation5 + $0xce0] sm:$0xff] }
 0x1b0   : > { %2241 = vmatprep.subr.mxu1 %v745_v43  ;;  %v1572_v55 = vpop.f32.mrf.mxu0  ;;  %2141 = vmatpush2.msra.mxu0 %v488_v47  ;;  %v4383_v59 = vadd.f32 %v1669_v56, %v1569_v44  ;;  %v417_v44 = vld [vmem:[#allocation5 + $0x4a8] sm:$0xff]  ;;  %v416_v49 = vld [vmem:[#allocation5 + $0x4a0] sm:$0xff] }
 0x1b1   : > { %2242 = vmatpush2.msra.mxu1 %v744_v48  ;;  %v1573_v58 = vadd.f32 %v1572_v55, %v4345_v0  ;;  %2142 = vmatprep.subr.mxu0 %v481_v50  ;;  %v457_v0 = vld [vmem:[#allocation5 + $0x5e8] sm:$0xff]  ;;  %v672_v50 = vld [vmem:[#allocation5 + $0xca0] sm:$0xff] }
 0x1b2   : > { %2243 = vmatprep.subr.mxu1 %v737_v46  ;;  %v1574_v63 = vpop.f32.mrf.mxu0  ;;  %2143 = vmatpush2.msra.mxu0 %v480_v52  ;;  %v673_v47 = vld [vmem:[#allocation5 + $0xca8] sm:$0xff]  ;;  %v408_v55 = vld [vmem:[#allocation5 + $0x460] sm:$0xff] }
 0x1b3   : > { %2244 = vmatpush2.msra.mxu1 %v736_v54  ;;  %v1575_v3 = vadd.f32 %v1574_v63, %v4348_v7  ;;  %2144 = vmatprep.subr.mxu0 %v473_v53  ;;  %v1673_v8 = vpop.f32.mrf.mxu1  ;;  %v449_v7 = vld [vmem:[#allocation5 + $0x5a8] sm:$0xff]  ;;  %v664_v56 = vld [vmem:[#allocation5 + $0xc60] sm:$0xff] }
 0x1b4   : > { %2245 = vmatprep.subr.mxu1 %v729_v57  ;;  %2145 = vmatpush2.msra.mxu0 %v472_v61  ;;  %v4386_v10 = vadd.f32 %v1673_v8, %v1573_v58  ;;  %v665_v52 = vld [vmem:[#allocation5 + $0xc68] sm:$0xff]  ;;  %v400_v63 = vld [vmem:[#allocation5 + $0x420] sm:$0xff] }
 0x1b5   : > { %2246 = vmatpush2.msra.mxu1 %v728_v62  ;;  %2146 = vmatprep.subr.mxu0 %v465_v1  ;;  %v1675_v15 = vpop.f32.mrf.mxu1  ;;  %v657_v58 = vld [vmem:[#allocation5 + $0xc28] sm:$0xff] }
 0x1b6   : > { %2247 = vmatprep.subr.mxu1 %v721_v2  ;;  %v1578_v14 = vpop.f32.mrf.mxu0  ;;  %2147 = vmatpush2.msra.mxu0 %v464_v5  ;;  %v4389_v18 = vadd.f32 %v1675_v15, %v1575_v3  ;;  %v656_v2 = vld [vmem:[#allocation5 + $0xc20] sm:$0xff]  ;;  %v1161_v8 = vld [vmem:[#allocation5 + $0x1be8] sm:$0xff] }
 0x1b7   : > { %2248 = vmatpush2.msra.mxu1 %v720_v6  ;;  %v1579_v17 = vadd.f32 %v1578_v14, %v4353_v20  ;;  %2148 = vmatprep.subr.mxu0 %v457_v0  ;;  %v433_v20 = vld [vmem:[#allocation5 + $0x528] sm:$0xff]  ;;  %v3833_v15 = vld [vmem:[%s4242_s11] sm:$0xff] }
 0x1b8   : > { %2249 = vmatprep.subr.mxu1 %v713_v9  ;;  %v1580_v23 = vpop.f32.mrf.mxu0  ;;  %2149 = vmatpush2.msra.mxu0 %v456_v11  ;;  %v3831_v6 = vld [vmem:[%s4242_s11 + $0x8] sm:$0xff]  ;;  %v3832_v9 = vld [vmem:[%s4242_s11 + $0x18] sm:$0xff]  ;;  %v904_v11 = vld [vmem:[#allocation5 + $0x13e0] sm:$0xff] }
 0x1b9   : > { %2250 = vmatpush2.msra.mxu1 %v712_v13  ;;  %v1581_v28 = vadd.f32 %v1580_v23, %v4356_v27  ;;  %2150 = vmatprep.subr.mxu0 %v449_v7  ;;  %v1679_v12 = vpop.f32.mrf.mxu1  ;;  %v425_v27 = vld [vmem:[#allocation5 + $0x4e8] sm:$0xff]  ;;  %v1160_v13 = vld [vmem:[#allocation5 + $0x1be0] sm:$0xff] }
 0x1ba   : > { %2251 = vmatprep.subr.mxu1 %v705_v16  ;;  %2151 = vmatpush2.msra.mxu0 %v448_v21  ;;  %v4392_v33 = vadd.f32 %v1679_v12, %v1579_v17  ;;  %v897_v7 = vld [vmem:[#allocation5 + $0x13a8] sm:$0xff]  ;;  %v896_v21 = vld [vmem:[#allocation5 + $0x13a0] sm:$0xff] }
 0x1bb   : > { %2252 = vmatpush2.msra.mxu1 %v704_v22  ;;  %2152 = vmatprep.subr.mxu0 %v441_v24  ;;  %v1681_v19 = vpop.f32.mrf.mxu1  ;;  %v1153_v16 = vld [vmem:[#allocation5 + $0x1ba8] sm:$0xff]  ;;  %v1152_v22 = vld [vmem:[#allocation5 + $0x1ba0] sm:$0xff] }
 0x1bc   : > { %2253 = vmatprep.subr.mxu1 %v697_v26  ;;  %v1584_v36 = vpop.f32.mrf.mxu0  ;;  %2153 = vmatpush2.msra.mxu0 %v440_v29  ;;  %v4395_v40 = vadd.f32 %v1681_v19, %v1581_v28  ;;  %v889_v23 = vld [vmem:[#allocation5 + $0x1368] sm:$0xff]  ;;  %v888_v26 = vld [vmem:[#allocation5 + $0x1360] sm:$0xff] }
 0x1bd   : > { %2254 = vmatpush2.msra.mxu1 %v696_v30  ;;  %v1585_v39 = vadd.f32 %v1584_v36, %v4361_v38  ;;  %2154 = vmatprep.subr.mxu0 %v433_v20  ;;  %v409_v38 = vld [vmem:[#allocation5 + $0x468] sm:$0xff]  ;;  %v1144_v28 = vld [vmem:[#allocation5 + $0x1b60] sm:$0xff] }
 0x1be   : > { %2255 = vmatprep.subr.mxu1 %v689_v31  ;;  %v1586_v43 = vpop.f32.mrf.mxu0  ;;  %2155 = vmatpush2.msra.mxu0 %v432_v34  ;;  %v1145_v24 = vld [vmem:[#allocation5 + $0x1b68] sm:$0xff]  ;;  %v880_v12 = vld [vmem:[#allocation5 + $0x1320] sm:$0xff] }
 0x1bf   : > { %2256 = vmatpush2.msra.mxu1 %v688_v35  ;;  %v1587_v48 = vadd.f32 %v1586_v43, %v4364_v45  ;;  %2156 = vmatprep.subr.mxu0 %v425_v27  ;;  %v1685_v46 = vpop.f32.mrf.mxu1  ;;  %v401_v45 = vld [vmem:[#allocation5 + $0x428] sm:$0xff]  ;;  %v1136_v20 = vld [vmem:[#allocation5 + $0x1b20] sm:$0xff] }
 0x1c0   : > { %2257 = vmatprep.subr.mxu1 %v681_v37  ;;  %2157 = vmatpush2.msra.mxu0 %v424_v41  ;;  %v4398_v54 = vadd.f32 %v1685_v46, %v1585_v39  ;;  %v881_v29 = vld [vmem:[#allocation5 + $0x1328] sm:$0xff]  ;;  %v872_v35 = vld [vmem:[#allocation5 + $0x12e0] sm:$0xff] }
 0x1c1   : > { %2258 = vmatpush2.msra.mxu1 %v680_v42  ;;  %2158 = vmatprep.subr.mxu0 %v417_v44  ;;  %v1687_v57 = vpop.f32.mrf.mxu1  ;;  %v1137_v30 = vld [vmem:[#allocation5 + $0x1b28] sm:$0xff]  ;;  %v1128_v36 = vld [vmem:[#allocation5 + $0x1ae0] sm:$0xff] }
 0x1c2   : > { %2259 = vmatprep.subr.mxu1 %v673_v47  ;;  %v1590_v53 = vpop.f32.mrf.mxu0  ;;  %2159 = vmatpush2.msra.mxu0 %v416_v49  ;;  %v4401_v62 = vadd.f32 %v1687_v57, %v1587_v48  ;;  %v873_v31 = vld [vmem:[#allocation5 + $0x12e8] sm:$0xff]  ;;  %v864_v37 = vld [vmem:[#allocation5 + $0x12a0] sm:$0xff] }
 0x1c3   : > { %2260 = vmatpush2.msra.mxu1 %v672_v50  ;;  %v1591_v61 = vadd.f32 %v1590_v53, %v4368_v60  ;;  %2160 = vmatprep.subr.mxu0 %v409_v38  ;;  %v905_v60 = vld [vmem:[#allocation5 + $0x13e8] sm:$0xff]  ;;  %v1120_v39 = vld [vmem:[#allocation5 + $0x1aa0] sm:$0xff] }
 0x1c4   : > { %2261 = vmatprep.subr.mxu1 %v665_v52  ;;  %v1592_v1 = vpop.f32.mrf.mxu0  ;;  %2161 = vmatpush2.msra.mxu0 %v408_v55  ;;  %v1129_v34 = vld [vmem:[#allocation5 + $0x1ae8] sm:$0xff]  ;;  %v856_v43 = vld [vmem:[#allocation5 + $0x1260] sm:$0xff] }
 0x1c5   : > { %2262 = vmatpush2.msra.mxu1 %v664_v56  ;;  %v1593_v3 = vadd.f32 %v1592_v1, %v4370_v4  ;;  %2162 = vmatprep.subr.mxu0 %v401_v45  ;;  %v1691_v5 = vpop.f32.mrf.mxu1  ;;  %v3834_v4 = vld [vmem:[%s4242_s11 + $0x10] sm:$0xff]  ;;  %v865_v19 = vld [vmem:[#allocation5 + $0x12a8] sm:$0xff]  ;;  %v1112_v44 = vld [vmem:[#allocation5 + $0x1a60] sm:$0xff] }
 0x1c6   : > { %2263 = vmatprep.subr.mxu1 %v657_v58  ;;  %2163 = vmatpush2.msra.mxu0 %v400_v63  ;;  %v4405_v0 = vadd.f32 %v1691_v5, %v1591_v61  ;;  %v1121_v27 = vld [vmem:[#allocation5 + $0x1aa8] sm:$0xff]  ;;  %v848_v49 = vld [vmem:[#allocation5 + $0x1220] sm:$0xff] }
 0x1c7   : > { %2164 = vmatprep.mubr.f32.mxu0 %v3831_v6  ;;  %2264 = vmatpush2.msra.mxu1 %v656_v2  ;;  %v1693_v14 = vpop.f32.mrf.mxu1  ;;  %v857_v41 = vld [vmem:[#allocation5 + $0x1268] sm:$0xff]  ;;  %v1104_v50 = vld [vmem:[#allocation5 + $0x1a20] sm:$0xff] }
 0x1c8   : > { %2265 = vmatprep.mubr.f32.mxu1 %v3832_v9  ;;  %2165 = vmatmul.mubr.f32.vlgmr.msra.gmra.mxu0 %v3833_v15  ;;  %v4410_v17 = vadd.f32 %v1693_v14, %v1593_v3  ;;  %v1113_v42 = vld [vmem:[#allocation5 + $0x1a68] sm:$0xff]  ;;  %v840_v52 = vld [vmem:[#allocation5 + $0x11e0] sm:$0xff] }
 0x1c9   : > { %2266 = vmatmul.mubr.f32.vlgmr.msra.gmra.mxu1 %v3834_v4  ;;  %2302 = vmatprep.subr.mxu0 %v905_v60  ;;  %v849_v47 = vld [vmem:[#allocation5 + $0x1228] sm:$0xff]  ;;  %v1096_v55 = vld [vmem:[#allocation5 + $0x19e0] sm:$0xff] }
 0x1ca   : > { %2403 = vmatprep.subr.mxu1 %v1161_v8  ;;  %2303 = vmatpush1.msra.mxu0 %v904_v11  ;;  %v1105_v48 = vld [vmem:[#allocation5 + $0x1a28] sm:$0xff]  ;;  %v832_v57 = vld [vmem:[#allocation5 + $0x11a0] sm:$0xff] }
 0x1cb   : > { %2404 = vmatpush1.msra.mxu1 %v1160_v13  ;;  %2304 = vmatprep.subr.mxu0 %v897_v7  ;;  %v841_v46 = vld [vmem:[#allocation5 + $0x11e8] sm:$0xff]  ;;  %v1088_v45 = vld [vmem:[#allocation5 + $0x19a0] sm:$0xff] }
 0x1cc   : > { %2405 = vmatprep.subr.mxu1 %v1153_v16  ;;  %2305 = vmatpush1.msra.mxu0 %v896_v21  ;;  %v1097_v38 = vld [vmem:[#allocation5 + $0x19e8] sm:$0xff]  ;;  %v824_v63 = vld [vmem:[#allocation5 + $0x1160] sm:$0xff] }
 0x1cd   : > { %2406 = vmatpush1.msra.mxu1 %v1152_v22  ;;  %2306 = vmatprep.subr.mxu0 %v889_v23  ;;  %v833_v56 = vld [vmem:[#allocation5 + $0x11a8] sm:$0xff]  ;;  %v1080_v1 = vld [vmem:[#allocation5 + $0x1960] sm:$0xff] }
 0x1ce   : > { %2407 = vmatprep.subr.mxu1 %v1145_v24  ;;  %2307 = vmatpush1.msra.mxu0 %v888_v26  ;;  %v1089_v53 = vld [vmem:[#allocation5 + $0x19a8] sm:$0xff]  ;;  %v816_v5 = vld [vmem:[#allocation5 + $0x1120] sm:$0xff] }
 0x1cf   : > { %2408 = vmatpush1.msra.mxu1 %v1144_v28  ;;  %2308 = vmatprep.subr.mxu0 %v881_v29  ;;  %v825_v58 = vld [vmem:[#allocation5 + $0x1168] sm:$0xff]  ;;  %v1072_v6 = vld [vmem:[#allocation5 + $0x1920] sm:$0xff] }
 0x1d0   : > { %2409 = vmatprep.subr.mxu1 %v1137_v30  ;;  %2309 = vmatpush1.msra.mxu0 %v880_v12  ;;  %v1081_v61 = vld [vmem:[#allocation5 + $0x1968] sm:$0xff]  ;;  %v808_v9 = vld [vmem:[#allocation5 + $0x10e0] sm:$0xff] }
 0x1d1   : > { %2410 = vmatpush1.msra.mxu1 %v1136_v20  ;;  %2310 = vmatprep.subr.mxu0 %v873_v31  ;;  %v817_v2 = vld [vmem:[#allocation5 + $0x1128] sm:$0xff]  ;;  %v1064_v11 = vld [vmem:[#allocation5 + $0x18e0] sm:$0xff] }
 0x1d2   : > { %2411 = vmatprep.subr.mxu1 %v1129_v34  ;;  %2311 = vmatpush1.msra.mxu0 %v872_v35  ;;  %v1073_v3 = vld [vmem:[#allocation5 + $0x1928] sm:$0xff]  ;;  %v800_v15 = vld [vmem:[#allocation5 + $0x10a0] sm:$0xff] }
 0x1d3   : > { %2412 = vmatpush1.msra.mxu1 %v1128_v36  ;;  %2312 = vmatprep.subr.mxu0 %v865_v19  ;;  %v809_v60 = vld [vmem:[#allocation5 + $0x10e8] sm:$0xff]  ;;  %v1056_v4 = vld [vmem:[#allocation5 + $0x18a0] sm:$0xff] }
 0x1d4   : > { %2413 = vmatprep.subr.mxu1 %v1121_v27  ;;  %2313 = vmatpush1.msra.mxu0 %v864_v37  ;;  %v1065_v8 = vld [vmem:[#allocation5 + $0x18e8] sm:$0xff]  ;;  %v792_v21 = vld [vmem:[#allocation5 + $0x1060] sm:$0xff] }
 0x1d5   : > { %2414 = vmatpush1.msra.mxu1 %v1120_v39  ;;  %2314 = vmatprep.subr.mxu0 %v857_v41  ;;  %v801_v13 = vld [vmem:[#allocation5 + $0x10a8] sm:$0xff]  ;;  %v1048_v22 = vld [vmem:[#allocation5 + $0x1860] sm:$0xff] }
 0x1d6   : > { %2415 = vmatprep.subr.mxu1 %v1113_v42  ;;  %2315 = vmatpush1.msra.mxu0 %v856_v43  ;;  %v1057_v14 = vld [vmem:[#allocation5 + $0x18a8] sm:$0xff]  ;;  %v784_v26 = vld [vmem:[#allocation5 + $0x1020] sm:$0xff] }
 0x1d7   : > { %2416 = vmatpush1.msra.mxu1 %v1112_v44  ;;  %2316 = vmatprep.subr.mxu0 %v849_v47  ;;  %v793_v7 = vld [vmem:[#allocation5 + $0x1068] sm:$0xff]  ;;  %v1040_v28 = vld [vmem:[#allocation5 + $0x1820] sm:$0xff] }
 0x1d8   : > { %2417 = vmatprep.subr.mxu1 %v1105_v48  ;;  %2317 = vmatpush1.msra.mxu0 %v848_v49  ;;  %v1049_v16 = vld [vmem:[#allocation5 + $0x1868] sm:$0xff]  ;;  %v1032_v12 = vld [vmem:[#allocation5 + $0x17e0] sm:$0xff] }
 0x1d9   : > { %2418 = vmatpush1.msra.mxu1 %v1104_v50  ;;  %2318 = vmatprep.subr.mxu0 %v841_v46  ;;  %v785_v23 = vld [vmem:[#allocation5 + $0x1028] sm:$0xff]  ;;  %v1288_v20 = vld [vmem:[#allocation5 + $0x1fe0] sm:$0xff] }
 0x1da   : > { %2419 = vmatprep.subr.mxu1 %v1097_v38  ;;  %2319 = vmatpush1.msra.mxu0 %v840_v52  ;;  %v1041_v24 = vld [vmem:[#allocation5 + $0x1828] sm:$0xff]  ;;  %v1024_v35 = vld [vmem:[#allocation5 + $0x17a0] sm:$0xff] }
 0x1db   : > { %2420 = vmatpush1.msra.mxu1 %v1096_v55  ;;  %2320 = vmatprep.subr.mxu0 %v833_v56  ;;  %v1033_v29 = vld [vmem:[#allocation5 + $0x17e8] sm:$0xff]  ;;  %v1280_v36 = vld [vmem:[#allocation5 + $0x1fa0] sm:$0xff] }
 0x1dc   : > { %2421 = vmatprep.subr.mxu1 %v1089_v53  ;;  %2321 = vmatpush1.msra.mxu0 %v832_v57  ;;  %v1289_v30 = vld [vmem:[#allocation5 + $0x1fe8] sm:$0xff]  ;;  %v1016_v37 = vld [vmem:[#allocation5 + $0x1760] sm:$0xff] }
 0x1dd   : > { %2422 = vmatpush1.msra.mxu1 %v1088_v45  ;;  %2322 = vmatprep.subr.mxu0 %v825_v58  ;;  %v1025_v31 = vld [vmem:[#allocation5 + $0x17a8] sm:$0xff]  ;;  %v1272_v39 = vld [vmem:[#allocation5 + $0x1f60] sm:$0xff]  ;;  %v3836_v58 = vld [vmem:[%s4242_s11 + $0x58] sm:$0xff] }
 0x1de   : > { %2423 = vmatprep.subr.mxu1 %v1081_v61  ;;  %2323 = vmatpush1.msra.mxu0 %v824_v63  ;;  %v1281_v34 = vld [vmem:[#allocation5 + $0x1fa8] sm:$0xff]  ;;  %v1008_v43 = vld [vmem:[#allocation5 + $0x1720] sm:$0xff] }
 0x1df   : > { %2424 = vmatpush1.msra.mxu1 %v1080_v1  ;;  %2324 = vmatprep.subr.mxu0 %v817_v2  ;;  %v1017_v19 = vld [vmem:[#allocation5 + $0x1768] sm:$0xff]  ;;  %v1264_v44 = vld [vmem:[#allocation5 + $0x1f20] sm:$0xff] }
 0x1e0   : > { %2425 = vmatprep.subr.mxu1 %v1073_v3  ;;  %2325 = vmatpush1.msra.mxu0 %v816_v5  ;;  %v1273_v27 = vld [vmem:[#allocation5 + $0x1f68] sm:$0xff]  ;;  %v1000_v49 = vld [vmem:[#allocation5 + $0x16e0] sm:$0xff] }
 0x1e1   : > { %2426 = vmatpush1.msra.mxu1 %v1072_v6  ;;  %2326 = vmatprep.subr.mxu0 %v809_v60  ;;  %v1009_v41 = vld [vmem:[#allocation5 + $0x1728] sm:$0xff]  ;;  %v1256_v50 = vld [vmem:[#allocation5 + $0x1ee0] sm:$0xff]  ;;  %v3838_v6 = vld [vmem:[%s4242_s11 + $0x50] sm:$0xff] }
 0x1e2   : > { %2427 = vmatprep.subr.mxu1 %v1065_v8  ;;  %2327 = vmatpush1.msra.mxu0 %v808_v9  ;;  %v1265_v42 = vld [vmem:[#allocation5 + $0x1f28] sm:$0xff]  ;;  %v992_v61 = vld [vmem:[#allocation5 + $0x16a0] sm:$0xff] }
 0x1e3   : > { %2428 = vmatpush1.msra.mxu1 %v1064_v11  ;;  %2328 = vmatprep.subr.mxu0 %v801_v13  ;;  %v1001_v47 = vld [vmem:[#allocation5 + $0x16e8] sm:$0xff]  ;;  %v1248_v63 = vld [vmem:[#allocation5 + $0x1ea0] sm:$0xff] }
 0x1e4   : > { %2429 = vmatprep.subr.mxu1 %v1057_v14  ;;  %2329 = vmatpush1.msra.mxu0 %v800_v15  ;;  %v1257_v48 = vld [vmem:[#allocation5 + $0x1ee8] sm:$0xff]  ;;  %v3837_v5 = vld [vmem:[%s4242_s11 + $0x40] sm:$0xff]  ;;  %v3840_v14 = vld [vmem:[%s4242_s11 + $0x98] sm:$0xff] }
 0x1e5   : > { %2430 = vmatpush1.msra.mxu1 %v1056_v4  ;;  %2330 = vmatprep.subr.mxu0 %v793_v7  ;;  %v993_v52 = vld [vmem:[#allocation5 + $0x16a8] sm:$0xff]  ;;  %v984_v60 = vld [vmem:[#allocation5 + $0x1660] sm:$0xff] }
 0x1e6   : > { %2431 = vmatprep.subr.mxu1 %v1049_v16  ;;  %2331 = vmatpush1.msra.mxu0 %v792_v21  ;;  %v1249_v55 = vld [vmem:[#allocation5 + $0x1ea8] sm:$0xff]  ;;  %v1240_v8 = vld [vmem:[#allocation5 + $0x1e60] sm:$0xff] }
 0x1e7   : > { %2432 = vmatpush1.msra.mxu1 %v1048_v22  ;;  %2332 = vmatprep.subr.mxu0 %v785_v23  ;;  %v3835_v45 = vld [vmem:[%s4242_s11 + $0x48] sm:$0xff]  ;;  %v976_v15 = vld [vmem:[#allocation5 + $0x1620] sm:$0xff]  ;;  %v3842_v22 = vld [vmem:[%s4242_s11 + $0x90] sm:$0xff] }
 0x1e8   : > { %2433 = vmatprep.subr.mxu1 %v1041_v24  ;;  %2333 = vmatpush1.msra.mxu0 %v784_v26  ;;  %v985_v2 = vld [vmem:[#allocation5 + $0x1668] sm:$0xff]  ;;  %v1232_v4 = vld [vmem:[#allocation5 + $0x1e20] sm:$0xff] }
 0x1e9   : > { %2434 = vmatpush1.msra.mxu1 %v1040_v28  ;;  %2334 = vmatprep.subr.mxu0 %v1033_v29  ;;  %v1241_v3 = vld [vmem:[#allocation5 + $0x1e68] sm:$0xff]  ;;  %v3841_v21 = vld [vmem:[%s4242_s11 + $0x80] sm:$0xff] }
 0x1ea   : > { %2435 = vmatprep.subr.mxu1 %v1289_v30  ;;  %2335 = vmatpush2.msra.mxu0 %v1032_v12  ;;  %v977_v9 = vld [vmem:[#allocation5 + $0x1628] sm:$0xff]  ;;  %v968_v23 = vld [vmem:[#allocation5 + $0x15e0] sm:$0xff]  ;;  %v3844_v30 = vld [vmem:[%s4242_s11 + $0xd8] sm:$0xff] }
 0x1eb   : > { %2436 = vmatpush2.msra.mxu1 %v1288_v20  ;;  %2336 = vmatprep.subr.mxu0 %v1025_v31  ;;  %v1233_v11 = vld [vmem:[#allocation5 + $0x1e28] sm:$0xff]  ;;  %v1224_v24 = vld [vmem:[#allocation5 + $0x1de0] sm:$0xff] }
 0x1ec   : > { %2437 = vmatprep.subr.mxu1 %v1281_v34  ;;  %2337 = vmatpush2.msra.mxu0 %v1024_v35  ;;  %v3839_v13 = vld [vmem:[%s4242_s11 + $0x88] sm:$0xff]  ;;  %v960_v12 = vld [vmem:[#allocation5 + $0x15a0] sm:$0xff] }
 0x1ed   : > { %2438 = vmatpush2.msra.mxu1 %v1280_v36  ;;  %2338 = vmatprep.subr.mxu0 %v1017_v19  ;;  %v969_v7 = vld [vmem:[#allocation5 + $0x15e8] sm:$0xff]  ;;  %v1216_v20 = vld [vmem:[#allocation5 + $0x1da0] sm:$0xff]  ;;  %v3846_v36 = vld [vmem:[%s4242_s11 + $0xd0] sm:$0xff] }
 0x1ee   : > { %2439 = vmatprep.subr.mxu1 %v1273_v27  ;;  %2339 = vmatpush2.msra.mxu0 %v1016_v37  ;;  %v1225_v16 = vld [vmem:[#allocation5 + $0x1de8] sm:$0xff]  ;;  %v3845_v35 = vld [vmem:[%s4242_s11 + $0xc0] sm:$0xff] }
 0x1ef   : > { %2440 = vmatpush2.msra.mxu1 %v1272_v39  ;;  %2340 = vmatprep.subr.mxu0 %v1009_v41  ;;  %v961_v26 = vld [vmem:[#allocation5 + $0x15a8] sm:$0xff]  ;;  %v952_v19 = vld [vmem:[#allocation5 + $0x1560] sm:$0xff] }
 0x1f0   : > { %2441 = vmatprep.subr.mxu1 %v1265_v42  ;;  %2341 = vmatpush2.msra.mxu0 %v1008_v43  ;;  %v1762_v46 = vpop.f32.mrf.mxu0  ;;  %v1217_v28 = vld [vmem:[#allocation5 + $0x1da8] sm:$0xff]  ;;  %v1208_v27 = vld [vmem:[#allocation5 + $0x1d60] sm:$0xff]  ;;  %v3848_v42 = vld [vmem:[%s4242_s11 + $0x118] sm:$0xff] }
 0x1f1   : > { %2442 = vmatpush2.msra.mxu1 %v1264_v44  ;;  %v1863_v38 = vpop.f32.mrf.mxu1  ;;  %2342 = vmatprep.subr.mxu0 %v1001_v47  ;;  %v3843_v29 = vld [vmem:[%s4242_s11 + $0xc8] sm:$0xff]  ;;  %v944_v43 = vld [vmem:[#allocation5 + $0x1520] sm:$0xff] }
 0x1f2   : > { %2443 = vmatprep.subr.mxu1 %v1257_v48  ;;  %v4412_v56 = vadd.f32 %v1863_v38, %v1762_v46  ;;  %2343 = vmatpush2.msra.mxu0 %v1000_v49  ;;  %v1764_v53 = vpop.f32.mrf.mxu0  ;;  %v953_v31 = vld [vmem:[#allocation5 + $0x1568] sm:$0xff]  ;;  %v1200_v44 = vld [vmem:[#allocation5 + $0x1d20] sm:$0xff] }
 0x1f3   : > { %2444 = vmatpush2.msra.mxu1 %v1256_v50  ;;  %v1865_v57 = vpop.f32.mrf.mxu1  ;;  %2170 = vmatprep.mubr.f32.mxu0 %v3835_v45  ;;  %v1209_v34 = vld [vmem:[#allocation5 + $0x1d68] sm:$0xff]  ;;  %v3849_v49 = vld [vmem:[%s4242_s11 + $0x100] sm:$0xff]  ;;  %v3850_v50 = vld [vmem:[%s4242_s11 + $0x110] sm:$0xff] }
 0x1f4   : > { %2271 = vmatprep.mubr.f32.mxu1 %v3836_v58  ;;  %v4416_v1 = vadd.f32 %v1865_v57, %v1764_v53  ;;  %2344 = vmatprep.subr.mxu0 %v993_v52  ;;  %v945_v37 = vld [vmem:[#allocation5 + $0x1528] sm:$0xff]  ;;  %v936_v46 = vld [vmem:[#allocation5 + $0x14e0] sm:$0xff]  ;;  %v3852_v57 = vld [vmem:[%s4242_s11 + $0x158] sm:$0xff] }
 0x1f5   : > { %2445 = vmatprep.subr.mxu1 %v1249_v55  ;;  %2171 = vmatmul.mubr.f32.gmra.mxu0 %v3837_v5  ;;  %v1201_v39 = vld [vmem:[#allocation5 + $0x1d28] sm:$0xff]  ;;  %v1192_v38 = vld [vmem:[#allocation5 + $0x1ce0] sm:$0xff] }
 0x1f6   : > { %2272 = vmatmul.mubr.f32.gmra.mxu1 %v3838_v6  ;;  %2345 = vmatpush2.msra.mxu0 %v992_v61  ;;  %v3847_v41 = vld [vmem:[%s4242_s11 + $0x108] sm:$0xff]  ;;  %v928_v45 = vld [vmem:[#allocation5 + $0x14a0] sm:$0xff] }
 0x1f7   : > { %2446 = vmatpush2.msra.mxu1 %v1248_v63  ;;  %2346 = vmatprep.subr.mxu0 %v985_v2  ;;  %v937_v47 = vld [vmem:[#allocation5 + $0x14e8] sm:$0xff]  ;;  %v1184_v58 = vld [vmem:[#allocation5 + $0x1ca0] sm:$0xff] }
 0x1f8   : > { %2447 = vmatprep.subr.mxu1 %v1241_v3  ;;  %2347 = vmatpush2.msra.mxu0 %v984_v60  ;;  %v1193_v48 = vld [vmem:[#allocation5 + $0x1ce8] sm:$0xff]  ;;  %v3853_v2 = vld [vmem:[%s4242_s11 + $0x140] sm:$0xff]  ;;  %v3854_v3 = vld [vmem:[%s4242_s11 + $0x150] sm:$0xff] }
 0x1f9   : > { %2448 = vmatpush2.msra.mxu1 %v1240_v8  ;;  %2176 = vmatprep.mubr.f32.mxu0 %v3839_v13  ;;  %v929_v52 = vld [vmem:[#allocation5 + $0x14a8] sm:$0xff]  ;;  %v920_v5 = vld [vmem:[#allocation5 + $0x1460] sm:$0xff]  ;;  %v395_v13 = vld [vmem:[#allocation5 + $0x3f8] sm:$0xff] }
 0x1fa   : > { %2277 = vmatprep.mubr.f32.mxu1 %v3840_v14  ;;  %2348 = vmatprep.subr.mxu0 %v977_v9  ;;  %v1185_v55 = vld [vmem:[#allocation5 + $0x1ca8] sm:$0xff]  ;;  %v1176_v6 = vld [vmem:[#allocation5 + $0x1c60] sm:$0xff] }
 0x1fb   : > { %2449 = vmatprep.subr.mxu1 %v1233_v11  ;;  %2177 = vmatmul.mubr.f32.gmra.mxu0 %v3841_v21  ;;  %v3851_v53 = vld [vmem:[%s4242_s11 + $0x148] sm:$0xff]  ;;  %v912_v9 = vld [vmem:[#allocation5 + $0x1420] sm:$0xff]  ;;  %v3857_v21 = vld [vmem:[%s4242_s11 + $0x38] sm:$0xff] }
 0x1fc   : > { %2278 = vmatmul.mubr.f32.gmra.mxu1 %v3842_v22  ;;  %2349 = vmatpush2.msra.mxu0 %v976_v15  ;;  %v921_v61 = vld [vmem:[#allocation5 + $0x1468] sm:$0xff]  ;;  %v1168_v11 = vld [vmem:[#allocation5 + $0x1c20] sm:$0xff]  ;;  %v651_v15 = vld [vmem:[#allocation5 + $0xbf8] sm:$0xff] }
 0x1fd   : > { %2450 = vmatpush2.msra.mxu1 %v1232_v4  ;;  %2350 = vmatprep.subr.mxu0 %v969_v7  ;;  %v1177_v63 = vld [vmem:[#allocation5 + $0x1c68] sm:$0xff]  ;;  %v3856_v4 = vld [vmem:[%s4242_s11 + $0x20] sm:$0xff]  ;;  %v394_v7 = vld [vmem:[#allocation5 + $0x3f0] sm:$0xff] }
 0x1fe   : > { %2451 = vmatprep.subr.mxu1 %v1225_v16  ;;  %2351 = vmatpush2.msra.mxu0 %v968_v23  ;;  %v913_v60 = vld [vmem:[#allocation5 + $0x1428] sm:$0xff]  ;;  %v650_v16 = vld [vmem:[#allocation5 + $0xbf0] sm:$0xff]  ;;  %v387_v22 = vld [vmem:[#allocation5 + $0x3b8] sm:$0xff] }
 0x1ff   : > { %2452 = vmatpush2.msra.mxu1 %v1224_v24  ;;  %2182 = vmatprep.mubr.f32.mxu0 %v3843_v29  ;;  %v1169_v8 = vld [vmem:[#allocation5 + $0x1c28] sm:$0xff]  ;;  %v643_v23 = vld [vmem:[#allocation5 + $0xbb8] sm:$0xff]  ;;  %v3858_v24 = vld [vmem:[%s4242_s11 + $0x30] sm:$0xff] }
 0x200   : > { %2283 = vmatprep.mubr.f32.mxu1 %v3844_v30  ;;  %2352 = vmatprep.subr.mxu0 %v961_v26  ;;  %v3855_v14 = vld [vmem:[%s4242_s11 + $0x28] sm:$0xff]  ;;  %v386_v26 = vld [vmem:[#allocation5 + $0x3b0] sm:$0xff]  ;;  %v379_v29 = vld [vmem:[#allocation5 + $0x378] sm:$0xff] }
 0x201   : > { %2453 = vmatprep.subr.mxu1 %v1217_v28  ;;  %2183 = vmatmul.mubr.f32.gmra.mxu0 %v3845_v35  ;;  %v642_v28 = vld [vmem:[#allocation5 + $0xbb0] sm:$0xff]  ;;  %v635_v30 = vld [vmem:[#allocation5 + $0xb78] sm:$0xff] }
 0x202   : > { %2284 = vmatmul.mubr.f32.gmra.mxu1 %v3846_v36  ;;  %2353 = vmatpush2.msra.mxu0 %v960_v12  ;;  %v3859_v12 = vld [vmem:[%s4242_s11 + $0x68] sm:$0xff]  ;;  %v371_v35 = vld [vmem:[#allocation5 + $0x338] sm:$0xff] }
 0x203   : > { %2454 = vmatpush2.msra.mxu1 %v1216_v20  ;;  %2354 = vmatprep.subr.mxu0 %v953_v31  ;;  %v378_v20 = vld [vmem:[#allocation5 + $0x370] sm:$0xff]  ;;  %v3860_v31 = vld [vmem:[%s4242_s11 + $0x60] sm:$0xff]  ;;  %v627_v36 = vld [vmem:[#allocation5 + $0xb38] sm:$0xff] }
 0x204   : > { %2455 = vmatprep.subr.mxu1 %v1209_v34  ;;  %2355 = vmatpush2.msra.mxu0 %v952_v19  ;;  %v634_v34 = vld [vmem:[#allocation5 + $0xb70] sm:$0xff]  ;;  %v3861_v19 = vld [vmem:[%s4242_s11 + $0x78] sm:$0xff] }
 0x205   : > { %2456 = vmatpush2.msra.mxu1 %v1208_v27  ;;  %2188 = vmatprep.mubr.f32.mxu0 %v3847_v41  ;;  %v370_v27 = vld [vmem:[#allocation5 + $0x330] sm:$0xff]  ;;  %v363_v41 = vld [vmem:[#allocation5 + $0x2f8] sm:$0xff] }
 0x206   : > { %2289 = vmatprep.mubr.f32.mxu1 %v3848_v42  ;;  %2356 = vmatprep.subr.mxu0 %v945_v37  ;;  %v626_v37 = vld [vmem:[#allocation5 + $0xb30] sm:$0xff]  ;;  %v619_v42 = vld [vmem:[#allocation5 + $0xaf8] sm:$0xff] }
 0x207   : > { %2457 = vmatprep.subr.mxu1 %v1201_v39  ;;  %2189 = vmatmul.mubr.f32.gmra.mxu0 %v3849_v49  ;;  %v3862_v39 = vld [vmem:[%s4242_s11 + $0x70] sm:$0xff] }
 0x208   : > { %2290 = vmatmul.mubr.f32.gmra.mxu1 %v3850_v50  ;;  %2357 = vmatpush2.msra.mxu0 %v944_v43  ;;  %v3864_v50 = vld [vmem:[%s4242_s11 + $0xa0] sm:$0xff] }
 0x209   : > { %2458 = vmatpush2.msra.mxu1 %v1200_v44  ;;  %2358 = vmatprep.subr.mxu0 %v937_v47  ;;  %v3863_v47 = vld [vmem:[%s4242_s11 + $0xa8] sm:$0xff] }
 0x20a   : > { %2459 = vmatprep.subr.mxu1 %v1193_v48  ;;  %2359 = vmatpush2.msra.mxu0 %v936_v46  ;;  %v362_v48 = vld [vmem:[#allocation5 + $0x2f0] sm:$0xff] }
 0x20b   : > { %2460 = vmatpush2.msra.mxu1 %v1192_v38  ;;  %2194 = vmatprep.mubr.f32.mxu0 %v3851_v53  ;;  %v618_v46 = vld [vmem:[#allocation5 + $0xaf0] sm:$0xff]  ;;  %v355_v38 = vld [vmem:[#allocation5 + $0x2b8] sm:$0xff] }
 0x20c   : > { %2295 = vmatprep.mubr.f32.mxu1 %v3852_v57  ;;  %2360 = vmatprep.subr.mxu0 %v929_v52  ;;  %v611_v53 = vld [vmem:[#allocation5 + $0xab8] sm:$0xff] }
 0x20d   : > { %2461 = vmatprep.subr.mxu1 %v1185_v55  ;;  %2195 = vmatmul.mubr.f32.gmra.mxu0 %v3853_v2  ;;  %v347_v2 = vld [vmem:[#allocation5 + $0x278] sm:$0xff] }
 0x20e   : > { %2296 = vmatmul.mubr.f32.gmra.mxu1 %v3854_v3  ;;  %2361 = vmatpush2.msra.mxu0 %v928_v45  ;;  %v3865_v45 = vld [vmem:[%s4242_s11 + $0xb8] sm:$0xff] }
 0x20f   : > { %2462 = vmatpush2.msra.mxu1 %v1184_v58  ;;  %2362 = vmatprep.subr.mxu0 %v921_v61  ;;  %v354_v58 = vld [vmem:[#allocation5 + $0x2b0] sm:$0xff]  ;;  %v603_v3 = vld [vmem:[#allocation5 + $0xa78] sm:$0xff] }
 0x210   : > { %2463 = vmatprep.subr.mxu1 %v1177_v63  ;;  %2363 = vmatpush2.msra.mxu0 %v920_v5  ;;  %v610_v61 = vld [vmem:[#allocation5 + $0xab0] sm:$0xff] }
 0x211   : > { %2464 = vmatpush2.msra.mxu1 %v1176_v6  ;;  %2364 = vmatprep.subr.mxu0 %v913_v60  ;;  %v3866_v63 = vld [vmem:[%s4242_s11 + $0xb0] sm:$0xff]  ;;  %v3867_v60 = vld [vmem:[%s4242_s11 + $0xe8] sm:$0xff] }
 0x212   : > { %2465 = vmatprep.subr.mxu1 %v1169_v8  ;;  %2365 = vmatpush2.msra.mxu0 %v912_v9  ;;  %v346_v8 = vld [vmem:[#allocation5 + $0x270] sm:$0xff] }
 0x213   : > { %2366 = vmatprep.mubr.f32.mxu0 %v3855_v14  ;;  %2466 = vmatpush2.msra.mxu1 %v1168_v11  ;;  %v3868_v11 = vld [vmem:[%s4242_s11 + $0xe0] sm:$0xff]  ;;  %v339_v14 = vld [vmem:[#allocation5 + $0x238] sm:$0xff] }
 0x214   : > { %2367 = vmatmul.mubr.f32.vlgmr.msra.gmra.mxu0 %v3856_v4  ;;  %2467 = vmatprep.mubr.f32.mxu1 %v3857_v21  ;;  %v3869_v21 = vld [vmem:[%s4242_s11 + $0xf8] sm:$0xff] }
 0x215   : > { %2504 = vmatprep.subr.mxu0 %v395_v13  ;;  %2605 = vmatprep.subr.mxu1 %v651_v15  ;;  %v602_v13 = vld [vmem:[#allocation5 + $0xa70] sm:$0xff] }
 0x216   : > { %2468 = vmatmul.mubr.f32.vlgmr.msra.gmra.mxu1 %v3858_v24  ;;  %2505 = vmatpush1.msra.mxu0 %v394_v7  ;;  %v595_v7 = vld [vmem:[#allocation5 + $0xa38] sm:$0xff]  ;;  %v3870_v24 = vld [vmem:[%s4242_s11 + $0xf0] sm:$0xff] }
 0x217   : > { %2606 = vmatpush1.msra.mxu1 %v650_v16  ;;  %2506 = vmatprep.subr.mxu0 %v387_v22  ;;  %v338_v22 = vld [vmem:[#allocation5 + $0x230] sm:$0xff] }
 0x218   : > { %2607 = vmatprep.subr.mxu1 %v643_v23  ;;  %2372 = vmatprep.mubr.f32.mxu0 %v3859_v12  ;;  %v594_v23 = vld [vmem:[#allocation5 + $0xa30] sm:$0xff]  ;;  %v3871_v12 = vld [vmem:[%s4242_s11 + $0x128] sm:$0xff] }
 0x219   : > { %2507 = vmatpush1.msra.mxu0 %v386_v26  ;;  %2608 = vmatpush1.msra.mxu1 %v642_v28  ;;  %v331_v26 = vld [vmem:[#allocation5 + $0x1f8] sm:$0xff] }
 0x21a   : > { %2373 = vmatmul.mubr.f32.gmra.mxu0 %v3860_v31  ;;  %2508 = vmatprep.subr.mxu0 %v379_v29  ;;  %v587_v28 = vld [vmem:[#allocation5 + $0x9f8] sm:$0xff] }
 0x21b   : > { %2609 = vmatprep.subr.mxu1 %v635_v30  ;;  %2473 = vmatprep.mubr.f32.mxu1 %v3861_v19 }
 0x21c   : > { %2509 = vmatpush1.msra.mxu0 %v378_v20  ;;  %2610 = vmatpush1.msra.mxu1 %v634_v34  ;;  %v330_v20 = vld [vmem:[#allocation5 + $0x1f0] sm:$0xff]  ;;  %v3872_v34 = vld [vmem:[%s4242_s11 + $0x120] sm:$0xff] }
 0x21d   : > { %2510 = vmatprep.subr.mxu0 %v371_v35  ;;  %2474 = vmatmul.mubr.f32.gmra.mxu1 %v3862_v39  ;;  %v1768_v43 = vpop.f32.mrf.mxu0  ;;  %v586_v35 = vld [vmem:[#allocation5 + $0x9f0] sm:$0xff] }
 0x21e   : > { %2611 = vmatprep.subr.mxu1 %v627_v36  ;;  %v1869_v44 = vpop.f32.mrf.mxu1  ;;  %2378 = vmatprep.mubr.f32.mxu0 %v3863_v47  ;;  %v323_v36 = vld [vmem:[#allocation5 + $0x1b8] sm:$0xff] }
 0x21f   : > { %2511 = vmatpush1.msra.mxu0 %v370_v27  ;;  %v4445_v49 = vadd.f32 %v1869_v44, %v1768_v43  ;;  %2612 = vmatpush1.msra.mxu1 %v626_v37  ;;  %v1770_v52 = vpop.f32.mrf.mxu0  ;;  %v579_v37 = vld [vmem:[#allocation5 + $0x9b8] sm:$0xff]  ;;  %v578_v43 = vld [vmem:[#allocation5 + $0x9b0] sm:$0xff] }
 0x220   : > { %2379 = vmatmul.mubr.f32.gmra.mxu0 %v3864_v50  ;;  %v1871_v55 = vpop.f32.mrf.mxu1  ;;  %2512 = vmatprep.subr.mxu0 %v363_v41  ;;  %v3873_v41 = vld [vmem:[%s4242_s11 + $0x138] sm:$0xff]  ;;  %v3874_v44 = vld [vmem:[%s4242_s11 + $0x130] sm:$0xff] }
 0x221   : > { %2613 = vmatprep.subr.mxu1 %v619_v42  ;;  %v4448_v57 = vadd.f32 %v1871_v55, %v1770_v52  ;;  %2479 = vmatprep.mubr.f32.mxu1 %v3865_v45  ;;  %v322_v42 = vld [vmem:[#allocation5 + $0x1b0] sm:$0xff]  ;;  %v315_v47 = vld [vmem:[#allocation5 + $0x178] sm:$0xff] }
 0x222   : > { %2513 = vmatpush1.msra.mxu0 %v362_v48  ;;  %2614 = vmatpush1.msra.mxu1 %v618_v46  ;;  %v571_v48 = vld [vmem:[#allocation5 + $0x978] sm:$0xff]  ;;  %v314_v52 = vld [vmem:[#allocation5 + $0x170] sm:$0xff] }
 0x223   : > { %2514 = vmatprep.subr.mxu0 %v355_v38  ;;  %2480 = vmatmul.mubr.f32.gmra.mxu1 %v3866_v63  ;;  %v1774_v5 = vpop.f32.mrf.mxu0  ;;  %v3875_v38 = vld [vmem:[%s4242_s11 + $0x168] sm:$0xff]  ;;  %v570_v45 = vld [vmem:[#allocation5 + $0x970] sm:$0xff] }
 0x224   : > { %2615 = vmatprep.subr.mxu1 %v611_v53  ;;  %v1875_v6 = vpop.f32.mrf.mxu1  ;;  %2384 = vmatprep.mubr.f32.mxu0 %v3867_v60  ;;  %v3876_v53 = vld [vmem:[%s4242_s11 + $0x160] sm:$0xff]  ;;  %v562_v60 = vld [vmem:[#allocation5 + $0x930] sm:$0xff] }
 0x225   : > { %2515 = vmatpush1.msra.mxu0 %v354_v58  ;;  %v4453_v9 = vadd.f32 %v1875_v6, %v1774_v5  ;;  %2616 = vmatpush1.msra.mxu1 %v610_v61  ;;  %v1776_v15 = vpop.f32.mrf.mxu0  ;;  %v307_v58 = vld [vmem:[#allocation5 + $0x138] sm:$0xff]  ;;  %v306_v6 = vld [vmem:[#allocation5 + $0x130] sm:$0xff] }
 0x226   : > { %2385 = vmatmul.mubr.f32.gmra.mxu0 %v3868_v11  ;;  %v1877_v4 = vpop.f32.mrf.mxu1  ;;  %2516 = vmatprep.subr.mxu0 %v347_v2  ;;  %v563_v2 = vld [vmem:[#allocation5 + $0x938] sm:$0xff] }
 0x227   : > { %2617 = vmatprep.subr.mxu1 %v603_v3  ;;  %v4456_v16 = vadd.f32 %v1877_v4, %v1776_v15  ;;  %2485 = vmatprep.mubr.f32.mxu1 %v3869_v21  ;;  %v3877_v5 = vld [vmem:[%s4242_s11 + $0x178] sm:$0xff]  ;;  %v554_v15 = vld [vmem:[#allocation5 + $0x8f0] sm:$0xff] }
 0x228   : > { %2517 = vmatpush1.msra.mxu0 %v346_v8  ;;  %2618 = vmatpush1.msra.mxu1 %v602_v13  ;;  %v299_v8 = vld [vmem:[#allocation5 + $0xf8] sm:$0xff]  ;;  %v3878_v13 = vld [vmem:[%s4242_s11 + $0x170] sm:$0xff] }
 0x229   : > { %2518 = vmatprep.subr.mxu0 %v339_v14  ;;  %2486 = vmatmul.mubr.f32.gmra.mxu1 %v3870_v24  ;;  %v1780_v29 = vpop.f32.mrf.mxu0  ;;  %v555_v11 = vld [vmem:[#allocation5 + $0x8f8] sm:$0xff]  ;;  %v298_v14 = vld [vmem:[#allocation5 + $0xf0] sm:$0xff] }
 0x22a   : > { %2619 = vmatprep.subr.mxu1 %v595_v7  ;;  %v1881_v30 = vpop.f32.mrf.mxu1  ;;  %2390 = vmatprep.mubr.f32.mxu0 %v3871_v12  ;;  %v291_v21 = vld [vmem:[#allocation5 + $0xb8] sm:$0xff]  ;;  %v290_v24 = vld [vmem:[#allocation5 + $0xb0] sm:$0xff] }
 0x22b   : > { %2519 = vmatpush1.msra.mxu0 %v338_v22  ;;  %v4461_v31 = vadd.f32 %v1881_v30, %v1780_v29  ;;  %2620 = vmatpush1.msra.mxu1 %v594_v23  ;;  %v1782_v19 = vpop.f32.mrf.mxu0  ;;  %v547_v22 = vld [vmem:[#allocation5 + $0x8b8] sm:$0xff] }
 0x22c   : > { %2391 = vmatmul.mubr.f32.gmra.mxu0 %v3872_v34  ;;  %v1883_v27 = vpop.f32.mrf.mxu1  ;;  %2520 = vmatprep.subr.mxu0 %v331_v26  ;;  %v546_v26 = vld [vmem:[#allocation5 + $0x8b0] sm:$0xff]  ;;  %v283_v30 = vld [vmem:[#allocation5 + $0x78] sm:$0xff] }
 0x22d   : > { %2621 = vmatprep.subr.mxu1 %v587_v28  ;;  %v4464_v39 = vadd.f32 %v1883_v27, %v1782_v19  ;;  %2491 = vmatprep.mubr.f32.mxu1 %v3873_v41  ;;  %v539_v12 = vld [vmem:[#allocation5 + $0x878] sm:$0xff]  ;;  %v282_v34 = vld [vmem:[#allocation5 + $0x70] sm:$0xff] }
 0x22e   : > { %2521 = vmatpush1.msra.mxu0 %v330_v20  ;;  %2622 = vmatpush1.msra.mxu1 %v586_v35  ;;  %v538_v35 = vld [vmem:[#allocation5 + $0x870] sm:$0xff]  ;;  %v531_v19 = vld [vmem:[#allocation5 + $0x838] sm:$0xff] }
 0x22f   : > { %2522 = vmatprep.subr.mxu0 %v323_v36  ;;  %2492 = vmatmul.mubr.f32.gmra.mxu1 %v3874_v44  ;;  %v1786_v50 = vpop.f32.mrf.mxu0  ;;  %v275_v36 = vld [vmem:[#allocation5 + $0x38] sm:$0xff]  ;;  %v274_v27 = vld [vmem:[#allocation5 + $0x30] sm:$0xff] }
 0x230   : > { %2623 = vmatprep.subr.mxu1 %v579_v37  ;;  %v1887_v46 = vpop.f32.mrf.mxu1  ;;  %2396 = vmatprep.mubr.f32.mxu0 %v3875_v38  ;;  %v530_v37 = vld [vmem:[#allocation5 + $0x830] sm:$0xff]  ;;  %v515_v38 = vld [vmem:[#allocation5 + $0x7b8] sm:$0xff] }
 0x231   : > { %2523 = vmatpush1.msra.mxu0 %v322_v42  ;;  %v4469_v55 = vadd.f32 %v1887_v46, %v1786_v50  ;;  %2624 = vmatpush1.msra.mxu1 %v578_v43  ;;  %v1788_v61 = vpop.f32.mrf.mxu0  ;;  %v523_v42 = vld [vmem:[#allocation5 + $0x7f8] sm:$0xff] }
 0x232   : > { %2397 = vmatmul.mubr.f32.gmra.mxu0 %v3876_v53  ;;  %v1889_v63 = vpop.f32.mrf.mxu1  ;;  %2524 = vmatprep.subr.mxu0 %v315_v47  ;;  %v779_v43 = vld [vmem:[#allocation5 + $0xff8] sm:$0xff]  ;;  %v522_v47 = vld [vmem:[#allocation5 + $0x7f0] sm:$0xff] }
 0x233   : > { %2625 = vmatprep.subr.mxu1 %v571_v48  ;;  %v4472_v3 = vadd.f32 %v1889_v63, %v1788_v61  ;;  %2497 = vmatprep.mubr.f32.mxu1 %v3877_v5  ;;  %v778_v48 = vld [vmem:[#allocation5 + $0xff0] sm:$0xff] }
 0x234   : > { %2525 = vmatpush1.msra.mxu0 %v314_v52  ;;  %2626 = vmatpush1.msra.mxu1 %v570_v45  ;;  %v771_v52 = vld [vmem:[#allocation5 + $0xfb8] sm:$0xff]  ;;  %v770_v61 = vld [vmem:[#allocation5 + $0xfb0] sm:$0xff] }
 0x235   : > { %2526 = vmatprep.subr.mxu0 %v307_v58  ;;  %2498 = vmatmul.mubr.f32.gmra.mxu1 %v3878_v13  ;;  %v1792_v4 = vpop.f32.mrf.mxu0  ;;  %v514_v58 = vld [vmem:[#allocation5 + $0x7b0] sm:$0xff] }
 0x236   : > { %2627 = vmatprep.subr.mxu1 %v563_v2  ;;  %v1893_v7 = vpop.f32.mrf.mxu1  ;;  %2527 = vmatpush1.msra.mxu0 %v306_v6  ;;  %v763_v2 = vld [vmem:[#allocation5 + $0xf78] sm:$0xff]  ;;  %v506_v6 = vld [vmem:[#allocation5 + $0x770] sm:$0xff] }
 0x237   : > { %2628 = vmatpush1.msra.mxu1 %v562_v60  ;;  %v4476_v23 = vadd.f32 %v1893_v7, %v1792_v4  ;;  %2528 = vmatprep.subr.mxu0 %v299_v8  ;;  %v1794_v28 = vpop.f32.mrf.mxu0  ;;  %v762_v60 = vld [vmem:[#allocation5 + $0xf70] sm:$0xff]  ;;  %v491_v7 = vld [vmem:[#allocation5 + $0x6f8] sm:$0xff] }
 0x238   : > { %2629 = vmatprep.subr.mxu1 %v555_v11  ;;  %v1895_v29 = vpop.f32.mrf.mxu1  ;;  %2529 = vmatpush1.msra.mxu0 %v298_v14  ;;  %v499_v11 = vld [vmem:[#allocation5 + $0x738] sm:$0xff]  ;;  %v498_v14 = vld [vmem:[#allocation5 + $0x730] sm:$0xff] }
 0x239   : > { %2630 = vmatpush1.msra.mxu1 %v554_v15  ;;  %v4478_v20 = vadd.f32 %v1895_v29, %v1794_v28  ;;  %2530 = vmatprep.subr.mxu0 %v291_v21  ;;  %v754_v15 = vld [vmem:[#allocation5 + $0xf30] sm:$0xff]  ;;  %v747_v21 = vld [vmem:[#allocation5 + $0xef8] sm:$0xff] }
 0x23a   : > { %2631 = vmatprep.subr.mxu1 %v547_v22  ;;  %2531 = vmatpush1.msra.mxu0 %v290_v24  ;;  %v490_v24 = vld [vmem:[#allocation5 + $0x6f0] sm:$0xff]  ;;  %v483_v29 = vld [vmem:[#allocation5 + $0x6b8] sm:$0xff] }
 0x23b   : > { %2632 = vmatpush1.msra.mxu1 %v546_v26  ;;  %2532 = vmatprep.subr.mxu0 %v283_v30  ;;  %v746_v26 = vld [vmem:[#allocation5 + $0xef0] sm:$0xff] }
 0x23c   : > { %2633 = vmatprep.subr.mxu1 %v539_v12  ;;  %v1964_v41 = vpop.f32.mrf.mxu0  ;;  %2533 = vmatpush1.msra.mxu0 %v282_v34  ;;  %v482_v12 = vld [vmem:[#allocation5 + $0x6b0] sm:$0xff] }
 0x23d   : > { %2634 = vmatpush1.msra.mxu1 %v538_v35  ;;  %v1965_v44 = vadd.f32 %v1964_v41, %v4412_v56  ;;  %2534 = vmatprep.subr.mxu0 %v275_v36  ;;  %v507_v56 = vld [vmem:[#allocation5 + $0x778] sm:$0xff]  ;;  %v738_v34 = vld [vmem:[#allocation5 + $0xeb0] sm:$0xff] }
 0x23e   : > { %2635 = vmatprep.subr.mxu1 %v531_v19  ;;  %v2065_v50 = vpop.f32.mrf.mxu1  ;;  %v1966_v46 = vpop.f32.mrf.mxu0  ;;  %2535 = vmatpush1.msra.mxu0 %v274_v27  ;;  %v731_v19 = vld [vmem:[#allocation5 + $0xe78] sm:$0xff]  ;;  %v474_v41 = vld [vmem:[#allocation5 + $0x670] sm:$0xff] }
 0x23f   : > { %2636 = vmatpush1.msra.mxu1 %v530_v37  ;;  %v4481_v53 = vadd.f32 %v2065_v50, %v1965_v44  ;;  %v1967_v45 = vadd.f32 %v1966_v46, %v4416_v1  ;;  %2536 = vmatprep.subr.mxu0 %v523_v42  ;;  %v755_v1 = vld [vmem:[#allocation5 + $0xf38] sm:$0xff]  ;;  %v730_v42 = vld [vmem:[#allocation5 + $0xe70] sm:$0xff] }
 0x240   : > { %2637 = vmatprep.subr.mxu1 %v779_v43  ;;  %v2067_v63 = vpop.f32.mrf.mxu1  ;;  %2537 = vmatpush2.msra.mxu0 %v522_v47  ;;  %v467_v44 = vld [vmem:[#allocation5 + $0x638] sm:$0xff]  ;;  %v466_v50 = vld [vmem:[#allocation5 + $0x630] sm:$0xff] }
 0x241   : > { %2638 = vmatpush2.msra.mxu1 %v778_v48  ;;  %v4484_v5 = vadd.f32 %v2067_v63, %v1967_v45  ;;  %2538 = vmatprep.subr.mxu0 %v515_v38  ;;  %v723_v47 = vld [vmem:[#allocation5 + $0xe38] sm:$0xff]  ;;  %v722_v46 = vld [vmem:[#allocation5 + $0xe30] sm:$0xff] }
 0x242   : > { %2639 = vmatprep.subr.mxu1 %v771_v52  ;;  %v1970_v8 = vpop.f32.mrf.mxu0  ;;  %2539 = vmatpush2.msra.mxu0 %v514_v58  ;;  %v715_v52 = vld [vmem:[#allocation5 + $0xdf8] sm:$0xff]  ;;  %v458_v58 = vld [vmem:[#allocation5 + $0x5f0] sm:$0xff] }
 0x243   : > { %2640 = vmatpush2.msra.mxu1 %v770_v61  ;;  %v1971_v13 = vadd.f32 %v1970_v8, %v4445_v49  ;;  %2540 = vmatprep.subr.mxu0 %v507_v56  ;;  %v739_v49 = vld [vmem:[#allocation5 + $0xeb8] sm:$0xff]  ;;  %v714_v61 = vld [vmem:[#allocation5 + $0xdf0] sm:$0xff] }
 0x244   : > { %2641 = vmatprep.subr.mxu1 %v763_v2  ;;  %v1972_v4 = vpop.f32.mrf.mxu0  ;;  %2541 = vmatpush2.msra.mxu0 %v506_v6  ;;  %v707_v2 = vld [vmem:[#allocation5 + $0xdb8] sm:$0xff]  ;;  %v450_v8 = vld [vmem:[#allocation5 + $0x5b0] sm:$0xff] }
 0x245   : > { %2642 = vmatpush2.msra.mxu1 %v762_v60  ;;  %v1973_v22 = vadd.f32 %v1972_v4, %v4448_v57  ;;  %2542 = vmatprep.subr.mxu0 %v499_v11  ;;  %v2071_v28 = vpop.f32.mrf.mxu1  ;;  %v475_v57 = vld [vmem:[#allocation5 + $0x678] sm:$0xff]  ;;  %v706_v11 = vld [vmem:[#allocation5 + $0xdb0] sm:$0xff] }
 0x246   : > { %2643 = vmatprep.subr.mxu1 %v755_v1  ;;  %2543 = vmatpush2.msra.mxu0 %v498_v14  ;;  %v4488_v30 = vadd.f32 %v2071_v28, %v1971_v13  ;;  %v443_v13 = vld [vmem:[#allocation5 + $0x578] sm:$0xff]  ;;  %v442_v4 = vld [vmem:[#allocation5 + $0x570] sm:$0xff] }
 0x247   : > { %2644 = vmatpush2.msra.mxu1 %v754_v15  ;;  %2544 = vmatprep.subr.mxu0 %v491_v7  ;;  %v2073_v36 = vpop.f32.mrf.mxu1  ;;  %v699_v14 = vld [vmem:[#allocation5 + $0xd78] sm:$0xff]  ;;  %v698_v7 = vld [vmem:[#allocation5 + $0xd70] sm:$0xff] }
 0x248   : > { %2645 = vmatprep.subr.mxu1 %v747_v21  ;;  %v1976_v35 = vpop.f32.mrf.mxu0  ;;  %2545 = vmatpush2.msra.mxu0 %v490_v24  ;;  %v4491_v37 = vadd.f32 %v2073_v36, %v1973_v22  ;;  %v691_v22 = vld [vmem:[#allocation5 + $0xd38] sm:$0xff]  ;;  %v690_v28 = vld [vmem:[#allocation5 + $0xd30] sm:$0xff] }
 0x249   : > { %2646 = vmatpush2.msra.mxu1 %v746_v26  ;;  %v1977_v27 = vadd.f32 %v1976_v35, %v4453_v9  ;;  %2546 = vmatprep.subr.mxu0 %v483_v29  ;;  %v459_v9 = vld [vmem:[#allocation5 + $0x5f8] sm:$0xff]  ;;  %v434_v26 = vld [vmem:[#allocation5 + $0x530] sm:$0xff] }
 0x24a   : > { %2647 = vmatprep.subr.mxu1 %v739_v49  ;;  %v1978_v43 = vpop.f32.mrf.mxu0  ;;  %2547 = vmatpush2.msra.mxu0 %v482_v12  ;;  %v683_v12 = vld [vmem:[#allocation5 + $0xcf8] sm:$0xff]  ;;  %v426_v36 = vld [vmem:[#allocation5 + $0x4f0] sm:$0xff] }
 0x24b   : > { %2648 = vmatpush2.msra.mxu1 %v738_v34  ;;  %v1979_v48 = vadd.f32 %v1978_v43, %v4456_v16  ;;  %2548 = vmatprep.subr.mxu0 %v475_v57  ;;  %v2077_v38 = vpop.f32.mrf.mxu1  ;;  %v451_v16 = vld [vmem:[#allocation5 + $0x5b8] sm:$0xff]  ;;  %v682_v57 = vld [vmem:[#allocation5 + $0xcf0] sm:$0xff] }
 0x24c   : > { %2649 = vmatprep.subr.mxu1 %v731_v19  ;;  %2549 = vmatpush2.msra.mxu0 %v474_v41  ;;  %v4494_v45 = vadd.f32 %v2077_v38, %v1977_v27  ;;  %v419_v27 = vld [vmem:[#allocation5 + $0x4b8] sm:$0xff]  ;;  %v418_v43 = vld [vmem:[#allocation5 + $0x4b0] sm:$0xff] }
 0x24d   : > { %2650 = vmatpush2.msra.mxu1 %v730_v42  ;;  %2550 = vmatprep.subr.mxu0 %v467_v44  ;;  %v2079_v56 = vpop.f32.mrf.mxu1  ;;  %v675_v41 = vld [vmem:[#allocation5 + $0xcb8] sm:$0xff]  ;;  %v674_v44 = vld [vmem:[#allocation5 + $0xcb0] sm:$0xff] }
 0x24e   : > { %2651 = vmatprep.subr.mxu1 %v723_v47  ;;  %v1982_v63 = vpop.f32.mrf.mxu0  ;;  %2551 = vmatpush2.msra.mxu0 %v466_v50  ;;  %v4497_v60 = vadd.f32 %v2079_v56, %v1979_v48  ;;  %v667_v48 = vld [vmem:[#allocation5 + $0xc78] sm:$0xff]  ;;  %v666_v38 = vld [vmem:[#allocation5 + $0xc70] sm:$0xff] }
 0x24f   : > { %2652 = vmatpush2.msra.mxu1 %v722_v46  ;;  %v1983_v6 = vadd.f32 %v1982_v63, %v4461_v31  ;;  %2552 = vmatprep.subr.mxu0 %v459_v9  ;;  %v435_v31 = vld [vmem:[#allocation5 + $0x538] sm:$0xff]  ;;  %v410_v46 = vld [vmem:[#allocation5 + $0x470] sm:$0xff] }
 0x250   : > { %2653 = vmatprep.subr.mxu1 %v715_v52  ;;  %v1984_v1 = vpop.f32.mrf.mxu0  ;;  %2553 = vmatpush2.msra.mxu0 %v458_v58  ;;  %v659_v58 = vld [vmem:[#allocation5 + $0xc38] sm:$0xff]  ;;  %v402_v56 = vld [vmem:[#allocation5 + $0x430] sm:$0xff] }
 0x251   : > { %2654 = vmatpush2.msra.mxu1 %v714_v61  ;;  %v1985_v15 = vadd.f32 %v1984_v1, %v4464_v39  ;;  %2554 = vmatprep.subr.mxu0 %v451_v16  ;;  %v2083_v21 = vpop.f32.mrf.mxu1  ;;  %v427_v39 = vld [vmem:[#allocation5 + $0x4f8] sm:$0xff] }
 0x252   : > { %2655 = vmatprep.subr.mxu1 %v707_v2  ;;  %2555 = vmatpush2.msra.mxu0 %v450_v8  ;;  %v4500_v24 = vadd.f32 %v2083_v21, %v1983_v6  ;;  %v658_v2 = vld [vmem:[#allocation5 + $0xc30] sm:$0xff]  ;;  %v1163_v1 = vld [vmem:[#allocation5 + $0x1bf8] sm:$0xff]  ;;  %v3881_v21 = vld [vmem:[%s4242_s11] sm:$0xff] }
 0x253   : > { %2656 = vmatpush2.msra.mxu1 %v706_v11  ;;  %2556 = vmatprep.subr.mxu0 %v443_v13  ;;  %v2085_v49 = vpop.f32.mrf.mxu1  ;;  %v3879_v11 = vld [vmem:[%s4242_s11 + $0x8] sm:$0xff] }
 0x254   : > { %2657 = vmatprep.subr.mxu1 %v699_v14  ;;  %v1988_v29 = vpop.f32.mrf.mxu0  ;;  %2557 = vmatpush2.msra.mxu0 %v442_v4  ;;  %v4503_v35 = vadd.f32 %v2085_v49, %v1985_v15  ;;  %v3880_v14 = vld [vmem:[%s4242_s11 + $0x18] sm:$0xff]  ;;  %v906_v15 = vld [vmem:[#allocation5 + $0x13f0] sm:$0xff] }
 0x255   : > { %2658 = vmatpush2.msra.mxu1 %v698_v7  ;;  %v1989_v34 = vadd.f32 %v1988_v29, %v4469_v55  ;;  %2558 = vmatprep.subr.mxu0 %v435_v31  ;;  %v411_v55 = vld [vmem:[#allocation5 + $0x478] sm:$0xff]  ;;  %v1162_v4 = vld [vmem:[#allocation5 + $0x1bf0] sm:$0xff] }
 0x256   : > { %2659 = vmatprep.subr.mxu1 %v691_v22  ;;  %v1990_v19 = vpop.f32.mrf.mxu0  ;;  %2559 = vmatpush2.msra.mxu0 %v434_v26  ;;  %v899_v31 = vld [vmem:[#allocation5 + $0x13b8] sm:$0xff]  ;;  %v1154_v29 = vld [vmem:[#allocation5 + $0x1bb0] sm:$0xff] }
 0x257   : > { %2660 = vmatpush2.msra.mxu1 %v690_v28  ;;  %v1991_v42 = vadd.f32 %v1990_v19, %v4472_v3  ;;  %2560 = vmatprep.subr.mxu0 %v427_v39  ;;  %v2089_v47 = vpop.f32.mrf.mxu1  ;;  %v403_v3 = vld [vmem:[#allocation5 + $0x438] sm:$0xff]  ;;  %v898_v28 = vld [vmem:[#allocation5 + $0x13b0] sm:$0xff] }
 0x258   : > { %2661 = vmatprep.subr.mxu1 %v683_v12  ;;  %2561 = vmatpush2.msra.mxu0 %v426_v36  ;;  %v4506_v50 = vadd.f32 %v2089_v47, %v1989_v34  ;;  %v1155_v22 = vld [vmem:[#allocation5 + $0x1bb8] sm:$0xff]  ;;  %v890_v12 = vld [vmem:[#allocation5 + $0x1370] sm:$0xff] }
 0x259   : > { %2662 = vmatpush2.msra.mxu1 %v682_v57  ;;  %2562 = vmatprep.subr.mxu0 %v419_v27  ;;  %v2091_v52 = vpop.f32.mrf.mxu1  ;;  %v891_v49 = vld [vmem:[#allocation5 + $0x1378] sm:$0xff]  ;;  %v1146_v34 = vld [vmem:[#allocation5 + $0x1b70] sm:$0xff] }
 0x25a   : > { %2663 = vmatprep.subr.mxu1 %v675_v41  ;;  %v1994_v9 = vpop.f32.mrf.mxu0  ;;  %2563 = vmatpush2.msra.mxu0 %v418_v43  ;;  %v4509_v63 = vadd.f32 %v2091_v52, %v1991_v42  ;;  %v1147_v39 = vld [vmem:[#allocation5 + $0x1b78] sm:$0xff]  ;;  %v882_v19 = vld [vmem:[#allocation5 + $0x1330] sm:$0xff] }
 0x25b   : > { %2664 = vmatpush2.msra.mxu1 %v674_v44  ;;  %v1995_v61 = vadd.f32 %v1994_v9, %v4476_v23  ;;  %2564 = vmatprep.subr.mxu0 %v411_v55  ;;  %v907_v23 = vld [vmem:[#allocation5 + $0x13f8] sm:$0xff]  ;;  %v1138_v27 = vld [vmem:[#allocation5 + $0x1b30] sm:$0xff] }
 0x25c   : > { %2665 = vmatprep.subr.mxu1 %v667_v48  ;;  %v1996_v16 = vpop.f32.mrf.mxu0  ;;  %2565 = vmatpush2.msra.mxu0 %v410_v46  ;;  %v883_v36 = vld [vmem:[#allocation5 + $0x1338] sm:$0xff]  ;;  %v874_v43 = vld [vmem:[#allocation5 + $0x12f0] sm:$0xff] }
 0x25d   : > { %2666 = vmatpush2.msra.mxu1 %v666_v38  ;;  %v1997_v6 = vadd.f32 %v1996_v16, %v4478_v20  ;;  %2566 = vmatprep.subr.mxu0 %v403_v3  ;;  %v2095_v8 = vpop.f32.mrf.mxu1  ;;  %v3882_v20 = vld [vmem:[%s4242_s11 + $0x10] sm:$0xff]  ;;  %v1139_v57 = vld [vmem:[#allocation5 + $0x1b38] sm:$0xff] }
 0x25e   : > { %2667 = vmatprep.subr.mxu1 %v659_v58  ;;  %2567 = vmatpush2.msra.mxu0 %v402_v56  ;;  %v4513_v13 = vadd.f32 %v2095_v8, %v1995_v61  ;;  %v875_v41 = vld [vmem:[#allocation5 + $0x12f8] sm:$0xff]  ;;  %v1130_v44 = vld [vmem:[#allocation5 + $0x1af0] sm:$0xff] }
 0x25f   : > { %2568 = vmatprep.mubr.f32.mxu0 %v3879_v11  ;;  %2668 = vmatpush2.msra.mxu1 %v658_v2  ;;  %v2097_v7 = vpop.f32.mrf.mxu1  ;;  %v1131_v42 = vld [vmem:[#allocation5 + $0x1af8] sm:$0xff]  ;;  %v866_v48 = vld [vmem:[#allocation5 + $0x12b0] sm:$0xff] }
 0x260   : > { %2669 = vmatprep.mubr.f32.mxu1 %v3880_v14  ;;  %2569 = vmatmul.mubr.f32.vlgmr.msra.gmra.mxu0 %v3881_v21  ;;  %v4518_v26 = vadd.f32 %v2097_v7, %v1997_v6  ;;  %v867_v47 = vld [vmem:[#allocation5 + $0x12b8] sm:$0xff]  ;;  %v1122_v46 = vld [vmem:[#allocation5 + $0x1ab0] sm:$0xff] }
 0x261   : > { %2670 = vmatmul.mubr.f32.vlgmr.msra.gmra.mxu1 %v3882_v20  ;;  %2706 = vmatprep.subr.mxu0 %v907_v23  ;;  %v1123_v55 = vld [vmem:[#allocation5 + $0x1ab8] sm:$0xff]  ;;  %v858_v52 = vld [vmem:[#allocation5 + $0x1270] sm:$0xff] }
 0x262   : > { %2807 = vmatprep.subr.mxu1 %v1163_v1  ;;  %2707 = vmatpush1.msra.mxu0 %v906_v15  ;;  %v859_v38 = vld [vmem:[#allocation5 + $0x1278] sm:$0xff]  ;;  %v1114_v3 = vld [vmem:[#allocation5 + $0x1a70] sm:$0xff] }
 0x263   : > { %2808 = vmatpush1.msra.mxu1 %v1162_v4  ;;  %2708 = vmatprep.subr.mxu0 %v899_v31  ;;  %v1115_v9 = vld [vmem:[#allocation5 + $0x1a78] sm:$0xff]  ;;  %v850_v56 = vld [vmem:[#allocation5 + $0x1230] sm:$0xff] }
 0x264   : > { %2809 = vmatprep.subr.mxu1 %v1155_v22  ;;  %2709 = vmatpush1.msra.mxu0 %v898_v28  ;;  %v851_v58 = vld [vmem:[#allocation5 + $0x1238] sm:$0xff]  ;;  %v1106_v16 = vld [vmem:[#allocation5 + $0x1a30] sm:$0xff] }
 0x265   : > { %2810 = vmatpush1.msra.mxu1 %v1154_v29  ;;  %2710 = vmatprep.subr.mxu0 %v891_v49  ;;  %v1107_v61 = vld [vmem:[#allocation5 + $0x1a38] sm:$0xff]  ;;  %v842_v8 = vld [vmem:[#allocation5 + $0x11f0] sm:$0xff] }
 0x266   : > { %2811 = vmatprep.subr.mxu1 %v1147_v39  ;;  %2711 = vmatpush1.msra.mxu0 %v890_v12  ;;  %v843_v2 = vld [vmem:[#allocation5 + $0x11f8] sm:$0xff]  ;;  %v1098_v11 = vld [vmem:[#allocation5 + $0x19f0] sm:$0xff] }
 0x267   : > { %2812 = vmatpush1.msra.mxu1 %v1146_v34  ;;  %2712 = vmatprep.subr.mxu0 %v883_v36  ;;  %v1099_v6 = vld [vmem:[#allocation5 + $0x19f8] sm:$0xff]  ;;  %v834_v14 = vld [vmem:[#allocation5 + $0x11b0] sm:$0xff] }
 0x268   : > { %2813 = vmatprep.subr.mxu1 %v1139_v57  ;;  %2713 = vmatpush1.msra.mxu0 %v882_v19  ;;  %v835_v23 = vld [vmem:[#allocation5 + $0x11b8] sm:$0xff]  ;;  %v1090_v15 = vld [vmem:[#allocation5 + $0x19b0] sm:$0xff] }
 0x269   : > { %2814 = vmatpush1.msra.mxu1 %v1138_v27  ;;  %2714 = vmatprep.subr.mxu0 %v875_v41  ;;  %v1091_v1 = vld [vmem:[#allocation5 + $0x19b8] sm:$0xff]  ;;  %v826_v21 = vld [vmem:[#allocation5 + $0x1170] sm:$0xff] }
 0x26a   : > { %2815 = vmatprep.subr.mxu1 %v1131_v42  ;;  %2715 = vmatpush1.msra.mxu0 %v874_v43  ;;  %v827_v4 = vld [vmem:[#allocation5 + $0x1178] sm:$0xff]  ;;  %v1082_v20 = vld [vmem:[#allocation5 + $0x1970] sm:$0xff] }
 0x26b   : > { %2816 = vmatpush1.msra.mxu1 %v1130_v44  ;;  %2716 = vmatprep.subr.mxu0 %v867_v47  ;;  %v1083_v7 = vld [vmem:[#allocation5 + $0x1978] sm:$0xff]  ;;  %v818_v28 = vld [vmem:[#allocation5 + $0x1130] sm:$0xff] }
 0x26c   : > { %2817 = vmatprep.subr.mxu1 %v1123_v55  ;;  %2717 = vmatpush1.msra.mxu0 %v866_v48  ;;  %v819_v31 = vld [vmem:[#allocation5 + $0x1138] sm:$0xff]  ;;  %v1074_v29 = vld [vmem:[#allocation5 + $0x1930] sm:$0xff] }
 0x26d   : > { %2818 = vmatpush1.msra.mxu1 %v1122_v46  ;;  %2718 = vmatprep.subr.mxu0 %v859_v38  ;;  %v1075_v22 = vld [vmem:[#allocation5 + $0x1938] sm:$0xff]  ;;  %v810_v12 = vld [vmem:[#allocation5 + $0x10f0] sm:$0xff] }
 0x26e   : > { %2819 = vmatprep.subr.mxu1 %v1115_v9  ;;  %2719 = vmatpush1.msra.mxu0 %v858_v52  ;;  %v811_v49 = vld [vmem:[#allocation5 + $0x10f8] sm:$0xff]  ;;  %v1066_v34 = vld [vmem:[#allocation5 + $0x18f0] sm:$0xff] }
 0x26f   : > { %2820 = vmatpush1.msra.mxu1 %v1114_v3  ;;  %2720 = vmatprep.subr.mxu0 %v851_v58  ;;  %v1067_v39 = vld [vmem:[#allocation5 + $0x18f8] sm:$0xff]  ;;  %v802_v19 = vld [vmem:[#allocation5 + $0x10b0] sm:$0xff] }
 0x270   : > { %2821 = vmatprep.subr.mxu1 %v1107_v61  ;;  %2721 = vmatpush1.msra.mxu0 %v850_v56  ;;  %v803_v36 = vld [vmem:[#allocation5 + $0x10b8] sm:$0xff]  ;;  %v1058_v27 = vld [vmem:[#allocation5 + $0x18b0] sm:$0xff] }
 0x271   : > { %2822 = vmatpush1.msra.mxu1 %v1106_v16  ;;  %2722 = vmatprep.subr.mxu0 %v843_v2  ;;  %v1059_v57 = vld [vmem:[#allocation5 + $0x18b8] sm:$0xff]  ;;  %v794_v43 = vld [vmem:[#allocation5 + $0x1070] sm:$0xff] }
 0x272   : > { %2823 = vmatprep.subr.mxu1 %v1099_v6  ;;  %2723 = vmatpush1.msra.mxu0 %v842_v8  ;;  %v795_v41 = vld [vmem:[#allocation5 + $0x1078] sm:$0xff]  ;;  %v1050_v44 = vld [vmem:[#allocation5 + $0x1870] sm:$0xff] }
 0x273   : > { %2824 = vmatpush1.msra.mxu1 %v1098_v11  ;;  %2724 = vmatprep.subr.mxu0 %v835_v23  ;;  %v1051_v42 = vld [vmem:[#allocation5 + $0x1878] sm:$0xff]  ;;  %v786_v48 = vld [vmem:[#allocation5 + $0x1030] sm:$0xff] }
 0x274   : > { %2825 = vmatprep.subr.mxu1 %v1091_v1  ;;  %2725 = vmatpush1.msra.mxu0 %v834_v14  ;;  %v787_v47 = vld [vmem:[#allocation5 + $0x1038] sm:$0xff]  ;;  %v1042_v46 = vld [vmem:[#allocation5 + $0x1830] sm:$0xff] }
 0x275   : > { %2826 = vmatpush1.msra.mxu1 %v1090_v15  ;;  %2726 = vmatprep.subr.mxu0 %v827_v4  ;;  %v1043_v55 = vld [vmem:[#allocation5 + $0x1838] sm:$0xff]  ;;  %v1034_v52 = vld [vmem:[#allocation5 + $0x17f0] sm:$0xff] }
 0x276   : > { %2827 = vmatprep.subr.mxu1 %v1083_v7  ;;  %2727 = vmatpush1.msra.mxu0 %v826_v21  ;;  %v1035_v38 = vld [vmem:[#allocation5 + $0x17f8] sm:$0xff]  ;;  %v1290_v3 = vld [vmem:[#allocation5 + $0x1ff0] sm:$0xff] }
 0x277   : > { %2828 = vmatpush1.msra.mxu1 %v1082_v20  ;;  %2728 = vmatprep.subr.mxu0 %v819_v31  ;;  %v1291_v9 = vld [vmem:[#allocation5 + $0x1ff8] sm:$0xff]  ;;  %v1026_v56 = vld [vmem:[#allocation5 + $0x17b0] sm:$0xff]  ;;  %v3883_v31 = vld [vmem:[%s4242_s11 + $0x48] sm:$0xff] }
 0x278   : > { %2829 = vmatprep.subr.mxu1 %v1075_v22  ;;  %2729 = vmatpush1.msra.mxu0 %v818_v28  ;;  %v1027_v58 = vld [vmem:[#allocation5 + $0x17b8] sm:$0xff]  ;;  %v1282_v16 = vld [vmem:[#allocation5 + $0x1fb0] sm:$0xff] }
 0x279   : > { %2830 = vmatpush1.msra.mxu1 %v1074_v29  ;;  %2730 = vmatprep.subr.mxu0 %v811_v49  ;;  %v1283_v61 = vld [vmem:[#allocation5 + $0x1fb8] sm:$0xff]  ;;  %v1018_v8 = vld [vmem:[#allocation5 + $0x1770] sm:$0xff] }
 0x27a   : > { %2831 = vmatprep.subr.mxu1 %v1067_v39  ;;  %2731 = vmatpush1.msra.mxu0 %v810_v12  ;;  %v1019_v2 = vld [vmem:[#allocation5 + $0x1778] sm:$0xff]  ;;  %v1274_v11 = vld [vmem:[#allocation5 + $0x1f70] sm:$0xff]  ;;  %v3885_v12 = vld [vmem:[%s4242_s11 + $0x40] sm:$0xff] }
 0x27b   : > { %2832 = vmatpush1.msra.mxu1 %v1066_v34  ;;  %2732 = vmatprep.subr.mxu0 %v803_v36  ;;  %v1275_v6 = vld [vmem:[#allocation5 + $0x1f78] sm:$0xff]  ;;  %v1010_v14 = vld [vmem:[#allocation5 + $0x1730] sm:$0xff] }
 0x27c   : > { %2833 = vmatprep.subr.mxu1 %v1059_v57  ;;  %2733 = vmatpush1.msra.mxu0 %v802_v19  ;;  %v1011_v23 = vld [vmem:[#allocation5 + $0x1738] sm:$0xff]  ;;  %v1266_v15 = vld [vmem:[#allocation5 + $0x1f30] sm:$0xff] }
 0x27d   : > { %2834 = vmatpush1.msra.mxu1 %v1058_v27  ;;  %2734 = vmatprep.subr.mxu0 %v795_v41  ;;  %v1267_v1 = vld [vmem:[#allocation5 + $0x1f38] sm:$0xff]  ;;  %v1002_v21 = vld [vmem:[#allocation5 + $0x16f0] sm:$0xff]  ;;  %v3887_v41 = vld [vmem:[%s4242_s11 + $0x88] sm:$0xff] }
 0x27e   : > { %2835 = vmatprep.subr.mxu1 %v1051_v42  ;;  %2735 = vmatpush1.msra.mxu0 %v794_v43  ;;  %v1003_v4 = vld [vmem:[#allocation5 + $0x16f8] sm:$0xff]  ;;  %v1258_v20 = vld [vmem:[#allocation5 + $0x1ef0] sm:$0xff] }
 0x27f   : > { %2836 = vmatpush1.msra.mxu1 %v1050_v44  ;;  %2736 = vmatprep.subr.mxu0 %v787_v47  ;;  %v1259_v7 = vld [vmem:[#allocation5 + $0x1ef8] sm:$0xff]  ;;  %v994_v49 = vld [vmem:[#allocation5 + $0x16b0] sm:$0xff] }
 0x280   : > { %2837 = vmatprep.subr.mxu1 %v1043_v55  ;;  %2737 = vmatpush1.msra.mxu0 %v786_v48  ;;  %v3884_v22 = vld [vmem:[%s4242_s11 + $0x58] sm:$0xff]  ;;  %v1250_v39 = vld [vmem:[#allocation5 + $0x1eb0] sm:$0xff]  ;;  %v3889_v48 = vld [vmem:[%s4242_s11 + $0x80] sm:$0xff] }
 0x281   : > { %2838 = vmatpush1.msra.mxu1 %v1042_v46  ;;  %2738 = vmatprep.subr.mxu0 %v1035_v38  ;;  %v995_v28 = vld [vmem:[#allocation5 + $0x16b8] sm:$0xff]  ;;  %v3886_v34 = vld [vmem:[%s4242_s11 + $0x50] sm:$0xff] }
 0x282   : > { %2839 = vmatprep.subr.mxu1 %v1291_v9  ;;  %2739 = vmatpush2.msra.mxu0 %v1034_v52  ;;  %v1251_v29 = vld [vmem:[#allocation5 + $0x1eb8] sm:$0xff]  ;;  %v986_v19 = vld [vmem:[#allocation5 + $0x1670] sm:$0xff] }
 0x283   : > { %2840 = vmatpush2.msra.mxu1 %v1290_v3  ;;  %2740 = vmatprep.subr.mxu0 %v1027_v58  ;;  %v987_v36 = vld [vmem:[#allocation5 + $0x1678] sm:$0xff]  ;;  %v1242_v27 = vld [vmem:[#allocation5 + $0x1e70] sm:$0xff]  ;;  %v3891_v58 = vld [vmem:[%s4242_s11 + $0xc8] sm:$0xff] }
 0x284   : > { %2841 = vmatprep.subr.mxu1 %v1283_v61  ;;  %2741 = vmatpush2.msra.mxu0 %v1026_v56  ;;  %v1243_v57 = vld [vmem:[#allocation5 + $0x1e78] sm:$0xff]  ;;  %v978_v47 = vld [vmem:[#allocation5 + $0x1630] sm:$0xff] }
 0x285   : > { %2842 = vmatpush2.msra.mxu1 %v1282_v16  ;;  %2742 = vmatprep.subr.mxu0 %v1019_v2  ;;  %v3888_v42 = vld [vmem:[%s4242_s11 + $0x98] sm:$0xff]  ;;  %v1234_v55 = vld [vmem:[#allocation5 + $0x1e30] sm:$0xff] }
 0x286   : > { %2843 = vmatprep.subr.mxu1 %v1275_v6  ;;  %2743 = vmatpush2.msra.mxu0 %v1018_v8  ;;  %v979_v43 = vld [vmem:[#allocation5 + $0x1638] sm:$0xff]  ;;  %v3890_v46 = vld [vmem:[%s4242_s11 + $0x90] sm:$0xff]  ;;  %v3893_v8 = vld [vmem:[%s4242_s11 + $0xc0] sm:$0xff] }
 0x287   : > { %2844 = vmatpush2.msra.mxu1 %v1274_v11  ;;  %2744 = vmatprep.subr.mxu0 %v1011_v23  ;;  %v1235_v44 = vld [vmem:[#allocation5 + $0x1e38] sm:$0xff]  ;;  %v970_v52 = vld [vmem:[#allocation5 + $0x15f0] sm:$0xff] }
 0x288   : > { %2845 = vmatprep.subr.mxu1 %v1267_v1  ;;  %2745 = vmatpush2.msra.mxu0 %v1010_v14  ;;  %v971_v38 = vld [vmem:[#allocation5 + $0x15f8] sm:$0xff]  ;;  %v1226_v3 = vld [vmem:[#allocation5 + $0x1df0] sm:$0xff] }
 0x289   : > { %2846 = vmatpush2.msra.mxu1 %v1266_v15  ;;  %2746 = vmatprep.subr.mxu0 %v1003_v4  ;;  %v1227_v9 = vld [vmem:[#allocation5 + $0x1df8] sm:$0xff]  ;;  %v962_v2 = vld [vmem:[#allocation5 + $0x15b0] sm:$0xff]  ;;  %v3895_v4 = vld [vmem:[%s4242_s11 + $0x108] sm:$0xff] }
 0x28a   : > { %2847 = vmatprep.subr.mxu1 %v1259_v7  ;;  %2574 = vmatprep.mubr.f32.mxu0 %v3883_v31  ;;  %v3892_v61 = vld [vmem:[%s4242_s11 + $0xd8] sm:$0xff]  ;;  %v1218_v6 = vld [vmem:[#allocation5 + $0x1db0] sm:$0xff] }
 0x28b   : > { %2675 = vmatprep.mubr.f32.mxu1 %v3884_v22  ;;  %2747 = vmatpush2.msra.mxu0 %v1002_v21  ;;  %v963_v56 = vld [vmem:[#allocation5 + $0x15b8] sm:$0xff]  ;;  %v3894_v11 = vld [vmem:[%s4242_s11 + $0xd0] sm:$0xff] }
 0x28c   : > { %2848 = vmatpush2.msra.mxu1 %v1258_v20  ;;  %2575 = vmatmul.mubr.f32.gmra.mxu0 %v3885_v12  ;;  %v1219_v16 = vld [vmem:[#allocation5 + $0x1db8] sm:$0xff]  ;;  %v954_v14 = vld [vmem:[#allocation5 + $0x1570] sm:$0xff] }
 0x28d   : > { %2676 = vmatmul.mubr.f32.gmra.mxu1 %v3886_v34  ;;  %2748 = vmatprep.subr.mxu0 %v995_v28  ;;  %v955_v23 = vld [vmem:[#allocation5 + $0x1578] sm:$0xff]  ;;  %v1210_v15 = vld [vmem:[#allocation5 + $0x1d70] sm:$0xff]  ;;  %v3897_v28 = vld [vmem:[%s4242_s11 + $0x100] sm:$0xff] }
 0x28e   : > { %2849 = vmatprep.subr.mxu1 %v1251_v29  ;;  %2749 = vmatpush2.msra.mxu0 %v994_v49  ;;  %v1211_v1 = vld [vmem:[#allocation5 + $0x1d78] sm:$0xff]  ;;  %v946_v31 = vld [vmem:[#allocation5 + $0x1530] sm:$0xff] }
 0x28f   : > { %2850 = vmatpush2.msra.mxu1 %v1250_v39  ;;  %2750 = vmatprep.subr.mxu0 %v987_v36  ;;  %v3896_v7 = vld [vmem:[%s4242_s11 + $0x118] sm:$0xff]  ;;  %v1202_v22 = vld [vmem:[#allocation5 + $0x1d30] sm:$0xff]  ;;  %v3899_v36 = vld [vmem:[%s4242_s11 + $0x148] sm:$0xff] }
 0x290   : > { %2851 = vmatprep.subr.mxu1 %v1243_v57  ;;  %2580 = vmatprep.mubr.f32.mxu0 %v3887_v41  ;;  %v947_v21 = vld [vmem:[#allocation5 + $0x1538] sm:$0xff]  ;;  %v3898_v29 = vld [vmem:[%s4242_s11 + $0x110] sm:$0xff] }
 0x291   : > { %2681 = vmatprep.mubr.f32.mxu1 %v3888_v42  ;;  %2751 = vmatpush2.msra.mxu0 %v986_v19  ;;  %v1203_v20 = vld [vmem:[#allocation5 + $0x1d38] sm:$0xff]  ;;  %v938_v12 = vld [vmem:[#allocation5 + $0x14f0] sm:$0xff] }
 0x292   : > { %2852 = vmatpush2.msra.mxu1 %v1242_v27  ;;  %2581 = vmatmul.mubr.f32.gmra.mxu0 %v3889_v48  ;;  %v939_v49 = vld [vmem:[#allocation5 + $0x14f8] sm:$0xff]  ;;  %v1194_v34 = vld [vmem:[#allocation5 + $0x1cf0] sm:$0xff] }
 0x293   : > { %2682 = vmatmul.mubr.f32.gmra.mxu1 %v3890_v46  ;;  %2752 = vmatprep.subr.mxu0 %v979_v43  ;;  %v1195_v39 = vld [vmem:[#allocation5 + $0x1cf8] sm:$0xff]  ;;  %v930_v41 = vld [vmem:[#allocation5 + $0x14b0] sm:$0xff]  ;;  %v3901_v43 = vld [vmem:[%s4242_s11 + $0x140] sm:$0xff] }
 0x294   : > { %2853 = vmatprep.subr.mxu1 %v1235_v44  ;;  %2753 = vmatpush2.msra.mxu0 %v978_v47  ;;  %v3900_v57 = vld [vmem:[%s4242_s11 + $0x158] sm:$0xff]  ;;  %v1186_v42 = vld [vmem:[#allocation5 + $0x1cb0] sm:$0xff] }
 0x295   : > { %2854 = vmatpush2.msra.mxu1 %v1234_v55  ;;  %2754 = vmatprep.subr.mxu0 %v971_v38  ;;  %v931_v19 = vld [vmem:[#allocation5 + $0x14b8] sm:$0xff]  ;;  %v3902_v44 = vld [vmem:[%s4242_s11 + $0x150] sm:$0xff] }
 0x296   : > { %2855 = vmatprep.subr.mxu1 %v1227_v9  ;;  %2586 = vmatprep.mubr.f32.mxu0 %v3891_v58  ;;  %v1187_v27 = vld [vmem:[#allocation5 + $0x1cb8] sm:$0xff]  ;;  %v922_v48 = vld [vmem:[#allocation5 + $0x1470] sm:$0xff]  ;;  %v3903_v58 = vld [vmem:[%s4242_s11 + $0x28] sm:$0xff] }
 0x297   : > { %2687 = vmatprep.mubr.f32.mxu1 %v3892_v61  ;;  %2755 = vmatpush2.msra.mxu0 %v970_v52  ;;  %v923_v47 = vld [vmem:[#allocation5 + $0x1478] sm:$0xff]  ;;  %v1178_v46 = vld [vmem:[#allocation5 + $0x1c70] sm:$0xff] }
 0x298   : > { %2856 = vmatpush2.msra.mxu1 %v1226_v3  ;;  %2587 = vmatmul.mubr.f32.gmra.mxu0 %v3893_v8  ;;  %v1179_v55 = vld [vmem:[#allocation5 + $0x1c78] sm:$0xff]  ;;  %v914_v52 = vld [vmem:[#allocation5 + $0x1430] sm:$0xff]  ;;  %v3907_v8 = vld [vmem:[%s4242_s11 + $0x68] sm:$0xff] }
 0x299   : > { %2688 = vmatmul.mubr.f32.gmra.mxu1 %v3894_v11  ;;  %2756 = vmatprep.subr.mxu0 %v963_v56  ;;  %v915_v38 = vld [vmem:[#allocation5 + $0x1438] sm:$0xff]  ;;  %v1170_v3 = vld [vmem:[#allocation5 + $0x1c30] sm:$0xff] }
 0x29a   : > { %2857 = vmatprep.subr.mxu1 %v1219_v16  ;;  %2757 = vmatpush2.msra.mxu0 %v962_v2  ;;  %v1171_v9 = vld [vmem:[#allocation5 + $0x1c38] sm:$0xff]  ;;  %v3905_v16 = vld [vmem:[%s4242_s11 + $0x20] sm:$0xff]  ;;  %v3906_v2 = vld [vmem:[%s4242_s11 + $0x30] sm:$0xff] }
 0x29b   : > { %2858 = vmatpush2.msra.mxu1 %v1218_v6  ;;  %2758 = vmatprep.subr.mxu0 %v955_v23  ;;  %v3904_v61 = vld [vmem:[%s4242_s11 + $0x38] sm:$0xff]  ;;  %v4546_v23 = vpop.f32.mrf.mxu0 }
 0x29c   : > { %2859 = vmatprep.subr.mxu1 %v1211_v1  ;;  %2592 = vmatprep.mubr.f32.mxu0 %v3895_v4  ;;  %v3179_v56 = vld [vmem:[#allocation7 + $0xf8] sm:$0xff]  ;;  %v4548_v1 = vpop.f32.mrf.mxu1  ;;  %v3910_v4 = vld [vmem:[%s4242_s11 + $0x70] sm:$0xff] }
 0x29d   : > { %2693 = vmatprep.mubr.f32.mxu1 %v3896_v7  ;;  %2759 = vmatpush2.msra.mxu0 %v954_v14  ;;  %v3163_v6 = vld [vmem:[#allocation7 + $0x78] sm:$0xff]  ;;  %v3178_v14 = vld [vmem:[#allocation7 + $0xf0] sm:$0xff] }
 0x29e   : > { %2860 = vmatpush2.msra.mxu1 %v1210_v15  ;;  %2593 = vmatmul.mubr.f32.gmra.mxu0 %v3897_v28  ;;  %v3908_v11 = vld [vmem:[%s4242_s11 + $0x78] sm:$0xff]  ;;  %v3909_v15 = vld [vmem:[%s4242_s11 + $0x60] sm:$0xff]  ;;  %v3162_v7 = vld [vmem:[#allocation7 + $0x70] sm:$0xff] }
 0x29f   : > { %2694 = vmatmul.mubr.f32.gmra.mxu1 %v3898_v29  ;;  %2760 = vmatprep.subr.mxu0 %v947_v21  ;;  %v3911_v21 = vld [vmem:[%s4242_s11 + $0xa8] sm:$0xff]  ;;  %v3913_v29 = vld [vmem:[%s4242_s11 + $0xa0] sm:$0xff] }
 0x2a0   : > { %2861 = vmatprep.subr.mxu1 %v1203_v20  ;;  %2761 = vmatpush2.msra.mxu0 %v946_v31  ;;  %v3912_v20 = vld [vmem:[%s4242_s11 + $0xb8] sm:$0xff]  ;;  %v4554_v31 = vpop.f32.mrf.mxu0  ;;  %v3177_v28 = vld [vmem:[#allocation7 + $0xe8] sm:$0xff] }
 0x2a1   : > { %2862 = vmatpush2.msra.mxu1 %v1202_v22  ;;  %2762 = vmatprep.subr.mxu0 %v939_v49  ;;  %v4556_v22 = vpop.f32.mrf.mxu1  ;;  %v3914_v49 = vld [vmem:[%s4242_s11 + $0xb0] sm:$0xff] }
 0x2a2   : > { %2863 = vmatprep.subr.mxu1 %v1195_v39  ;;  %2598 = vmatprep.mubr.f32.mxu0 %v3899_v36  ;;  %v3161_v39 = vld [vmem:[#allocation7 + $0x68] sm:$0xff] }
 0x2a3   : > { %2699 = vmatprep.mubr.f32.mxu1 %v3900_v57  ;;  %2763 = vmatpush2.msra.mxu0 %v938_v12  ;;  %v3915_v12 = vld [vmem:[%s4242_s11 + $0xe8] sm:$0xff] }
 0x2a4   : > { %2864 = vmatpush2.msra.mxu1 %v1194_v34  ;;  %2599 = vmatmul.mubr.f32.gmra.mxu0 %v3901_v43  ;;  %v3916_v34 = vld [vmem:[%s4242_s11 + $0xf8] sm:$0xff]  ;;  %v3918_v43 = vld [vmem:[%s4242_s11 + $0xf0] sm:$0xff] }
 0x2a5   : > { %2700 = vmatmul.mubr.f32.gmra.mxu1 %v3902_v44  ;;  %2764 = vmatprep.subr.mxu0 %v931_v19  ;;  %v3160_v44 = vld [vmem:[#allocation7 + $0x60] sm:$0xff] }
 0x2a6   : > { %2865 = vmatprep.subr.mxu1 %v1187_v27  ;;  %2765 = vmatpush2.msra.mxu0 %v930_v41  ;;  %v3176_v41 = vld [vmem:[#allocation7 + $0xe0] sm:$0xff] }
 0x2a7   : > { %2866 = vmatpush2.msra.mxu1 %v1186_v42  ;;  %2766 = vmatprep.subr.mxu0 %v923_v47  ;;  %v3917_v42 = vld [vmem:[%s4242_s11 + $0xe0] sm:$0xff]  ;;  %v3919_v47 = vld [vmem:[%s4242_s11 + $0x128] sm:$0xff] }
 0x2a8   : > { %2867 = vmatprep.subr.mxu1 %v1179_v55  ;;  %2767 = vmatpush2.msra.mxu0 %v922_v48  ;;  %v3920_v55 = vld [vmem:[%s4242_s11 + $0x138] sm:$0xff] }
 0x2a9   : > { %2868 = vmatpush2.msra.mxu1 %v1178_v46  ;;  %2768 = vmatprep.subr.mxu0 %v915_v38  ;;  %v3175_v38 = vld [vmem:[#allocation7 + $0xd8] sm:$0xff] }
 0x2aa   : > { %2869 = vmatprep.subr.mxu1 %v1171_v9  ;;  %2769 = vmatpush2.msra.mxu0 %v914_v52  ;;  %v3921_v9 = vld [vmem:[%s4242_s11 + $0x120] sm:$0xff]  ;;  %v3922_v52 = vld [vmem:[%s4242_s11 + $0x130] sm:$0xff] }
 0x2ab   : > { %2770 = vmatprep.mubr.f32.mxu0 %v3903_v58  ;;  %2870 = vmatpush2.msra.mxu1 %v1170_v3  ;;  %v3159_v3 = vld [vmem:[#allocation7 + $0x58] sm:$0xff]  ;;  %v3923_v58 = vld [vmem:[%s4242_s11 + $0x168] sm:$0xff] }
 0x2ac   : > { %2871 = vmatprep.mubr.f32.mxu1 %v3904_v61  ;;  %2771 = vmatmul.mubr.f32.vlgmr.msra.gmra.mxu0 %v3905_v16  ;;  %v3924_v61 = vld [vmem:[%s4242_s11 + $0x178] sm:$0xff] }
 0x2ad   : > { %2872 = vmatmul.mubr.f32.vlgmr.msra.gmra.mxu1 %v3906_v2  ;;  %2776 = vmatprep.mubr.f32.mxu0 %v3907_v8  ;;  %v3174_v2 = vld [vmem:[#allocation7 + $0xd0] sm:$0xff]  ;;  %v3925_v8 = vld [vmem:[%s4242_s11 + $0x160] sm:$0xff] }
 0x2ae   : > { %2877 = vmatprep.mubr.f32.mxu1 %v3908_v11  ;;  %3550 = vmatprep.subr.mxu0 %v3179_v56  ;;  %v3926_v11 = vld [vmem:[%s4242_s11 + $0x170] sm:$0xff] }
 0x2af   : > { %3551 = vmatpush3.msra.mxu0 %v3163_v6  ;;  %v3158_v6 = vld [vmem:[#allocation7 + $0x50] sm:$0xff] }
 0x2b0   : > { %2777 = vmatmul.mubr.f32.gmra.mxu0 %v3909_v15  ;;  %3552 = vmatprep.subr.mxu0 %v3178_v14  ;;  %v3173_v14 = vld [vmem:[#allocation7 + $0xc8] sm:$0xff] }
 0x2b1   : > { %2878 = vmatmul.mubr.f32.gmra.mxu1 %v3910_v4  ;;  %2782 = vmatprep.mubr.f32.mxu0 %v3911_v21  ;;  %v3172_v21 = vld [vmem:[#allocation7 + $0xc0] sm:$0xff] }
 0x2b2   : > { %2883 = vmatprep.mubr.f32.mxu1 %v3912_v20  ;;  %3553 = vmatpush3.msra.mxu0 %v3162_v7  ;;  %v3157_v7 = vld [vmem:[#allocation7 + $0x48] sm:$0xff] }
 0x2b3   : > { %3554 = vmatprep.subr.mxu0 %v3177_v28 }
 0x2b4   : > { %2783 = vmatmul.mubr.f32.gmra.mxu0 %v3913_v29  ;;  %v3156_v29 = vld [vmem:[#allocation7 + $0x40] sm:$0xff] }
 0x2b5   : > { %2884 = vmatmul.mubr.f32.gmra.mxu1 %v3914_v49  ;;  %2788 = vmatprep.mubr.f32.mxu0 %v3915_v12  ;;  %v4562_v36 = vpop.f32.mrf.mxu0  ;;  %v3171_v49 = vld [vmem:[#allocation7 + $0xb8] sm:$0xff]  ;;  %v3170_v12 = vld [vmem:[#allocation7 + $0xb0] sm:$0xff] }
 0x2b6   : > { %2889 = vmatprep.mubr.f32.mxu1 %v3916_v34  ;;  %v4564_v57 = vpop.f32.mrf.mxu1  ;;  %3555 = vmatpush3.msra.mxu0 %v3161_v39  ;;  %v3155_v39 = vld [vmem:[#allocation7 + $0x38] sm:$0xff] }
 0x2b7   : > { %v4566_v19 = vpop.f32.mrf.mxu0  ;;  %3556 = vmatprep.subr.mxu0 %v3176_v41 }
 0x2b8   : > { %v4568_v27 = vpop.f32.mrf.mxu1  ;;  %2789 = vmatmul.mubr.f32.gmra.mxu0 %v3917_v42  ;;  %v3154_v42 = vld [vmem:[#allocation7 + $0x30] sm:$0xff] }
 0x2b9   : > { %2890 = vmatmul.mubr.f32.gmra.mxu1 %v3918_v43  ;;  %2794 = vmatprep.mubr.f32.mxu0 %v3919_v47  ;;  %v3169_v43 = vld [vmem:[#allocation7 + $0xa8] sm:$0xff] }
 0x2ba   : > { %2895 = vmatprep.mubr.f32.mxu1 %v3920_v55  ;;  %3557 = vmatpush3.msra.mxu0 %v3160_v44  ;;  %v3153_v47 = vld [vmem:[#allocation7 + $0x28] sm:$0xff]  ;;  %v3168_v55 = vld [vmem:[#allocation7 + $0xa0] sm:$0xff] }
 0x2bb   : > { %v4574_v48 = vpop.f32.mrf.mxu0  ;;  %3558 = vmatprep.subr.mxu0 %v3175_v38 }
 0x2bc   : > { %v4576_v46 = vpop.f32.mrf.mxu1  ;;  %2795 = vmatmul.mubr.f32.gmra.mxu0 %v3921_v9  ;;  %v3152_v9 = vld [vmem:[#allocation7 + $0x20] sm:$0xff] }
 0x2bd   : > { %2896 = vmatmul.mubr.f32.gmra.mxu1 %v3922_v52  ;;  %2800 = vmatprep.mubr.f32.mxu0 %v3923_v58  ;;  %v4582_v56 = vpop.f32.mrf.mxu0  ;;  %v3167_v52 = vld [vmem:[#allocation7 + $0x98] sm:$0xff] }
 0x2be   : > { %2901 = vmatprep.mubr.f32.mxu1 %v3924_v61  ;;  %v4584_v16 = vpop.f32.mrf.mxu1  ;;  %3559 = vmatpush3.msra.mxu0 %v3159_v3  ;;  %v3151_v58 = vld [vmem:[#allocation7 + $0x18] sm:$0xff]  ;;  %v3166_v61 = vld [vmem:[#allocation7 + $0x90] sm:$0xff] }
 0x2bf   : > { %3560 = vmatprep.subr.mxu0 %v3174_v2 }
 0x2c0   : > { %2801 = vmatmul.mubr.f32.gmra.mxu0 %v3925_v8  ;;  %v3150_v8 = vld [vmem:[#allocation7 + $0x10] sm:$0xff] }
 0x2c1   : > { %2902 = vmatmul.mubr.f32.gmra.mxu1 %v3926_v11  ;;  %v4588_v15 = vpop.f32.mrf.mxu0  ;;  %3561 = vmatpush3.msra.mxu0 %v3158_v6  ;;  %v3165_v11 = vld [vmem:[#allocation7 + $0x88] sm:$0xff] }
 0x2c2   : > { %v4590_v4 = vpop.f32.mrf.mxu1  ;;  %3562 = vmatprep.subr.mxu0 %v3173_v14  ;;  %v3149_v14 = vld [vmem:[#allocation7 + $0x8] sm:$0xff] }
 0x2c3   : > { %v4592_v20 = vpop.f32.mrf.mxu0  ;;  %3563 = vmatpush3.msra.mxu0 %v3157_v7  ;;  %v2268_v7 = vadd.f32 %v4548_v1, %v4546_v23  ;;  %v2908_v23 = vmul.f32 %v4373_v25, %v4373_v25  ;;  %v2274_v1 = vadd.f32 %v4564_v57, %v4562_v36  ;;  %v2280_v57 = vadd.f32 %v4576_v46, %v4574_v48 }
 0x2c4   : > { %v4594_v28 = vpop.f32.mrf.mxu1  ;;  %3564 = vmatprep.subr.mxu0 %v3172_v21  ;;  %v3164_v21 = vld [vmem:[#allocation7 + $0x80] sm:$0xff] }
 0x2c5   : > { %3565 = vmatpush3.msra.mxu0 %v3156_v29 }
 0x2c6   : > { %3566 = vmatprep.subr.mxu0 %v3171_v49 }
 0x2c7   : > { %v4596_v34 = vpop.f32.mrf.mxu0  ;;  %3567 = vmatpush3.msra.mxu0 %v3155_v39  ;;  %v3148_v39 = vld [vmem:[#allocation7] sm:$0xff] }
 0x2c8   : > { %v4598_v41 = vpop.f32.mrf.mxu1  ;;  %3568 = vmatprep.subr.mxu0 %v3170_v12  ;;  %v2270_v12 = vadd.f32 %v4556_v22, %v4554_v31  ;;  %v2909_v31 = vmul.f32 %v4376_v32, %v4376_v32 }
 0x2c9   : > { %v4600_v44 = vpop.f32.mrf.mxu0  ;;  %3569 = vmatpush3.msra.mxu0 %v3154_v42 }
 0x2ca   : > { %v4602_v38 = vpop.f32.mrf.mxu1  ;;  %3570 = vmatprep.subr.mxu0 %v3169_v43 }
 0x2cb   : > { %3571 = vmatpush3.msra.mxu0 %v3153_v47 }
 0x2cc   : > { %3572 = vmatprep.subr.mxu0 %v3168_v55 }
 0x2cd   : > { %v4604_v3 = vpop.f32.mrf.mxu0  ;;  %3573 = vmatpush3.msra.mxu0 %v3152_v9 }
 0x2ce   : > { %v4606_v2 = vpop.f32.mrf.mxu1  ;;  %3574 = vmatprep.subr.mxu0 %v3167_v52 }
 0x2cf   : > { %v4608_v6 = vpop.f32.mrf.mxu0  ;;  %3575 = vmatpush3.msra.mxu0 %v3151_v58 }
 0x2d0   : > { %3576 = vmatprep.subr.mxu0 %v3166_v61  ;;  %v4612_v29 = vpop.f32.mrf.mxu1 }
 0x2d1   : > { %3577 = vmatpush3.msra.mxu0 %v3150_v8  ;;  %v2276_v8 = vadd.f32 %v4568_v27, %v4566_v19  ;;  %v2912_v19 = vmul.f32 %v4380_v51, %v4380_v51  ;;  %v2286_v51 = vadd.f32 %v4590_v4, %v4588_v15  ;;  %v3211_v15 = vld [vmem:[#allocation7 + $0x1f8] sm:$0xff] }
 0x2d2   : > { %3578 = vmatprep.subr.mxu0 %v3165_v11  ;;  %v3195_v4 = vld [vmem:[#allocation7 + $0x178] sm:$0xff]  ;;  %3600 = vmatprep.subr.mxu1 %v3211_v15  ;;  %v2925_v15 = vmul.f32 %v4401_v62, %v4401_v62 }
 0x2d3   : > { %3579 = vmatpush3.msra.mxu0 %v3149_v14  ;;  %3601 = vmatpush3.msra.mxu1 %v3195_v4 }
 0x2d4   : > { %v2368_v49 = vpop.f32.mrf.mxu0  ;;  %3580 = vmatprep.subr.mxu0 %v3164_v21 }
 0x2d5   : > { %v2369_v42 = vadd.f32 %v2368_v49, %v2268_v7  ;;  %3581 = vmatpush3.msra.mxu0 %v3148_v39 }
 0x2d6   : > { %v2469_v43 = vpop.f32.mrf.mxu1  ;;  %v2370_v47 = vpop.f32.mrf.mxu0 }
 0x2d7   : > { %v2470_v55 = vadd.f32 %v2469_v43, %v2369_v42  ;;  %v2371_v9 = vadd.f32 %v2370_v47, %v2270_v12  ;;  %v2282_v12 = vadd.f32 %v4584_v16, %v4582_v56  ;;  %v2916_v16 = vmul.f32 %v4386_v10, %v4386_v10 }
 0x2d8   : > { %v2471_v52 = vpop.f32.mrf.mxu1 }
 0x2d9   : > { %v2932_v58 = vmul.f32 %v2470_v55, %v2470_v55  ;;  %v2472_v61 = vadd.f32 %v2471_v52, %v2371_v9  ;;  %v2913_v9 = vmul.f32 %v4383_v59, %v4383_v59 }
 0x2da   : > { %v2374_v22 = vpop.f32.mrf.mxu0 }
 0x2db   : > { %v4624_v11 = vadd.f32 %v2932_v58, %v2908_v23  ;;  %v2933_v14 = vmul.f32 %v2472_v61, %v2472_v61  ;;  %v2375_v7 = vadd.f32 %v2374_v22, %v2274_v1  ;;  %v2288_v58 = vadd.f32 %v4594_v28, %v4592_v20 }
 0x2dc   : > { %v2376_v21 = vpop.f32.mrf.mxu0  ;;  %v2920_v20 = vmul.f32 %v4392_v33, %v4392_v33  ;;  %v2292_v28 = vadd.f32 %v4598_v41, %v4596_v34  ;;  %v2294_v33 = vadd.f32 %v4602_v38, %v4600_v44  ;;  %v2298_v34 = vadd.f32 %v4606_v2, %v4604_v3  ;;  %v3209_v44 = vld [vmem:[#allocation7 + $0x1e8] sm:$0xff] }
 0x2dd   : > { %3723 = vrsqrt.f32 %v4624_v11  ;;  %v4627_v25 = vadd.f32 %v2933_v14, %v2909_v31  ;;  %v2377_v49 = vadd.f32 %v2376_v21, %v2276_v8  ;;  %v2475_v36 = vpop.f32.mrf.mxu1  ;;  %vm2982_vm1 = vcmp.eq.f32.partialorder %v4624_v11, inf }
 0x2de   : > { %v2476_v32 = vadd.f32 %v2475_v36, %v2375_v7  ;;  %v2917_v7 = vmul.f32 %v4389_v18, %v4389_v18  ;;  %vm2984_vm3 = vcmp.eq.f32.partialorder %v4624_v11, 0.0 }
 0x2df   : > { %3725 = vrsqrt.f32 %v4627_v25  ;;  %v2477_v39 = vpop.f32.mrf.mxu1  ;;  %vm2989_vm0 = vcmp.eq.f32.partialorder %v4627_v25, inf  ;;  %vm2991_vm2 = vcmp.eq.f32.partialorder %v4627_v25, 0.0 }
 0x2e0   : > { %v2380_v27 = vpop.f32.mrf.mxu0  ;;  %v2936_v42 = vmul.f32 %v2476_v32, %v2476_v32  ;;  %v2478_v47 = vadd.f32 %v2477_v39, %v2377_v49  ;;  %v2921_v39 = vmul.f32 %v4395_v40, %v4395_v40 }
 0x2e1   : > { %v2381_v43 = vadd.f32 %v2380_v27, %v2280_v57 }
 0x2e2   : > { %v2382_v55 = vpop.f32.mrf.mxu0  ;;  %v4638_v52 = vadd.f32 %v2936_v42, %v2912_v19  ;;  %v2937_v48 = vmul.f32 %v2478_v47, %v2478_v47 }
 0x2e3   : > { %v2383_v46 = vadd.f32 %v2382_v55, %v2282_v12  ;;  %v2481_v23 = vpop.f32.mrf.mxu1  ;;  %v2924_v12 = vmul.f32 %v4398_v54, %v4398_v54  ;;  %v2992_v54 = vand.u32 2147483648, %v4627_v25 }
 0x2e4   : > { %3727 = vrsqrt.f32 %v4638_v52  ;;  %v4643_v1 = vadd.f32 %v2937_v48, %v2913_v9  ;;  %v2482_v56 = vadd.f32 %v2481_v23, %v2381_v43  ;;  %v3210_v43 = vld [vmem:[#allocation7 + $0x1f0] sm:$0xff]  ;;  %vm3010_vm4 = vcmp.eq.f32.partialorder %v4638_v52, inf }
 0x2e5   : > { %v2483_v61 = vpop.f32.mrf.mxu1  ;;  %3602 = vmatprep.subr.mxu1 %v3210_v43  ;;  %v3194_v48 = vld [vmem:[#allocation7 + $0x170] sm:$0xff]  ;;  %vm3012_vm5 = vcmp.eq.f32.partialorder %v4638_v52, 0.0 }
 0x2e6   : > { %v2386_v59 = vpop.f32.mrf.mxu0  ;;  %3729 = vrsqrt.f32 %v4643_v1  ;;  %v2940_v31 = vmul.f32 %v2482_v56, %v2482_v56  ;;  %v2484_v8 = vadd.f32 %v2483_v61, %v2383_v46  ;;  %3603 = vmatpush3.msra.mxu1 %v3194_v48  ;;  %vm3017_vm6 = vcmp.eq.f32.partialorder %v4643_v1, inf  ;;  %v3190_v43 = vld [vmem:[#allocation7 + $0x150] sm:$0xff] }
 0x2e7   : > { %v2387_v22 = vadd.f32 %v2386_v59, %v2286_v51  ;;  %3604 = vmatprep.subr.mxu1 %v3209_v44  ;;  %v3193_v51 = vld [vmem:[#allocation7 + $0x168] sm:$0xff]  ;;  %v3208_v59 = vld [vmem:[#allocation7 + $0x1e0] sm:$0xff]  ;;  %vm3019_vm7 = vcmp.eq.f32.partialorder %v4643_v1, 0.0 }
 0x2e8   : > { %v2388_v14 = vpop.f32.mrf.mxu0  ;;  %v4652_v21 = vadd.f32 %v2940_v31, %v2916_v16  ;;  %v2941_v49 = vmul.f32 %v2484_v8, %v2484_v8  ;;  %3605 = vmatpush3.msra.mxu1 %v3193_v51  ;;  %v3192_v8 = vld [vmem:[#allocation7 + $0x160] sm:$0xff] }
 0x2e9   : > { %v2389_v10 = vadd.f32 %v2388_v14, %v2288_v58  ;;  %v2487_v57 = vpop.f32.mrf.mxu1  ;;  %v2985_v58 = vand.u32 2147483648, %v4624_v11  ;;  %3606 = vmatprep.subr.mxu1 %v3208_v59  ;;  %v3204_v51 = vld [vmem:[#allocation7 + $0x1c0] sm:$0xff] }
 0x2ea   : > { %v3724_v36 = vpop.eup %3723  ;;  %3731 = vrsqrt.f32 %v4652_v21  ;;  %v4659_v32 = vadd.f32 %v2941_v49, %v2917_v7  ;;  %v2488_v19 = vadd.f32 %v2487_v57, %v2387_v22  ;;  %3607 = vmatpush3.msra.mxu1 %v3192_v8  ;;  %v3191_v57 = vld [vmem:[#allocation7 + $0x158] sm:$0xff]  ;;  %vm3038_vm8 = vcmp.eq.f32.partialorder %v4652_v21, inf }
 0x2eb   : > { %v2981_v18 = vmul.f32 %v3724_v36, %v4624_v11  ;;  %v2489_v42 = vpop.f32.mrf.mxu1  ;;  %vm3040_vm11 = vcmp.eq.f32.partialorder %v4652_v21, 0.0 }
 0x2ec   : > { %v3726_v27 = vpop.eup %3725  ;;  %v2392_v41 = vpop.f32.mrf.mxu0  ;;  %3733 = vrsqrt.f32 %v4659_v32  ;;  %v2944_v47 = vmul.f32 %v2488_v19, %v2488_v19  ;;  %v2490_v9 = vadd.f32 %v2489_v42, %v2389_v10  ;;  %v3207_v10 = vld [vmem:[#allocation7 + $0x1d8] sm:$0xff]  ;;  %vm3045_vm9 = vcmp.eq.f32.partialorder %v4659_v32, inf }
 0x2ed   : > { %v2393_v55 = vadd.f32 %v2392_v41, %v2292_v28  ;;  %v2988_v46 = vmul.f32 %v3726_v27, %v4627_v25  ;;  %v2983_v23 = vsel %vm2982_vm1, %v4624_v11, %v2981_v18  ;;  %3608 = vmatprep.subr.mxu1 %v3207_v10  ;;  %v3020_v41 = vand.u32 2147483648, %v4643_v1  ;;  %v3186_v10 = vld [vmem:[#allocation7 + $0x130] sm:$0xff] }
 0x2ee   : > { %v2394_v40 = vpop.f32.mrf.mxu0  ;;  %v4675_v38 = vadd.f32 %v2944_v47, %v2920_v20  ;;  %v2945_v3 = vmul.f32 %v2490_v9, %v2490_v9  ;;  %v2986_v49 = vsel %vm2984_vm3, %v2985_v58, %v2983_v23  ;;  %3609 = vmatpush3.msra.mxu1 %v3191_v57  ;;  %v3205_v9 = vld [vmem:[#allocation7 + $0x1c8] sm:$0xff]  ;;  %vm3047_vm10 = vcmp.eq.f32.partialorder %v4659_v32, 0.0 }
 0x2ef   : > { %v2395_v2 = vadd.f32 %v2394_v40, %v2294_v33  ;;  %v2493_v56 = vpop.f32.mrf.mxu1  ;;  %v2990_v16 = vsel %vm2989_vm0, %v4627_v25, %v2988_v46  ;;  %v2300_v25 = vadd.f32 %v4612_v29, %v4608_v6  ;;  %v3013_v29 = vand.u32 2147483648, %v4638_v52  ;;  %v3206_v33 = vld [vmem:[#allocation7 + $0x1d0] sm:$0xff] }
 0x2f0   : > { %3735 = vrsqrt.f32 %v4675_v38  ;;  %v4683_v61 = vadd.f32 %v2945_v3, %v2921_v39  ;;  %v2494_v31 = vadd.f32 %v2493_v56, %v2393_v55  ;;  %v2993_v22 = vsel %vm2991_vm2, %v2992_v54, %v2990_v16  ;;  %3610 = vmatprep.subr.mxu1 %v3206_v33  ;;  %v3189_v3 = vld [vmem:[#allocation7 + $0x148] sm:$0xff]  ;;  %v3188_v16 = vld [vmem:[#allocation7 + $0x140] sm:$0xff] }
 0x2f1   : > { %v3728_v14 = vpop.eup %3727  ;;  %v2495_v7 = vpop.f32.mrf.mxu1  ;;  %3276 = vmatprep.mubr.f32.mxu0 %v2993_v22  ;;  %3611 = vmatpush3.msra.mxu1 %v3190_v43  ;;  %v2928_v40 = vmul.f32 %v4405_v0, %v4405_v0  ;;  %v2929_v0 = vmul.f32 %v4410_v17, %v4410_v17  ;;  %v3048_v22 = vand.u32 2147483648, %v4659_v32  ;;  %v3041_v17 = vand.u32 2147483648, %v4652_v21 }
 0x2f2   : > { %v2398_v4 = vpop.f32.mrf.mxu0  ;;  %3737 = vrsqrt.f32 %v4683_v61  ;;  %v2948_v36 = vmul.f32 %v2494_v31, %v2494_v31  ;;  %v2496_v28 = vadd.f32 %v2495_v7, %v2395_v2  ;;  %3277 = vmatmul.mubr.f32.vlgmr.msra.gmra.mxu0 %v2986_v49  ;;  %v3009_v6 = vmul.f32 %v3728_v14, %v4638_v52  ;;  %3612 = vmatprep.subr.mxu1 %v3205_v9  ;;  %v3203_v31 = vld [vmem:[#allocation7 + $0x1b8] sm:$0xff] }
 0x2f3   : > { %v2399_v20 = vadd.f32 %v2398_v4, %v2298_v34  ;;  %v3730_v62 = vpop.eup %3729  ;;  %3613 = vmatpush3.msra.mxu1 %v3189_v3  ;;  %v3187_v14 = vld [vmem:[#allocation7 + $0x138] sm:$0xff]  ;;  %v3202_v4 = vld [vmem:[#allocation7 + $0x1b0] sm:$0xff]  ;;  %vm3066_vm12 = vcmp.eq.f32.partialorder %v4675_v38, inf  ;;  %vm3073_vm13 = vcmp.eq.f32.partialorder %v4683_v61, inf  ;;  %vm3075_vm14 = vcmp.eq.f32.partialorder %v4683_v61, 0.0  ;;  %v3196_v3 = vld [vmem:[#allocation7 + $0x180] sm:$0xff] }
 0x2f4   : > { %v2400_v19 = vpop.f32.mrf.mxu0  ;;  %v4696_v11 = vadd.f32 %v2948_v36, %v2924_v12  ;;  %v2949_v18 = vmul.f32 %v2496_v28, %v2496_v28  ;;  %v3016_v39 = vmul.f32 %v3730_v62, %v4643_v1  ;;  %v3011_v42 = vsel %vm3010_vm4, %v4638_v52, %v3009_v6  ;;  %3614 = vmatprep.subr.mxu1 %v3204_v51  ;;  %v3201_v28 = vld [vmem:[#allocation7 + $0x1a8] sm:$0xff] }
 0x2f5   : > { %v2401_v27 = vadd.f32 %v2400_v19, %v2300_v25  ;;  %v2499_v34 = vpop.f32.mrf.mxu1  ;;  %v3014_v44 = vsel %vm3012_vm5, %v3013_v29, %v3011_v42  ;;  %3615 = vmatpush3.msra.mxu1 %v3188_v16  ;;  %v3076_v19 = vand.u32 2147483648, %v4683_v61  ;;  %v3184_v29 = vld [vmem:[#allocation7 + $0x120] sm:$0xff]  ;;  %vm3068_vm15 = vcmp.eq.f32.partialorder %v4675_v38, 0.0 }
 0x2f6   : > { %3739 = vrsqrt.f32 %v4696_v11  ;;  %v4704_v12 = vadd.f32 %v2949_v18, %v2925_v15  ;;  %v2500_v47 = vadd.f32 %v2499_v34, %v2399_v20  ;;  %v3018_v55 = vsel %vm3017_vm6, %v4643_v1, %v3016_v39  ;;  %3616 = vmatprep.subr.mxu1 %v3203_v31  ;;  %v3199_v39 = vld [vmem:[#allocation7 + $0x198] sm:$0xff] }
 0x2f7   : > { %v3732_v48 = vpop.eup %3731  ;;  %v2501_v46 = vpop.f32.mrf.mxu1  ;;  %v3021_v54 = vsel %vm3019_vm7, %v3020_v41, %v3018_v55  ;;  %3617 = vmatpush3.msra.mxu1 %v3187_v14  ;;  %v3183_v41 = vld [vmem:[#allocation7 + $0x118] sm:$0xff]  ;;  %vm3094_vm0 = vcmp.eq.f32.partialorder %v4696_v11, inf  ;;  %vm3096_vm3 = vcmp.eq.f32.partialorder %v4696_v11, 0.0 }
 0x2f8   : > { %3741 = vrsqrt.f32 %v4704_v12  ;;  %v2952_v2 = vmul.f32 %v2500_v47, %v2500_v47  ;;  %v2502_v23 = vadd.f32 %v2501_v46, %v2401_v27  ;;  %3281 = vmatprep.mubr.f32.mxu0 %v3021_v54  ;;  %v3037_v1 = vmul.f32 %v3732_v48, %v4652_v21  ;;  %3618 = vmatprep.subr.mxu1 %v3202_v4  ;;  %v3198_v47 = vld [vmem:[#allocation7 + $0x190] sm:$0xff]  ;;  %v3197_v48 = vld [vmem:[#allocation7 + $0x188] sm:$0xff] }
 0x2f9   : > { %v3734_v56 = vpop.eup %3733  ;;  %3282 = vmatmul.mubr.f32.gmra.mxu0 %v3014_v44  ;;  %3619 = vmatpush3.msra.mxu1 %v3186_v10  ;;  %v3069_v27 = vand.u32 2147483648, %v4675_v38  ;;  %vm3101_vm1 = vcmp.eq.f32.partialorder %v4704_v12, inf  ;;  %v3181_v46 = vld [vmem:[#allocation7 + $0x108] sm:$0xff]  ;;  %vm3103_vm2 = vcmp.eq.f32.partialorder %v4704_v12, 0.0  ;;  %v3097_v44 = vand.u32 2147483648, %v4696_v11 }
 0x2fa   : > { %v4715_v52 = vadd.f32 %v2952_v2, %v2928_v40  ;;  %v2953_v58 = vmul.f32 %v2502_v23, %v2502_v23  ;;  %v3044_v59 = vmul.f32 %v3734_v56, %v4659_v32  ;;  %v3039_v8 = vsel %vm3038_vm8, %v4652_v21, %v3037_v1  ;;  %3620 = vmatprep.subr.mxu1 %v3201_v28  ;;  %v3200_v21 = vld [vmem:[#allocation7 + $0x1a0] sm:$0xff] }
 0x2fb   : > { %v3042_v36 = vsel %vm3040_vm11, %v3041_v17, %v3039_v8  ;;  %v3180_v1 = vld [vmem:[#allocation7 + $0x100] sm:$0xff] }
 0x2fc   : > { %3743 = vrsqrt.f32 %v4715_v52  ;;  %v4724_v15 = vadd.f32 %v2953_v58, %v2929_v0  ;;  %v3046_v25 = vsel %vm3045_vm9, %v4659_v32, %v3044_v59  ;;  %v3185_v32 = vld [vmem:[#allocation7 + $0x128] sm:$0xff]  ;;  %vm3122_vm4 = vcmp.eq.f32.partialorder %v4715_v52, inf }
 0x2fd   : > { %v3736_v7 = vpop.eup %3735  ;;  %v3049_v49 = vsel %vm3047_vm10, %v3048_v22, %v3046_v25  ;;  %3621 = vmatpush3.msra.mxu1 %v3185_v32  ;;  %v3125_v59 = vand.u32 2147483648, %v4715_v52  ;;  %vm3124_vm7 = vcmp.eq.f32.partialorder %v4715_v52, 0.0 }
 0x2fe   : > { %3745 = vrsqrt.f32 %v4724_v15  ;;  %3286 = vmatprep.mubr.f32.mxu0 %v3049_v49  ;;  %v3065_v20 = vmul.f32 %v3736_v7, %v4675_v38  ;;  %3622 = vmatprep.subr.mxu1 %v3200_v21  ;;  %vm3129_vm5 = vcmp.eq.f32.partialorder %v4724_v15, inf  ;;  %vm3131_vm6 = vcmp.eq.f32.partialorder %v4724_v15, 0.0 }
 0x2ff   : > { %v3738_v57 = vpop.eup %3737  ;;  %3287 = vmatmul.mubr.f32.gmra.mxu0 %v3042_v36  ;;  %3623 = vmatpush3.msra.mxu1 %v3184_v29 }
 0x300   : > { %v3072_v62 = vmul.f32 %v3738_v57, %v4683_v61  ;;  %v3067_v6 = vsel %vm3066_vm12, %v4675_v38, %v3065_v20  ;;  %3624 = vmatprep.subr.mxu1 %v3199_v39  ;;  %v3104_v38 = vand.u32 2147483648, %v4704_v12 }
 0x301   : > { %v3070_v42 = vsel %vm3068_vm15, %v3069_v27, %v3067_v6  ;;  %3625 = vmatpush3.msra.mxu1 %v3183_v41 }
 0x302   : > { %v3074_v18 = vsel %vm3073_vm13, %v4683_v61, %v3072_v62  ;;  %3626 = vmatprep.subr.mxu1 %v3198_v47  ;;  %v3182_v61 = vld [vmem:[#allocation7 + $0x110] sm:$0xff] }
 0x303   : > { %v3740_v33 = vpop.eup %3739  ;;  %v3077_v34 = vsel %vm3075_vm14, %v3076_v19, %v3074_v18  ;;  %3627 = vmatpush3.msra.mxu1 %v3182_v61 }
 0x304   : > { %3291 = vmatprep.mubr.f32.mxu0 %v3077_v34  ;;  %v3093_v43 = vmul.f32 %v3740_v33, %v4696_v11  ;;  %3628 = vmatprep.subr.mxu1 %v3197_v48 }
 0x305   : > { %v3742_v55 = vpop.eup %3741  ;;  %3292 = vmatmul.mubr.f32.gmra.mxu0 %v3070_v42  ;;  %3629 = vmatpush3.msra.mxu1 %v3181_v46 }
 0x306   : > { %v3100_v9 = vmul.f32 %v3742_v55, %v4704_v12  ;;  %v3095_v40 = vsel %vm3094_vm0, %v4696_v11, %v3093_v43  ;;  %3630 = vmatprep.subr.mxu1 %v3196_v3 }
 0x307   : > { %v3098_v51 = vsel %vm3096_vm3, %v3097_v44, %v3095_v40  ;;  %3631 = vmatpush3.msra.mxu1 %v3180_v1  ;;  %v2910_v40 = vmul.f32 %v4481_v53, %v4481_v53  ;;  %v2911_v1 = vmul.f32 %v4484_v5, %v4484_v5 }
 0x308   : > { %v3102_v54 = vsel %vm3101_vm1, %v4704_v12, %v3100_v9  ;;  %v3132_v12 = vand.u32 2147483648, %v4724_v15 }
 0x309   : > { %v3744_v2 = vpop.eup %3743  ;;  %v3105_v23 = vsel %vm3103_vm2, %v3104_v38, %v3102_v54 }
 0x30a   : > { %3296 = vmatprep.mubr.f32.mxu0 %v3105_v23  ;;  %v3121_v56 = vmul.f32 %v3744_v2, %v4715_v52 }
 0x30b   : > { %v3746_v0 = vpop.eup %3745  ;;  %3297 = vmatmul.mubr.f32.gmra.mxu0 %v3098_v51 }
 0x30c   : > { %v3128_v16 = vmul.f32 %v3746_v0, %v4724_v15  ;;  %v3123_v58 = vsel %vm3122_vm4, %v4715_v52, %v3121_v56 }
 0x30d   : > { %v3126_v22 = vsel %vm3124_vm7, %v3125_v59, %v3123_v58 }
 0x30e   : > { %v3130_v11 = vsel %vm3129_vm5, %v4724_v15, %v3128_v16 }
 0x30f   : > { %v3133_v31 = vsel %vm3131_vm6, %v3132_v12, %v3130_v11  ;;  %v2914_v11 = vmul.f32 %v4488_v30, %v4488_v30 }
 0x310   : > { %3301 = vmatprep.mubr.f32.mxu0 %v3133_v31 }
 0x311   : > { %3302 = vmatmul.mubr.f32.gmra.mxu0 %v3126_v22 }
 0x320   : > { %v2570_v8 = vpop.f32.mrf.mxu0 }
 0x321   : > { %v2671_v17 = vpop.f32.mrf.mxu1 }
 0x322   : > { %v2572_v14 = vpop.f32.mrf.mxu0  ;;  %v2672_v34 = vadd.f32 %v2671_v17, %v2570_v8 }
 0x323   : > { %v2673_v25 = vpop.f32.mrf.mxu1 }
 0x324   : > { %v2674_v43 = vadd.f32 %v2673_v25, %v2572_v14  ;;  %v2915_v14 = vmul.f32 %v4491_v37, %v4491_v37 }
 0x34c   : > { %v2576_v4 = vpop.f32.mrf.mxu0 }
 0x34d   : > { %v2677_v7 = vpop.f32.mrf.mxu1 }
 0x34e   : > { %v2578_v49 = vpop.f32.mrf.mxu0  ;;  %v2678_v9 = vadd.f32 %v2677_v7, %v2576_v4 }
 0x34f   : > { %v2679_v10 = vpop.f32.mrf.mxu1 }
 0x350   : > { %v2680_v44 = vadd.f32 %v2679_v10, %v2578_v49 }
 0x352   : > { %v2582_v36 = vpop.f32.mrf.mxu0 }
 0x353   : > { %v2683_v20 = vpop.f32.mrf.mxu1 }
 0x354   : > { %v2584_v28 = vpop.f32.mrf.mxu0  ;;  %v2684_v53 = vadd.f32 %v2683_v20, %v2582_v36 }
 0x355   : > { %v2685_v15 = vpop.f32.mrf.mxu1 }
 0x356   : > { %v2686_v59 = vadd.f32 %v2685_v15, %v2584_v28 }
 0x358   : > { %v2588_v57 = vpop.f32.mrf.mxu0 }
 0x359   : > { %v2689_v32 = vpop.f32.mrf.mxu1 }
 0x35a   : > { %v2590_v62 = vpop.f32.mrf.mxu0  ;;  %v2690_v25 = vadd.f32 %v2689_v32, %v2588_v57  ;;  %v2918_v57 = vmul.f32 %v4494_v45, %v4494_v45  ;;  %v2919_v32 = vmul.f32 %v4497_v60, %v4497_v60 }
 0x35b   : > { %v2691_v21 = vpop.f32.mrf.mxu1 }
 0x35c   : > { %v2692_v20 = vadd.f32 %v2691_v21, %v2590_v62 }
 0x35e   : > { %v2594_v52 = vpop.f32.mrf.mxu0 }
 0x35f   : > { %v2695_v19 = vpop.f32.mrf.mxu1 }
 0x360   : > { %v4760_v6 = vpop.f32.mrf.mxu0 }
 0x361   : > { %v4762_v29 = vpop.f32.mrf.mxu1 }
 0x364   : > { %v4764_v18 = vpop.f32.mrf.mxu0 }
 0x365   : > { %v4766_v27 = vpop.f32.mrf.mxu1 }
 0x366   : > { %v4768_v39 = vpop.f32.mrf.mxu0 }
 0x367   : > { %v4770_v33 = vpop.f32.mrf.mxu1 }
 0x36c   : > { %v2772_v41 = vpop.f32.mrf.mxu0 }
 0x36d   : > { %v2873_v42 = vpop.f32.mrf.mxu1  ;;  %v2773_v47 = vadd.f32 %v2772_v41, %v2672_v34 }
 0x36e   : > { %v2774_v55 = vpop.f32.mrf.mxu0 }
 0x36f   : > { %v2875_v61 = vpop.f32.mrf.mxu1  ;;  %v2874_v48 = vadd.f32 %v2873_v42, %v2773_v47  ;;  %v2775_v38 = vadd.f32 %v2774_v55, %v2674_v43  ;;  %v2696_v43 = vadd.f32 %v2695_v19, %v2594_v52  ;;  %v2923_v19 = vmul.f32 %v4503_v35, %v4503_v35 }
 0x370   : > { %v2778_v46 = vpop.f32.mrf.mxu0  ;;  %v2927_v35 = vmul.f32 %v4509_v63, %v4509_v63 }
 0x371   : > { %v2879_v54 = vpop.f32.mrf.mxu1  ;;  %v2934_v3 = vmul.f32 %v2874_v48, %v2874_v48  ;;  %v2876_v2 = vadd.f32 %v2875_v61, %v2775_v38  ;;  %v2779_v23 = vadd.f32 %v2778_v46, %v2678_v9  ;;  %v2922_v48 = vmul.f32 %v4500_v24, %v4500_v24 }
 0x372   : > { %v2780_v51 = vpop.f32.mrf.mxu0 }
 0x373   : > { %v2881_v56 = vpop.f32.mrf.mxu1  ;;  %v4776_v0 = vadd.f32 %v2934_v3, %v2910_v40  ;;  %v2935_v16 = vmul.f32 %v2876_v2, %v2876_v2  ;;  %v2880_v12 = vadd.f32 %v2879_v54, %v2779_v23  ;;  %v2781_v58 = vadd.f32 %v2780_v51, %v2680_v44 }
 0x374   : > { %v2784_v31 = vpop.f32.mrf.mxu0  ;;  %v2698_v44 = vadd.f32 %v4762_v29, %v4760_v6  ;;  %v2702_v3 = vadd.f32 %v4766_v27, %v4764_v18  ;;  %v2704_v6 = vadd.f32 %v4770_v33, %v4768_v39 }
 0x375   : > { %v2885_v22 = vpop.f32.mrf.mxu1  ;;  %3747 = vrsqrt.f32 %v4776_v0  ;;  %v4781_v8 = vadd.f32 %v2935_v16, %v2911_v1  ;;  %v2938_v17 = vmul.f32 %v2880_v12, %v2880_v12  ;;  %v2882_v5 = vadd.f32 %v2881_v56, %v2781_v58 }
 0x376   : > { %v2785_v4 = vadd.f32 %v2784_v31, %v2684_v53  ;;  %v2786_v7 = vpop.f32.mrf.mxu0  ;;  %v2926_v56 = vmul.f32 %v4506_v50, %v4506_v50  ;;  %v2930_v53 = vmul.f32 %v4513_v13, %v4513_v13  ;;  %v2931_v50 = vmul.f32 %v4518_v26, %v4518_v26 }
 0x377   : > { %v2887_v49 = vpop.f32.mrf.mxu1  ;;  %3749 = vrsqrt.f32 %v4781_v8  ;;  %v4786_v30 = vadd.f32 %v2938_v17, %v2914_v11  ;;  %v2939_v10 = vmul.f32 %v2882_v5, %v2882_v5  ;;  %v2787_v36 = vadd.f32 %v2786_v7, %v2686_v59 }
 0x378   : > { %v2886_v28 = vadd.f32 %v2885_v22, %v2785_v4  ;;  %v2790_v15 = vpop.f32.mrf.mxu0  ;;  %vm2996_vm8 = vcmp.eq.f32.partialorder %v4776_v0, inf  ;;  %vm2998_vm9 = vcmp.eq.f32.partialorder %v4776_v0, 0.0  ;;  %v2999_v13 = vand.u32 2147483648, %v4776_v0 }
 0x379   : > { %v2891_v34 = vpop.f32.mrf.mxu1  ;;  %3751 = vrsqrt.f32 %v4786_v30  ;;  %v4789_v41 = vadd.f32 %v2939_v10, %v2915_v14  ;;  %v2888_v42 = vadd.f32 %v2887_v49, %v2787_v36  ;;  %v2791_v37 = vadd.f32 %v2790_v15, %v2690_v25 }
 0x37a   : > { %v2942_v47 = vmul.f32 %v2886_v28, %v2886_v28  ;;  %v2792_v55 = vpop.f32.mrf.mxu0  ;;  %vm3003_vm10 = vcmp.eq.f32.partialorder %v4781_v8, inf  ;;  %v3006_v10 = vand.u32 2147483648, %v4781_v8  ;;  %vm3005_vm11 = vcmp.eq.f32.partialorder %v4781_v8, 0.0 }
 0x37b   : > { %v2893_v61 = vpop.f32.mrf.mxu1  ;;  %3753 = vrsqrt.f32 %v4789_v41  ;;  %v2943_v62 = vmul.f32 %v2888_v42, %v2888_v42  ;;  %v2892_v21 = vadd.f32 %v2891_v34, %v2791_v37  ;;  %v2793_v9 = vadd.f32 %v2792_v55, %v2692_v20 }
 0x37c   : > { %v4798_v38 = vadd.f32 %v2942_v47, %v2918_v57  ;;  %v2796_v40 = vpop.f32.mrf.mxu0  ;;  %vm3024_vm12 = vcmp.eq.f32.partialorder %v4786_v30, inf  ;;  %vm3031_vm13 = vcmp.eq.f32.partialorder %v4789_v41, inf  ;;  %vm3033_vm14 = vcmp.eq.f32.partialorder %v4789_v41, 0.0 }
 0x37d   : > { %v2897_v46 = vpop.f32.mrf.mxu1  ;;  %v4800_v45 = vadd.f32 %v2943_v62, %v2919_v32  ;;  %v2946_v54 = vmul.f32 %v2892_v21, %v2892_v21  ;;  %v2894_v60 = vadd.f32 %v2893_v61, %v2793_v9  ;;  %v2797_v52 = vadd.f32 %v2796_v40, %v2696_v43 }
 0x37e   : > { %3755 = vrsqrt.f32 %v4798_v38  ;;  %v2798_v24 = vpop.f32.mrf.mxu0  ;;  %v3027_v62 = vand.u32 2147483648, %v4786_v30  ;;  %vm3026_vm15 = vcmp.eq.f32.partialorder %v4786_v30, 0.0  ;;  %vm3052_vm0 = vcmp.eq.f32.partialorder %v4798_v38, inf }
 0x37f   : > { %v2899_v2 = vpop.f32.mrf.mxu1  ;;  %3757 = vrsqrt.f32 %v4800_v45  ;;  %v4810_v23 = vadd.f32 %v2946_v54, %v2922_v48  ;;  %v2947_v1 = vmul.f32 %v2894_v60, %v2894_v60  ;;  %v2898_v51 = vadd.f32 %v2897_v46, %v2797_v52 }
 0x380   : > { %v2799_v29 = vadd.f32 %v2798_v24, %v2698_v44  ;;  %v2802_v18 = vpop.f32.mrf.mxu0  ;;  %vm3059_vm1 = vcmp.eq.f32.partialorder %v4800_v45, inf  ;;  %vm3061_vm2 = vcmp.eq.f32.partialorder %v4800_v45, 0.0  ;;  %vm3054_vm3 = vcmp.eq.f32.partialorder %v4798_v38, 0.0 }
 0x381   : > { %v2903_v27 = vpop.f32.mrf.mxu1  ;;  %3759 = vrsqrt.f32 %v4810_v23  ;;  %v4819_v16 = vadd.f32 %v2947_v1, %v2923_v19  ;;  %v2950_v12 = vmul.f32 %v2898_v51, %v2898_v51  ;;  %v2803_v58 = vadd.f32 %v2802_v18, %v2702_v3 }
 0x382   : > { %v3748_v11 = vpop.eup %3747  ;;  %v2900_v63 = vadd.f32 %v2899_v2, %v2799_v29  ;;  %v2804_v59 = vpop.f32.mrf.mxu0  ;;  %vm3080_vm4 = vcmp.eq.f32.partialorder %v4810_v23, inf  ;;  %vm3082_vm7 = vcmp.eq.f32.partialorder %v4810_v23, 0.0 }
 0x383   : > { %3761 = vrsqrt.f32 %v4819_v16  ;;  %v4827_v39 = vadd.f32 %v2950_v12, %v2926_v56  ;;  %v2904_v33 = vadd.f32 %v2903_v27, %v2803_v58  ;;  %v2805_v31 = vadd.f32 %v2804_v59, %v2704_v6  ;;  %v2905_v5 = vpop.f32.mrf.mxu1 }
 0x384   : > { %v3750_v22 = vpop.eup %3749  ;;  %v2951_v17 = vmul.f32 %v2900_v63, %v2900_v63  ;;  %v2995_v14 = vmul.f32 %v3748_v11, %v4776_v0  ;;  %vm3087_vm5 = vcmp.eq.f32.partialorder %v4819_v16, inf  ;;  %vm3089_vm6 = vcmp.eq.f32.partialorder %v4819_v16, 0.0 }
 0x385   : > { %3763 = vrsqrt.f32 %v4827_v39  ;;  %v2954_v26 = vmul.f32 %v2904_v33, %v2904_v33  ;;  %v2906_v25 = vadd.f32 %v2905_v5, %v2805_v31  ;;  %v3002_v4 = vmul.f32 %v3750_v22, %v4781_v8 }
 0x386   : > { %v3752_v7 = vpop.eup %3751  ;;  %v4834_v49 = vadd.f32 %v2951_v17, %v2927_v35  ;;  %v2997_v36 = vsel %vm2996_vm8, %v4776_v0, %v2995_v14  ;;  %vm3108_vm8 = vcmp.eq.f32.partialorder %v4827_v39, inf }
 0x387   : > { %v4841_v20 = vadd.f32 %v2954_v26, %v2930_v53  ;;  %v2955_v28 = vmul.f32 %v2906_v25, %v2906_v25  ;;  %v3004_v15 = vsel %vm3003_vm10, %v4781_v8, %v3002_v4  ;;  %v3023_v37 = vmul.f32 %v3752_v7, %v4786_v30 }
 0x388   : > { %v3754_v34 = vpop.eup %3753  ;;  %3765 = vrsqrt.f32 %v4834_v49  ;;  %v3007_v42 = vsel %vm3005_vm11, %v3006_v10, %v3004_v15  ;;  %v3000_v32 = vsel %vm2998_vm9, %v2999_v13, %v2997_v36  ;;  %v3034_v8 = vand.u32 2147483648, %v4789_v41 }
 0x389   : > { %3767 = vrsqrt.f32 %v4841_v20  ;;  %v4849_v57 = vadd.f32 %v2955_v28, %v2931_v50  ;;  %3371 = vmatprep.mubr.f32.mxu1 %v3007_v42  ;;  %v3030_v43 = vmul.f32 %v3754_v34, %v4789_v41  ;;  %v3025_v47 = vsel %vm3024_vm12, %v4786_v30, %v3023_v37 }
 0x38a   : > { %3372 = vmatmul.mubr.f32.vlgmr.msra.gmra.mxu1 %v3000_v32  ;;  %v3028_v48 = vsel %vm3026_vm15, %v3027_v62, %v3025_v47  ;;  %v3055_v30 = vand.u32 2147483648, %v4798_v38  ;;  %vm3115_vm9 = vcmp.eq.f32.partialorder %v4834_v49, inf  ;;  %vm3117_vm10 = vcmp.eq.f32.partialorder %v4834_v49, 0.0 }
 0x38b   : > { %v3756_v55 = vpop.eup %3755  ;;  %3769 = vrsqrt.f32 %v4849_v57  ;;  %v3032_v61 = vsel %vm3031_vm13, %v4789_v41, %v3030_v43  ;;  %v3062_v41 = vand.u32 2147483648, %v4800_v45  ;;  %v3111_v53 = vand.u32 2147483648, %v4827_v39 }
 0x38c   : > { %v3758_v0 = vpop.eup %3757  ;;  %v3035_v21 = vsel %vm3033_vm14, %v3034_v8, %v3032_v61  ;;  %v3051_v9 = vmul.f32 %v3756_v55, %v4798_v38  ;;  %vm3110_vm11 = vcmp.eq.f32.partialorder %v4827_v39, 0.0  ;;  %vm3143_vm12 = vcmp.eq.f32.partialorder %v4849_v57, inf }
 0x38d   : > { %3376 = vmatprep.mubr.f32.mxu1 %v3035_v21  ;;  %v3058_v40 = vmul.f32 %v3758_v0, %v4800_v45  ;;  %v3146_v33 = vand.u32 2147483648, %v4849_v57  ;;  %vm3136_vm13 = vcmp.eq.f32.partialorder %v4841_v20, inf  ;;  %vm3145_vm14 = vcmp.eq.f32.partialorder %v4849_v57, 0.0 }
 0x38e   : > { %v3760_v46 = vpop.eup %3759  ;;  %3377 = vmatmul.mubr.f32.gmra.mxu1 %v3028_v48  ;;  %v3053_v54 = vsel %vm3052_vm0, %v4798_v38, %v3051_v9  ;;  %v3083_v38 = vand.u32 2147483648, %v4810_v23  ;;  %vm3138_vm15 = vcmp.eq.f32.partialorder %v4841_v20, 0.0 }
 0x38f   : > { %v3060_v60 = vsel %vm3059_vm1, %v4800_v45, %v3058_v40  ;;  %v3079_v52 = vmul.f32 %v3760_v46, %v4810_v23  ;;  %v3056_v3 = vsel %vm3054_vm3, %v3055_v30, %v3053_v54  ;;  %v3090_v45 = vand.u32 2147483648, %v4819_v16 }
 0x390   : > { %v3762_v19 = vpop.eup %3761  ;;  %v3063_v44 = vsel %vm3061_vm2, %v3062_v41, %v3060_v60 }
 0x391   : > { %3381 = vmatprep.mubr.f32.mxu1 %v3063_v44  ;;  %v3086_v24 = vmul.f32 %v3762_v19, %v4819_v16  ;;  %v3081_v1 = vsel %vm3080_vm4, %v4810_v23, %v3079_v52 }
 0x392   : > { %v3764_v2 = vpop.eup %3763  ;;  %3382 = vmatmul.mubr.f32.gmra.mxu1 %v3056_v3  ;;  %v3084_v29 = vsel %vm3082_vm7, %v3083_v38, %v3081_v1 }
 0x393   : > { %v3088_v51 = vsel %vm3087_vm5, %v4819_v16, %v3086_v24  ;;  %v3107_v56 = vmul.f32 %v3764_v2, %v4827_v39  ;;  %v3118_v16 = vand.u32 2147483648, %v4834_v49 }
 0x394   : > { %v3091_v35 = vsel %vm3089_vm6, %v3090_v45, %v3088_v51 }
 0x395   : > { %v3766_v6 = vpop.eup %3765  ;;  %3386 = vmatprep.mubr.f32.mxu1 %v3091_v35  ;;  %v3109_v12 = vsel %vm3108_vm8, %v4827_v39, %v3107_v56  ;;  %v3139_v39 = vand.u32 2147483648, %v4841_v20 }
 0x396   : > { %v3768_v18 = vpop.eup %3767  ;;  %3387 = vmatmul.mubr.f32.gmra.mxu1 %v3084_v29  ;;  %v3114_v27 = vmul.f32 %v3766_v6, %v4834_v49  ;;  %v3112_v59 = vsel %vm3110_vm11, %v3111_v53, %v3109_v12 }
 0x397   : > { %v3135_v58 = vmul.f32 %v3768_v18, %v4841_v20 }
 0x398   : > { %v3770_v11 = vpop.eup %3769  ;;  %v3116_v23 = vsel %vm3115_vm9, %v4834_v49, %v3114_v27 }
 0x399   : > { %v3119_v50 = vsel %vm3117_vm10, %v3118_v16, %v3116_v23  ;;  %v3142_v63 = vmul.f32 %v3770_v11, %v4849_v57  ;;  %v3137_v22 = vsel %vm3136_vm13, %v4841_v20, %v3135_v58 }
 0x39a   : > { %3391 = vmatprep.mubr.f32.mxu1 %v3119_v50  ;;  %v3140_v5 = vsel %vm3138_vm15, %v3139_v39, %v3137_v22 }
 0x39b   : > { %3392 = vmatmul.mubr.f32.gmra.mxu1 %v3112_v59  ;;  %v3144_v31 = vsel %vm3143_vm12, %v4849_v57, %v3142_v63 }
 0x39c   : > { %v3147_v17 = vsel %vm3145_vm14, %v3146_v33, %v3144_v31 }
 0x39d   : > { %3396 = vmatprep.mubr.f32.mxu1 %v3147_v17 }
 0x39f   : > { %3397 = vmatmul.mubr.f32.gmra.mxu1 %v3140_v5 }
 0x3b2   : > { %v3582_v14 = vpop.f32.mrf.mxu0 }
 0x3b4   : > { %v3583_v13 = vpop.f32.mrf.mxu0 }
 0x3b5   : > { %v3584_v47 = vadd.f32 %v3583_v13, %v3582_v14 }
 0x3b9   : > { %v3585_v26 = vpop.f32.mrf.mxu0 }
 0x3bb   : > { %v3586_v25 = vpop.f32.mrf.mxu0 }
 0x3bc   : > { %v3587_v55 = vadd.f32 %v3586_v25, %v3585_v26 }
 0x3bf   : > { %v3588_v4 = vpop.f32.mrf.mxu0 }
 0x3c1   : > { %v3589_v7 = vpop.f32.mrf.mxu0 }
 0x3c2   : > { %v3590_v54 = vadd.f32 %v3589_v7, %v3588_v4 }
 0x3c5   : > { %v3591_v49 = vpop.f32.mrf.mxu0 }
 0x3c7   : > { %v3592_v28 = vpop.f32.mrf.mxu0 }
 0x3c8   : > { %v3593_v62 = vadd.f32 %v3592_v28, %v3591_v49 }
 0x3cb   : > { %v3594_v42 = vpop.f32.mrf.mxu0 }
 0x3cd   : > { %v3595_v43 = vpop.f32.mrf.mxu0 }
 0x3ce   : > { %v3596_v19 = vadd.f32 %v3595_v43, %v3594_v42 }
 0x3d1   : > { %v3597_v9 = vpop.f32.mrf.mxu0 }
 0x3d3   : > { %v3598_v44 = vpop.f32.mrf.mxu0 }
 0x3d4   : > { %v3599_v51 = vadd.f32 %v3598_v44, %v3597_v9 }
 0x44a   : > { %v3632_v10 = vpop.f32.mrf.mxu1 }
 0x44c   : > { %v3633_v36 = vpop.f32.mrf.mxu1 }
 0x44d   : > { %v3634_v32 = vadd.f32 %v3633_v36, %v3632_v10 }
 0x44e   : > { %v3635_v15 = vpop.f32.mrf.mxu1 }
 0x44f   : > { %v3374_v0 = vadd.f32 %v3634_v32, %v3584_v47 }
 0x450   : > { %v3636_v34 = vpop.f32.mrf.mxu1 }
 0x451   : > { %v3637_v20 = vadd.f32 %v3636_v34, %v3635_v15  ;;  %v3402_v60 = vmax.f32 %v3374_v0, 1e-07 }
 0x452   : > { %v3638_v37 = vpop.f32.mrf.mxu1 }
 0x453   : > { %v3379_v48 = vadd.f32 %v3637_v20, %v3587_v55 }
 0x454   : > { %v3639_v57 = vpop.f32.mrf.mxu1 }
 0x455   : > { %v3640_v40 = vadd.f32 %v3639_v57, %v3638_v37  ;;  %v3403_v3 = vmax.f32 %v3379_v48, 1e-07 }
 0x456   : > { %v3641_v8 = vpop.f32.mrf.mxu1 }
 0x457   : > { %v3384_v24 = vadd.f32 %v3640_v40, %v3590_v54 }
 0x458   : > { %v3642_v61 = vpop.f32.mrf.mxu1 }
 0x459   : > { %v3643_v21 = vadd.f32 %v3642_v61, %v3641_v8  ;;  %v3404_v56 = vmax.f32 %v3384_v24, 1e-07 }
 0x45b   : > { %v3389_v46 = vadd.f32 %v3643_v21, %v3593_v62  ;;  %v3644_v41 = vpop.f32.mrf.mxu1 }
 0x45d   : > { %v3405_v30 = vmax.f32 %v3389_v46, 1e-07  ;;  %v3645_v52 = vpop.f32.mrf.mxu1 }
 0x45e   : > { %v3646_v2 = vadd.f32 %v3645_v52, %v3644_v41 }
 0x45f   : > { %v3647_v45 = vpop.f32.mrf.mxu1  ;;  %3771 = vlog2.f32 %v3405_v30 }
 0x460   : > { %v3394_v1 = vadd.f32 %v3646_v2, %v3596_v19  ;;  %3773 = vlog2.f32 %v3402_v60 }
 0x461   : > { %v3648_v38 = vpop.f32.mrf.mxu1  ;;  %3775 = vlog2.f32 %v3403_v3 }
 0x462   : > { %v3406_v35 = vmax.f32 %v3394_v1, 1e-07  ;;  %v3649_v6 = vadd.f32 %v3648_v38, %v3647_v45 }
 0x464   : > { %3777 = vlog2.f32 %v3406_v35  ;;  %v3399_v29 = vadd.f32 %v3649_v6, %v3599_v51 }
 0x465   : > { %3779 = vlog2.f32 %v3404_v56 }
 0x466   : > { %v3407_v18 = vmax.f32 %v3399_v29, 1e-07 }
 0x468   : > { %3781 = vlog2.f32 %v3407_v18 }
 0x46c   : > { %v3772_v27 = vpop.eup %3771 }
 0x46d   : > { %v3774_v16 = vpop.eup %3773  ;;  %v3415_v58 = vmul.f32 0.6931472, %v3772_v27 }
 0x46e   : > { %v3776_v12 = vpop.eup %3775  ;;  %v3409_v23 = vmul.f32 0.6931472, %v3774_v16 }
 0x46f   : > { %v3411_v53 = vmul.f32 0.6931472, %v3776_v12 }
 0x470   : > { %v3420_v59 = vsub.f32 %v3409_v23, %v3415_v58 }
 0x471   : > { %v3778_v11 = vpop.eup %3777 }
 0x472   : > { %v3417_v50 = vmul.f32 0.6931472, %v3778_v11  ;;  %v3780_v63 = vpop.eup %3779  ;;  %v3423_v5 = vand.u32 2147483647, %v3420_v59 }
 0x473   : > { %v3413_v22 = vmul.f32 0.6931472, %v3780_v63 }
 0x474   : > { %v3421_v33 = vsub.f32 %v3411_v53, %v3417_v50 }
 0x475   : > { %v3782_v31 = vpop.eup %3781 }
 0x476   : > { %v3424_v17 = vand.u32 2147483647, %v3421_v33  ;;  %v3419_v39 = vmul.f32 0.6931472, %v3782_v31 }
 0x478   : > { %v3422_v14 = vsub.f32 %v3413_v22, %v3419_v39  ;;  %v3426_v13 = vadd.f32 %v3424_v17, %v3423_v5 }
 0x47a   : > { %v3425_v26 = vand.u32 2147483647, %v3422_v14 }
 0x47c   : > { %v3427_v25 = vadd.f32 %v3426_v13, %v3425_v26 }
 0x47e   : > { %3428 = vst [vmem:[%s218_s27] sm:$0xff] %v3427_v25 }
 0x47f   : > { %4020 = shalt.err (!%p4017_p3)
}
 0x480   : > { %s4021_s23 = scalar_lea.hbm %s3441_s5, 128  ;;  %s4025_s7 = scalar_lea.hbm %s4941_s3, 256 }
 0x481   : > { %p4022_p2 = scmp.ne.s32.totalorder %s3441_s5, %s4021_s23  ;;  %p4026_p4 = scmp.lt.s32.totalorder %s3441_s5, %s4941_s3 }
 0x482   : > { %p4027_p6 = scmp.lt.s32.totalorder %s4025_s7, %s4021_s23 }
 0x483   : > { %p4023_p9 = pnand %p4022_p2, %p4956_p11 }
 0x484   : > { %p4028_p8 = por %p4027_p6, %p4026_p4 }
 0x485   : > { %p4024_p1 = pneg %p4023_p9 }
 0x487   : > { %p4029_p10 = pnand %p4028_p8, %p4024_p1 }
 0x489   : > { %4032 = shalt.err (!%p4029_p10)
}
 0x48a   : > { %3662 = dma.vmem_to_hbm [thread:$0]  (%p4956_p11), %s3444_s28, 128, %s3441_s5, %s3430_s6  }
 0x48b PF: > { %s3455_s11 = sand.u32 1, %s4063_s12   ;;  %p4957_p7 = scmp.ne.s32.totalorder %s4947_s19, 0 }
 0x48c   : > { %p4958_p12 = scmp.ge.s32.totalorder %s4075_s15, 2  ;;  %s3456_s18 = scalar_lea.sflag [#allocation4], %s3455_s11 }
 0x48e   : > { %p3676_p13 = pnand %p4958_p12, %p4957_p7 }
 0x490   : > { %p3677_p0 = pneg %p3676_p13 }
 0x492   : > { %4058 = dma.done.wait (%p3677_p0), %s3456_s18, 128  }
 0x493   : > { %4060 = vsyncadd (%p3677_p0), %s3456_s18, 4294967168  ;;  %p17_p5 = scmp.ge.s32.totalorder %s4180_s9, 4   ;;  %s4959_s12 = smov %s4067_s13 }
 0x494   : > { %s4960_s13 = smov %s4071_s14  ;;  %s4961_s14 = smov %s4189_s17 }
 0x495   : > { %s4962_s15 = smov %s4180_s9  ;;  %19 = sbr.rel (!%p17_p5) target bundleno = 6 (0x6), region = 85 }
 0x49a   :  { %3461 = vsyncpa [#allocation3], 1 }
 0x49b   :  { %3463 = vsyncpa [#allocation3 + $0x1], 1 }
 0x49c   :  { %3464 = vsyncpa [#allocation6], 1 }
 0x49d   :  { %3465 = vsyncpa [#allocation4], 1 }
 0x49e   :  { %3467 = vsyncpa [#allocation4 + $0x1], 1 }

</bundles_post_ra>
